<compile_context>
chip_gen: v7x
topology: tpu7x:2x2x1
jax: 0.10.0
libtpu: 0.0.40
codegen_flags: <defaults>
</compile_context>

<pallas_src>
import functools

import jax
import jax.numpy as jnp
from jax.experimental import pallas as pl
from jax.experimental.pallas import tpu as pltpu

NEG_SLOPE = 0.01        # torch.nn.LeakyReLU default negative_slope
_NEG_BIG = -1e30        # finite "minus infinity" for masked per-head maxes


def _leaky_relu(x):
    return jnp.where(x > 0, x, NEG_SLOPE * x)


def _round_up(x, m):
    return (x + m - 1) // m * m


def _choose_batch_tile(batch, block_b):
    """Batch tile: multiple of 8, <= block_b, minimal padding.

    Prefers an even number of equally sized grid steps (keeps both of v7x's
    TensorCores busy under dimension_semantics=("parallel",)) as long as each
    tile stays in the large-tile HBM-roofline regime (>= 512 rows)."""
    b8 = _round_up(batch, 8)
    if b8 <= block_b:
        half = b8 // 2
        if half >= 512 and half % 8 == 0:
            return half                     # two balanced tiles for dual-TC chips
        return b8                           # single tile, zero tile padding
    n = pl.cdiv(b8, block_b)
    if n % 2:
        n += 1                              # even, balanced grid for v7x's 2 TCs
    return _round_up(pl.cdiv(b8, n), 8)


def _apple_kernel(
    obs_ref,                        # (TB, obs_dim) f32: [backbone | latent]
    w0_ref, b0_ref,                 # backbone layer 0
    w1_ref, b1_ref,                 # backbone layer 1
    wfuse_ref, bfuse_ref,           # fused [attention | head/value layer-0 feats part]
    head_oh_ref,                    # (H, H*L) one-hot lane masks per head
    seg2_ref,                       # (2*H*L, 2*H) block-diag segment matrix
    whv0a_ref,                      # (H, 2*h2) head/value layer-0 latent-attention part
    wout_ref, bout_ref,             # fused block-diagonal layer 1, 128-lane padded
    out_ref,                        # (TB, 128): [:, :num_outputs]=logits, [:, num_outputs]=vf
    *,
    compute_dtype, num_heads, latent_size, d_bb, hl,
):
    cd = compute_dtype
    obs = obs_ref[...]                                   # (TB, obs_dim) f32
    x = obs[:, :d_bb].astype(cd)                         # backbone input
    lat = obs[:, d_bb:]                                  # (TB, L) f32 latent slice

    # backbone: Linear -> LeakyReLU -> Linear -> LeakyReLU (f32 accumulation)
    h0 = _leaky_relu(
        jnp.dot(x, w0_ref[...], preferred_element_type=jnp.float32) + b0_ref[...])
    feats = _leaky_relu(
        jnp.dot(h0.astype(cd), w1_ref[...], preferred_element_type=jnp.float32)
        + b1_ref[...])
    feats_c = feats.astype(cd)

    # one fused MXU pass over feats: [attention logits | policy/value layer-0 part]
    y = (jnp.dot(feats_c, wfuse_ref[...], preferred_element_type=jnp.float32)
         + bfuse_ref[...])
    att = y[:, :hl]                                      # (TB, H*L)
    hid0 = y[:, hl:]                                     # (TB, 2*h2), bh0|bv0 folded in

    # numerically-safe per-head max subtraction (den >= 1 for every head)
    head_oh = head_oh_ref[...]                           # (H, H*L)
    max_b = jnp.zeros_like(att)
    for h in range(num_heads):
        m = head_oh[h:h + 1, :] > 0.5                    # (1, H*L)
        mh = jnp.max(jnp.where(m, att, _NEG_BIG), axis=-1, keepdims=True)
        max_b = jnp.where(m, mh, max_b)
    e = jnp.exp(att - max_b)                             # (TB, H*L) f32, each lane uses its head's max

    # replicate the latent across heads in VMEM (HBM ships only L lanes per row)
    lat_t = jnp.concatenate([lat] * num_heads, axis=-1)  # (TB, H*L)

    # per-head numerators AND denominators with one MXU push vs block-diag seg
    e2 = jnp.concatenate([e * lat_t, e], axis=-1)        # (TB, 2*H*L)
    nd = jnp.dot(e2, seg2_ref[...], preferred_element_type=jnp.float32)  # (TB, 2*H)
    latent_att = nd[:, :num_heads] / nd[:, num_heads:]   # exact divide (torch parity)

    # fused policy+value heads
    hid = _leaky_relu(
        hid0 + jnp.dot(latent_att.astype(cd), whv0a_ref[...],
                       preferred_element_type=jnp.float32))
    out_ref[...] = (
        jnp.dot(hid.astype(cd), wout_ref[...], preferred_element_type=jnp.float32)
        + bout_ref[...]
    ).astype(out_ref.dtype)


def prepare_apple_params(params, *, latent_size, num_heads, num_outputs,
                         compute_dtype=jnp.bfloat16):
    """One-time (per parameter set) weight preparation for the Pallas kernel.

    All concats, block-diagonal scatters, segment matrices and dtype casts are
    hoisted here so the per-call forward streams only `obs` plus these
    prepared arrays (review item: hoist weight prep out of the forward path)."""
    cd = compute_dtype
    h1 = params["w1"].shape[1]
    h2 = params["wh1"].shape[0]
    hl = num_heads * latent_size
    out_pad = _round_up(max(num_outputs + 1, 128), 128)   # lane-dense output width

    wh0, wv0 = params["wh0"], params["wv0"]               # (h1+H, h2)
    whv0_f = jnp.concatenate([wh0[:h1], wv0[:h1]], axis=1)   # (h1, 2*h2)
    whv0_a = jnp.concatenate([wh0[h1:], wv0[h1:]], axis=1)   # (H,  2*h2)
    bhv0 = jnp.concatenate([params["bh0"], params["bv0"]], axis=1)

    # fused RHS for every matmul that consumes feats: [wa | whv0_f]
    w_fuse = jnp.concatenate([params["wa"], whv0_f], axis=1).astype(cd)
    b_fuse = jnp.concatenate([params["ba"], bhv0], axis=1).astype(jnp.float32)

    # block-diagonal [[wh1, 0], [0, wv1]], padded to 128 output lanes
    w_out = jnp.zeros((2 * h2, out_pad), jnp.float32)
    w_out = w_out.at[:h2, :num_outputs].set(params["wh1"])
    w_out = w_out.at[h2:, num_outputs].set(params["wv1"][:, 0])
    b_out = jnp.zeros((1, out_pad), jnp.float32)
    b_out = b_out.at[0, :num_outputs].set(params["bh1"][0])
    b_out = b_out.at[0, num_outputs].set(params["bv1"][0, 0])

    # per-head one-hot lane masks + block-diag segment matrix for fused num/den
    head_oh = ((jnp.arange(hl)[None, :] // latent_size)
               == jnp.arange(num_heads)[:, None]).astype(jnp.float32)   # (H, H*L)
    seg = head_oh.T                                                      # (H*L, H)
    z = jnp.zeros_like(seg)
    seg2 = jnp.concatenate(
        [jnp.concatenate([seg, z], axis=1),
         jnp.concatenate([z, seg], axis=1)], axis=0)                     # (2*H*L, 2*H)

    weights = [
        params["w0"].astype(cd), params["b0"].astype(jnp.float32),
        params["w1"].astype(cd), params["b1"].astype(jnp.float32),
        w_fuse, b_fuse,
        head_oh, seg2,
        whv0_a.astype(cd),
        w_out.astype(cd), b_out,
    ]
    return dict(weights=weights, latent_size=latent_size, num_heads=num_heads,
                num_outputs=num_outputs, hl=hl, out_pad=out_pad, compute_dtype=cd)


def apple_picking_forward(obs, prep, *, block_b=1024, out_dtype=jnp.float32):
    """Pallas forward of ApplePickingDistributionModel.

    Returns (logits (B, num_outputs) f32, vf (B,) f32), matching the torch
    forward (logits + value_function)."""
    latent_size = prep["latent_size"]
    num_heads = prep["num_heads"]
    num_outputs = prep["num_outputs"]
    hl = prep["hl"]
    out_pad = prep["out_pad"]
    cd = prep["compute_dtype"]
    weights = prep["weights"]

    B, obs_dim = obs.shape
    d_bb = obs_dim - latent_size
    obs = obs.astype(jnp.float32)

    tb = _choose_batch_tile(B, block_b)
    b_pad = _round_up(B, tb)
    if b_pad != B:
        obs = jnp.pad(obs, ((0, b_pad - B), (0, 0)))

    kernel = functools.partial(
        _apple_kernel, compute_dtype=cd, num_heads=num_heads,
        latent_size=latent_size, d_bb=d_bb, hl=hl)

    in_specs = [pl.BlockSpec((tb, obs_dim), lambda i: (i, 0))] + [
        pl.BlockSpec(w.shape, lambda i: (0, 0)) for w in weights
    ]

    # Scoped-VMEM estimate (double-buffered activation tiles + weights).  Only
    # request more than the per-generation defaults for very large batch tiles
    # (v5e's default scoped VMEM is 16 MiB); cap well under v7x's 64 MiB.
    out_itemsize = jnp.dtype(out_dtype).itemsize
    weight_bytes = sum(int(w.size) * w.dtype.itemsize for w in weights)
    vmem_est = 2 * tb * obs_dim * 4 + 2 * tb * out_pad * out_itemsize + 2 * weight_bytes
    vmem_limit = None
    if vmem_est > 12 * 2**20:
        vmem_limit = int(min(2 * vmem_est, 48 * 2**20))

    out = pl.pallas_call(
        kernel,
        out_shape=jax.ShapeDtypeStruct((b_pad, out_pad), out_dtype),
        grid=(b_pad // tb,),
        in_specs=in_specs,
        out_specs=pl.BlockSpec((tb, out_pad), lambda i: (i, 0)),
        compiler_params=pltpu.CompilerParams(
            dimension_semantics=("parallel",),     # shards batch over v7x's 2 TCs
            vmem_limit_bytes=vmem_limit,
        ),
    )(obs, *weights)

    logits = out[:B, :num_outputs].astype(jnp.float32)
    vf = out[:B, num_outputs].astype(jnp.float32)
    return logits, vf


def _reference_forward(obs, params, *, latent_size, num_heads):
    """Pure-JAX transcription of the torch forward pass for verification."""
    obs = obs.astype(jnp.float32)
    x = obs[:, :-latent_size]
    lat = obs[:, -latent_size:]
    h = _leaky_relu(x @ params["w0"] + params["b0"])
    feats = _leaky_relu(h @ params["w1"] + params["b1"])
    att = (feats @ params["wa"] + params["ba"]).reshape(-1, num_heads, latent_size)
    att = jax.nn.softmax(att, axis=-1)
    latent_att = (att * lat[:, None, :]).sum(2)
    head_in = jnp.concatenate([feats, latent_att], axis=1)
    hh = _leaky_relu(head_in @ params["wh0"] + params["bh0"])
    logits = hh @ params["wh1"] + params["bh1"]
    hv = _leaky_relu(head_in @ params["wv0"] + params["bv0"])
    vf = (hv @ params["wv1"] + params["bv1"])[:, 0]
    return logits, vf


def _init_params(key, *, obs_dim, latent_size, hiddens, num_heads, num_outputs):
    h0, h1, h2 = hiddens
    d_bb = obs_dim - latent_size
    shapes = {
        "w0": (d_bb, h0), "b0": (1, h0),
        "w1": (h0, h1), "b1": (1, h1),
        "wa": (h1, num_heads * latent_size), "ba": (1, num_heads * latent_size),
        "wh0": (h1 + num_heads, h2), "bh0": (1, h2),
        "wh1": (h2, num_outputs), "bh1": (1, num_outputs),
        "wv0": (h1 + num_heads, h2), "bv0": (1, h2),
        "wv1": (h2, 1), "bv1": (1, 1),
    }
    params = {}
    for i, (name, shp) in enumerate(sorted(shapes.items())):
        params[name] = 0.1 * jax.random.normal(
            jax.random.fold_in(key, i), shp, dtype=jnp.float32)
    return params


if __name__ == "__main__":
    # Small, forward-consistent demo shapes (module default latent_size=1000 is
    # kept small here).  num_heads=4 because the torch forward hard-codes
    # reshape(-1, 4, latent_size).
    B = 384
    latent_size = 32
    num_heads = 4
    obs_dim = 64                # backbone input dim = obs_dim - latent_size = 32
    hiddens = (32, 32, 32)      # model_config['fcnet_hiddens']
    num_outputs = 8

    key = jax.random.PRNGKey(0)
    obs = jax.random.normal(jax.random.fold_in(key, 100), (B, obs_dim), jnp.float32)
    params = _init_params(
        key, obs_dim=obs_dim, latent_size=latent_size,
        hiddens=hiddens, num_heads=num_heads, num_outputs=num_outputs)

    ref_logits, ref_vf = _reference_forward(
        obs, params, latent_size=latent_size, num_heads=num_heads)

    # f32 path — exact module semantics (single 384-row tile, zero padding)
    prep_f32 = prepare_apple_params(
        params, latent_size=latent_size, num_heads=num_heads,
        num_outputs=num_outputs, compute_dtype=jnp.float32)
    logits, vf = apple_picking_forward(obs, prep_f32)
    jax.block_until_ready((logits, vf))
    assert logits.shape == (B, num_outputs) and vf.shape == (B,)
    assert jnp.allclose(logits, ref_logits, atol=1e-3, rtol=1e-3)
    assert jnp.allclose(vf, ref_vf, atol=1e-3, rtol=1e-3)

    # exercise the multi-tile, even-grid path (4 balanced 96-row tiles)
    logits_g, vf_g = apple_picking_forward(obs, prep_f32, block_b=128)
    jax.block_until_ready((logits_g, vf_g))
    assert jnp.allclose(logits_g, ref_logits, atol=1e-3, rtol=1e-3)
    assert jnp.allclose(vf_g, ref_vf, atol=1e-3, rtol=1e-3)

    # exercise the ragged-batch path (B=100 -> pad to 104 rows)
    B2 = 100
    ref_logits2, ref_vf2 = _reference_forward(
        obs[:B2], params, latent_size=latent_size, num_heads=num_heads)
    logits2, vf2 = apple_picking_forward(obs[:B2], prep_f32)
    jax.block_until_ready((logits2, vf2))
    assert jnp.allclose(logits2, ref_logits2, atol=1e-3, rtol=1e-3)
    assert jnp.allclose(vf2, ref_vf2, atol=1e-3, rtol=1e-3)

    # recommended production path: bf16 matmul operands (MXU-native on
    # v5e/v6e/v7x), f32 on-chip accumulation, bf16 lane-dense output writeback
    prep_bf16 = prepare_apple_params(
        params, latent_size=latent_size, num_heads=num_heads,
        num_outputs=num_outputs, compute_dtype=jnp.bfloat16)
    logits_bf, vf_bf = apple_picking_forward(obs, prep_bf16, out_dtype=jnp.bfloat16)
    jax.block_until_ready((logits_bf, vf_bf))
    assert jnp.allclose(logits_bf, ref_logits, atol=1e-1, rtol=1e-1)
    assert jnp.allclose(vf_bf, ref_vf, atol=1e-1, rtol=1e-1)

    # NOTE: the torch forward also returns [s + 1 for s in state]; with
    # discriminate_sequences=False the state list is empty, so nothing to do.
    # TODO(synk): TransformerDiscriminator / discriminator() paths are separate
    # methods (not part of forward) and are not implemented here.

    print("KERNEL_OK")
</pallas_src>

<mosaic_0001>
module attributes {stable_mosaic.version = 11 : i64} {
  func.func @_apple_kernel(%arg0: i32, %arg1: memref<384x64xf32, #tpu.memory_space<vmem>>, %arg2: memref<32x32xf32, #tpu.memory_space<vmem>>, %arg3: memref<1x32xf32, #tpu.memory_space<vmem>>, %arg4: memref<32x32xf32, #tpu.memory_space<vmem>>, %arg5: memref<1x32xf32, #tpu.memory_space<vmem>>, %arg6: memref<32x192xf32, #tpu.memory_space<vmem>>, %arg7: memref<1x192xf32, #tpu.memory_space<vmem>>, %arg8: memref<4x128xf32, #tpu.memory_space<vmem>>, %arg9: memref<256x8xf32, #tpu.memory_space<vmem>>, %arg10: memref<4x64xf32, #tpu.memory_space<vmem>>, %arg11: memref<64x128xf32, #tpu.memory_space<vmem>>, %arg12: memref<1x128xf32, #tpu.memory_space<vmem>>, %arg13: memref<384x128xf32, #tpu.memory_space<vmem>>) attributes {dimension_semantics = [#tpu.dimension_semantics<parallel>], iteration_bounds = array<i64: 1>, scalar_prefetch = 0 : i64, scratch_operands = 0 : i64, tpu.core_type = #tpu.core_type<tc>, window_params = [{transform_indices = @transform_0, window_bounds = array<i64: 384, 64>}, {pipeline_mode = #tpu.pipeline_mode<synchronous>, transform_indices = @transform_1, window_bounds = array<i64: 32, 32>}, {pipeline_mode = #tpu.pipeline_mode<synchronous>, transform_indices = @transform_2, window_bounds = array<i64: 1, 32>}, {pipeline_mode = #tpu.pipeline_mode<synchronous>, transform_indices = @transform_3, window_bounds = array<i64: 32, 32>}, {pipeline_mode = #tpu.pipeline_mode<synchronous>, transform_indices = @transform_4, window_bounds = array<i64: 1, 32>}, {pipeline_mode = #tpu.pipeline_mode<synchronous>, transform_indices = @transform_5, window_bounds = array<i64: 32, 192>}, {pipeline_mode = #tpu.pipeline_mode<synchronous>, transform_indices = @transform_6, window_bounds = array<i64: 1, 192>}, {pipeline_mode = #tpu.pipeline_mode<synchronous>, transform_indices = @transform_7, window_bounds = array<i64: 4, 128>}, {pipeline_mode = #tpu.pipeline_mode<synchronous>, transform_indices = @transform_8, window_bounds = array<i64: 256, 8>}, {pipeline_mode = #tpu.pipeline_mode<synchronous>, transform_indices = @transform_9, window_bounds = array<i64: 4, 64>}, {pipeline_mode = #tpu.pipeline_mode<synchronous>, transform_indices = @transform_10, window_bounds = array<i64: 64, 128>}, {pipeline_mode = #tpu.pipeline_mode<synchronous>, transform_indices = @transform_11, window_bounds = array<i64: 1, 128>}, {transform_indices = @transform_12, window_bounds = array<i64: 384, 128>}]} {
    %c0 = arith.constant 0 : index
    %c0_0 = arith.constant 0 : index
    %0 = vector.load %arg1[%c0, %c0_0] : memref<384x64xf32, #tpu.memory_space<vmem>>, vector<384x64xf32>
    %1 = vector.extract_strided_slice %0 {offsets = [0, 0], sizes = [384, 32], strides = [1, 1]} : vector<384x64xf32> to vector<384x32xf32>
    %2 = vector.extract_strided_slice %0 {offsets = [0, 32], sizes = [384, 32], strides = [1, 1]} : vector<384x64xf32> to vector<384x32xf32>
    %c0_1 = arith.constant 0 : index
    %c0_2 = arith.constant 0 : index
    %3 = vector.load %arg2[%c0_1, %c0_2] : memref<32x32xf32, #tpu.memory_space<vmem>>, vector<32x32xf32>
    %cst = arith.constant dense<0.000000e+00> : vector<384x32xf32>
    %4 = tpu.matmul %1, %3, %cst {dimension_numbers = #tpu.dot_dimension_numbers<[1], [0], [0], [1], [0, 0, 1, 1], [], []>} : vector<384x32xf32>, vector<32x32xf32>, vector<384x32xf32> -> vector<384x32xf32>
    %c0_3 = arith.constant 0 : index
    %c0_4 = arith.constant 0 : index
    %5 = vector.load %arg3[%c0_3, %c0_4] : memref<1x32xf32, #tpu.memory_space<vmem>>, vector<1x32xf32>
    %6 = vector.broadcast %5 : vector<1x32xf32> to vector<384x32xf32>
    %7 = arith.addf %4, %6 : vector<384x32xf32>
    %cst_5 = arith.constant 0.000000e+00 : f32
    %8 = vector.broadcast %cst_5 : f32 to vector<384x32xf32>
    %9 = arith.cmpf ogt, %7, %8 : vector<384x32xf32>
    %cst_6 = arith.constant 0.00999999977 : f32
    %10 = vector.broadcast %cst_6 : f32 to vector<384x32xf32>
    %11 = arith.mulf %10, %7 : vector<384x32xf32>
    %12 = arith.select %9, %7, %11 : vector<384x32xi1>, vector<384x32xf32>
    %c0_7 = arith.constant 0 : index
    %c0_8 = arith.constant 0 : index
    %13 = vector.load %arg4[%c0_7, %c0_8] : memref<32x32xf32, #tpu.memory_space<vmem>>, vector<32x32xf32>
    %cst_9 = arith.constant dense<0.000000e+00> : vector<384x32xf32>
    %14 = tpu.matmul %12, %13, %cst_9 {dimension_numbers = #tpu.dot_dimension_numbers<[1], [0], [0], [1], [0, 0, 1, 1], [], []>} : vector<384x32xf32>, vector<32x32xf32>, vector<384x32xf32> -> vector<384x32xf32>
    %c0_10 = arith.constant 0 : index
    %c0_11 = arith.constant 0 : index
    %15 = vector.load %arg5[%c0_10, %c0_11] : memref<1x32xf32, #tpu.memory_space<vmem>>, vector<1x32xf32>
    %16 = vector.broadcast %15 : vector<1x32xf32> to vector<384x32xf32>
    %17 = arith.addf %14, %16 : vector<384x32xf32>
    %cst_12 = arith.constant 0.000000e+00 : f32
    %18 = vector.broadcast %cst_12 : f32 to vector<384x32xf32>
    %19 = arith.cmpf ogt, %17, %18 : vector<384x32xf32>
    %cst_13 = arith.constant 0.00999999977 : f32
    %20 = vector.broadcast %cst_13 : f32 to vector<384x32xf32>
    %21 = arith.mulf %20, %17 : vector<384x32xf32>
    %22 = arith.select %19, %17, %21 : vector<384x32xi1>, vector<384x32xf32>
    %c0_14 = arith.constant 0 : index
    %c0_15 = arith.constant 0 : index
    %23 = vector.load %arg6[%c0_14, %c0_15] : memref<32x192xf32, #tpu.memory_space<vmem>>, vector<32x192xf32>
    %cst_16 = arith.constant dense<0.000000e+00> : vector<384x192xf32>
    %24 = tpu.matmul %22, %23, %cst_16 {dimension_numbers = #tpu.dot_dimension_numbers<[1], [0], [0], [1], [0, 0, 1, 1], [], []>} : vector<384x32xf32>, vector<32x192xf32>, vector<384x192xf32> -> vector<384x192xf32>
    %c0_17 = arith.constant 0 : index
    %c0_18 = arith.constant 0 : index
    %25 = vector.load %arg7[%c0_17, %c0_18] : memref<1x192xf32, #tpu.memory_space<vmem>>, vector<1x192xf32>
    %26 = vector.broadcast %25 : vector<1x192xf32> to vector<384x192xf32>
    %27 = arith.addf %24, %26 : vector<384x192xf32>
    %28 = vector.extract_strided_slice %27 {offsets = [0, 0], sizes = [384, 128], strides = [1, 1]} : vector<384x192xf32> to vector<384x128xf32>
    %29 = vector.extract_strided_slice %27 {offsets = [0, 128], sizes = [384, 64], strides = [1, 1]} : vector<384x192xf32> to vector<384x64xf32>
    %c0_19 = arith.constant 0 : index
    %c0_20 = arith.constant 0 : index
    %30 = vector.load %arg8[%c0_19, %c0_20] : memref<4x128xf32, #tpu.memory_space<vmem>>, vector<4x128xf32>
    %cst_21 = arith.constant 0.000000e+00 : f32
    %31 = vector.broadcast %cst_21 : f32 to vector<384x128xf32>
    %32 = vector.extract_strided_slice %30 {offsets = [0, 0], sizes = [1, 128], strides = [1, 1]} : vector<4x128xf32> to vector<1x128xf32>
    %cst_22 = arith.constant 5.000000e-01 : f32
    %33 = vector.broadcast %cst_22 : f32 to vector<1x128xf32>
    %34 = arith.cmpf ogt, %32, %33 : vector<1x128xf32>
    %cst_23 = arith.constant -1.000000e+30 : f32
    %35 = vector.shape_cast %34 : vector<1x128xi1> to vector<1x128xi1>
    %36 = vector.broadcast %35 : vector<1x128xi1> to vector<384x128xi1>
    %37 = vector.broadcast %cst_23 : f32 to vector<384x128xf32>
    %38 = arith.select %36, %28, %37 : vector<384x128xi1>, vector<384x128xf32>
    %cst_24 = arith.constant dense<0xFF800000> : vector<384xf32>
    %39 = vector.multi_reduction <maximumf>, %38, %cst_24 [1] : vector<384x128xf32> to vector<384xf32>
    %40 = vector.shape_cast %39 : vector<384xf32> to vector<384x1xf32>
    %41 = vector.shape_cast %34 : vector<1x128xi1> to vector<1x128xi1>
    %42 = vector.broadcast %41 : vector<1x128xi1> to vector<384x128xi1>
    %43 = vector.shape_cast %40 : vector<384x1xf32> to vector<384x1xf32>
    %44 = vector.broadcast %43 : vector<384x1xf32> to vector<384x128xf32>
    %45 = arith.select %42, %44, %31 : vector<384x128xi1>, vector<384x128xf32>
    %46 = vector.extract_strided_slice %30 {offsets = [1, 0], sizes = [1, 128], strides = [1, 1]} : vector<4x128xf32> to vector<1x128xf32>
    %cst_25 = arith.constant 5.000000e-01 : f32
    %47 = vector.broadcast %cst_25 : f32 to vector<1x128xf32>
    %48 = arith.cmpf ogt, %46, %47 : vector<1x128xf32>
    %cst_26 = arith.constant -1.000000e+30 : f32
    %49 = vector.shape_cast %48 : vector<1x128xi1> to vector<1x128xi1>
    %50 = vector.broadcast %49 : vector<1x128xi1> to vector<384x128xi1>
    %51 = vector.broadcast %cst_26 : f32 to vector<384x128xf32>
    %52 = arith.select %50, %28, %51 : vector<384x128xi1>, vector<384x128xf32>
    %cst_27 = arith.constant dense<0xFF800000> : vector<384xf32>
    %53 = vector.multi_reduction <maximumf>, %52, %cst_27 [1] : vector<384x128xf32> to vector<384xf32>
    %54 = vector.shape_cast %53 : vector<384xf32> to vector<384x1xf32>
    %55 = vector.shape_cast %48 : vector<1x128xi1> to vector<1x128xi1>
    %56 = vector.broadcast %55 : vector<1x128xi1> to vector<384x128xi1>
    %57 = vector.shape_cast %54 : vector<384x1xf32> to vector<384x1xf32>
    %58 = vector.broadcast %57 : vector<384x1xf32> to vector<384x128xf32>
    %59 = arith.select %56, %58, %45 : vector<384x128xi1>, vector<384x128xf32>
    %60 = vector.extract_strided_slice %30 {offsets = [2, 0], sizes = [1, 128], strides = [1, 1]} : vector<4x128xf32> to vector<1x128xf32>
    %cst_28 = arith.constant 5.000000e-01 : f32
    %61 = vector.broadcast %cst_28 : f32 to vector<1x128xf32>
    %62 = arith.cmpf ogt, %60, %61 : vector<1x128xf32>
    %cst_29 = arith.constant -1.000000e+30 : f32
    %63 = vector.shape_cast %62 : vector<1x128xi1> to vector<1x128xi1>
    %64 = vector.broadcast %63 : vector<1x128xi1> to vector<384x128xi1>
    %65 = vector.broadcast %cst_29 : f32 to vector<384x128xf32>
    %66 = arith.select %64, %28, %65 : vector<384x128xi1>, vector<384x128xf32>
    %cst_30 = arith.constant dense<0xFF800000> : vector<384xf32>
    %67 = vector.multi_reduction <maximumf>, %66, %cst_30 [1] : vector<384x128xf32> to vector<384xf32>
    %68 = vector.shape_cast %67 : vector<384xf32> to vector<384x1xf32>
    %69 = vector.shape_cast %62 : vector<1x128xi1> to vector<1x128xi1>
    %70 = vector.broadcast %69 : vector<1x128xi1> to vector<384x128xi1>
    %71 = vector.shape_cast %68 : vector<384x1xf32> to vector<384x1xf32>
    %72 = vector.broadcast %71 : vector<384x1xf32> to vector<384x128xf32>
    %73 = arith.select %70, %72, %59 : vector<384x128xi1>, vector<384x128xf32>
    %74 = vector.extract_strided_slice %30 {offsets = [3, 0], sizes = [1, 128], strides = [1, 1]} : vector<4x128xf32> to vector<1x128xf32>
    %cst_31 = arith.constant 5.000000e-01 : f32
    %75 = vector.broadcast %cst_31 : f32 to vector<1x128xf32>
    %76 = arith.cmpf ogt, %74, %75 : vector<1x128xf32>
    %cst_32 = arith.constant -1.000000e+30 : f32
    %77 = vector.shape_cast %76 : vector<1x128xi1> to vector<1x128xi1>
    %78 = vector.broadcast %77 : vector<1x128xi1> to vector<384x128xi1>
    %79 = vector.broadcast %cst_32 : f32 to vector<384x128xf32>
    %80 = arith.select %78, %28, %79 : vector<384x128xi1>, vector<384x128xf32>
    %cst_33 = arith.constant dense<0xFF800000> : vector<384xf32>
    %81 = vector.multi_reduction <maximumf>, %80, %cst_33 [1] : vector<384x128xf32> to vector<384xf32>
    %82 = vector.shape_cast %81 : vector<384xf32> to vector<384x1xf32>
    %83 = vector.shape_cast %76 : vector<1x128xi1> to vector<1x128xi1>
    %84 = vector.broadcast %83 : vector<1x128xi1> to vector<384x128xi1>
    %85 = vector.shape_cast %82 : vector<384x1xf32> to vector<384x1xf32>
    %86 = vector.broadcast %85 : vector<384x1xf32> to vector<384x128xf32>
    %87 = arith.select %84, %86, %73 : vector<384x128xi1>, vector<384x128xf32>
    %88 = arith.subf %28, %87 : vector<384x128xf32>
    %89 = math.exp %88 : vector<384x128xf32>
    %90 = tpu.concatenate %2, %2, %2, %2 in 1 : vector<384x32xf32>, vector<384x32xf32>, vector<384x32xf32>, vector<384x32xf32> -> vector<384x128xf32>
    %91 = arith.mulf %89, %90 : vector<384x128xf32>
    %92 = tpu.concatenate %91, %89 in 1 : vector<384x128xf32>, vector<384x128xf32> -> vector<384x256xf32>
    %c0_34 = arith.constant 0 : index
    %c0_35 = arith.constant 0 : index
    %93 = vector.load %arg9[%c0_34, %c0_35] : memref<256x8xf32, #tpu.memory_space<vmem>>, vector<256x8xf32>
    %cst_36 = arith.constant dense<0.000000e+00> : vector<384x8xf32>
    %94 = tpu.matmul %92, %93, %cst_36 {dimension_numbers = #tpu.dot_dimension_numbers<[1], [0], [0], [1], [0, 0, 1, 1], [], []>} : vector<384x256xf32>, vector<256x8xf32>, vector<384x8xf32> -> vector<384x8xf32>
    %95 = vector.extract_strided_slice %94 {offsets = [0, 0], sizes = [384, 4], strides = [1, 1]} : vector<384x8xf32> to vector<384x4xf32>
    %96 = vector.extract_strided_slice %94 {offsets = [0, 4], sizes = [384, 4], strides = [1, 1]} : vector<384x8xf32> to vector<384x4xf32>
    %97 = arith.divf %95, %96 : vector<384x4xf32>
    %c0_37 = arith.constant 0 : index
    %c0_38 = arith.constant 0 : index
    %98 = vector.load %arg10[%c0_37, %c0_38] : memref<4x64xf32, #tpu.memory_space<vmem>>, vector<4x64xf32>
    %cst_39 = arith.constant dense<0.000000e+00> : vector<384x64xf32>
    %99 = tpu.matmul %97, %98, %cst_39 {dimension_numbers = #tpu.dot_dimension_numbers<[1], [0], [0], [1], [0, 0, 1, 1], [], []>} : vector<384x4xf32>, vector<4x64xf32>, vector<384x64xf32> -> vector<384x64xf32>
    %100 = arith.addf %29, %99 : vector<384x64xf32>
    %cst_40 = arith.constant 0.000000e+00 : f32
    %101 = vector.broadcast %cst_40 : f32 to vector<384x64xf32>
    %102 = arith.cmpf ogt, %100, %101 : vector<384x64xf32>
    %cst_41 = arith.constant 0.00999999977 : f32
    %103 = vector.broadcast %cst_41 : f32 to vector<384x64xf32>
    %104 = arith.mulf %103, %100 : vector<384x64xf32>
    %105 = arith.select %102, %100, %104 : vector<384x64xi1>, vector<384x64xf32>
    %c0_42 = arith.constant 0 : index
    %c0_43 = arith.constant 0 : index
    %106 = vector.load %arg11[%c0_42, %c0_43] : memref<64x128xf32, #tpu.memory_space<vmem>>, vector<64x128xf32>
    %cst_44 = arith.constant dense<0.000000e+00> : vector<384x128xf32>
    %107 = tpu.matmul %105, %106, %cst_44 {dimension_numbers = #tpu.dot_dimension_numbers<[1], [0], [0], [1], [0, 0, 1, 1], [], []>} : vector<384x64xf32>, vector<64x128xf32>, vector<384x128xf32> -> vector<384x128xf32>
    %c0_45 = arith.constant 0 : index
    %c0_46 = arith.constant 0 : index
    %108 = vector.load %arg12[%c0_45, %c0_46] : memref<1x128xf32, #tpu.memory_space<vmem>>, vector<1x128xf32>
    %109 = vector.broadcast %108 : vector<1x128xf32> to vector<384x128xf32>
    %110 = arith.addf %107, %109 : vector<384x128xf32>
    %c0_47 = arith.constant 0 : index
    %c0_48 = arith.constant 0 : index
    %111 = vector.load %arg13[%c0_47, %c0_48] : memref<384x128xf32, #tpu.memory_space<vmem>>, vector<384x128xf32>
    tpu.vector_store %arg13[%c0_47, %c0_48], %110 {strides = array<i32>} : memref<384x128xf32, #tpu.memory_space<vmem>>, vector<384x128xf32>,
    return
  }
  func.func @transform_0(%arg0: i32) -> (i32, i32) {
    %c0_i32 = arith.constant 0 : i32
    %c0_i32_0 = arith.constant 0 : i32
    return %arg0, %c0_i32 : i32, i32
  }
  func.func @transform_1(%arg0: i32) -> (i32, i32) {
    %c0_i32 = arith.constant 0 : i32
    %c0_i32_0 = arith.constant 0 : i32
    %c0_i32_1 = arith.constant 0 : i32
    return %c0_i32, %c0_i32_0 : i32, i32
  }
  func.func @transform_2(%arg0: i32) -> (i32, i32) {
    %c0_i32 = arith.constant 0 : i32
    %c0_i32_0 = arith.constant 0 : i32
    %c0_i32_1 = arith.constant 0 : i32
    return %c0_i32, %c0_i32_0 : i32, i32
  }
  func.func @transform_3(%arg0: i32) -> (i32, i32) {
    %c0_i32 = arith.constant 0 : i32
    %c0_i32_0 = arith.constant 0 : i32
    %c0_i32_1 = arith.constant 0 : i32
    return %c0_i32, %c0_i32_0 : i32, i32
  }
  func.func @transform_4(%arg0: i32) -> (i32, i32) {
    %c0_i32 = arith.constant 0 : i32
    %c0_i32_0 = arith.constant 0 : i32
    %c0_i32_1 = arith.constant 0 : i32
    return %c0_i32, %c0_i32_0 : i32, i32
  }
  func.func @transform_5(%arg0: i32) -> (i32, i32) {
    %c0_i32 = arith.constant 0 : i32
    %c0_i32_0 = arith.constant 0 : i32
    %c0_i32_1 = arith.constant 0 : i32
    return %c0_i32, %c0_i32_0 : i32, i32
  }
  func.func @transform_6(%arg0: i32) -> (i32, i32) {
    %c0_i32 = arith.constant 0 : i32
    %c0_i32_0 = arith.constant 0 : i32
    %c0_i32_1 = arith.constant 0 : i32
    return %c0_i32, %c0_i32_0 : i32, i32
  }
  func.func @transform_7(%arg0: i32) -> (i32, i32) {
    %c0_i32 = arith.constant 0 : i32
    %c0_i32_0 = arith.constant 0 : i32
    %c0_i32_1 = arith.constant 0 : i32
    return %c0_i32, %c0_i32_0 : i32, i32
  }
  func.func @transform_8(%arg0: i32) -> (i32, i32) {
    %c0_i32 = arith.constant 0 : i32
    %c0_i32_0 = arith.constant 0 : i32
    %c0_i32_1 = arith.constant 0 : i32
    return %c0_i32, %c0_i32_0 : i32, i32
  }
  func.func @transform_9(%arg0: i32) -> (i32, i32) {
    %c0_i32 = arith.constant 0 : i32
    %c0_i32_0 = arith.constant 0 : i32
    %c0_i32_1 = arith.constant 0 : i32
    return %c0_i32, %c0_i32_0 : i32, i32
  }
  func.func @transform_10(%arg0: i32) -> (i32, i32) {
    %c0_i32 = arith.constant 0 : i32
    %c0_i32_0 = arith.constant 0 : i32
    %c0_i32_1 = arith.constant 0 : i32
    return %c0_i32, %c0_i32_0 : i32, i32
  }
  func.func @transform_11(%arg0: i32) -> (i32, i32) {
    %c0_i32 = arith.constant 0 : i32
    %c0_i32_0 = arith.constant 0 : i32
    %c0_i32_1 = arith.constant 0 : i32
    return %c0_i32, %c0_i32_0 : i32, i32
  }
  func.func @transform_12(%arg0: i32) -> (i32, i32) {
    %c0_i32 = arith.constant 0 : i32
    %c0_i32_0 = arith.constant 0 : i32
    return %arg0, %c0_i32 : i32, i32
  }
}

</mosaic_0001>

<bundles_post_ra>
// kernel: tpu_custom_call.1
= control target key start
LH: loop header
LB: loop body
LE: loop exit
PB: predicated region body
PF: predicated region fallthrough
CT: control target
= control target key end

     0   :  { %vm101_vm0 = vcmask 261120   ;;  %s10238_s0 = inlined_call_operand.vmem [shape: f32[384,64], index: 0, kind: input, shape index: {}]   ;;  %s10239_s1 = inlined_call_operand.vmem [shape: f32[32,32], index: 1, kind: input, shape index: {}]   ;;  %s10240_s2 = inlined_call_operand.vmem [shape: f32[1,32], index: 2, kind: input, shape index: {}]   ;;  %s10241_s3 = inlined_call_operand.vmem [shape: f32[32,32], index: 3, kind: input, shape index: {}]   ;;  %s10242_s4 = inlined_call_operand.vmem [shape: f32[1,32], index: 4, kind: input, shape index: {}]   ;;  %s10243_s5 = inlined_call_operand.vmem [shape: f32[32,192], index: 5, kind: input, shape index: {}]   ;;  %s10244_s6 = inlined_call_operand.vmem [shape: f32[1,192], index: 6, kind: input, shape index: {}]   ;;  %s10245_s7 = inlined_call_operand.vmem [shape: f32[4,128], index: 7, kind: input, shape index: {}]   ;;  %s10246_s8 = inlined_call_operand.vmem [shape: f32[256,8], index: 8, kind: input, shape index: {}]   ;;  %s10247_s9 = inlined_call_operand.vmem [shape: f32[4,64], index: 9, kind: input, shape index: {}]   ;;  %s10248_s10 = inlined_call_operand.vmem [shape: f32[64,128], index: 10, kind: input, shape index: {}]   ;;  %s10249_s11 = inlined_call_operand.vmem [shape: f32[1,128], index: 11, kind: input, shape index: {}]   ;;  %s10250_s12 = inlined_call_operand.hbm [shape: f32[384,128], index: 12, kind: output, shape index: {}]  }
   0x1   :  { %v90_v0 = vld [vmem:[%s10239_s1] sm:$0xff]  ;;  %v91_v1 = vld [vmem:[%s10239_s1 + $0x8] sm:$0xff]  ;;  %v92_v2 = vld [vmem:[%s10239_s1 + $0x10] sm:$0xff] }
   0x2   :  { %v5952_v3 = vpack.c.bf16 %v91_v1, %v90_v0  ;;  %v93_v4 = vld [vmem:[%s10239_s1 + $0x18] sm:$0xff]  ;;  %v6406_v5 = vld [vmem:[%s10238_s0] sm:$0xff]  ;;  %v6413_v7 = vld [vmem:[%s10238_s0 + $0x8] sm:$0xff] }
   0x3   :  { %v5956_v6 = vpack.c.bf16 %v93_v4, %v92_v2  ;;  %5638 = vmatprep.mubr.msk.f32.mxu0 %vm101_vm0, %v6406_v5 }
   0x4   :  { %5953 = vmatprep.subr.bf16.mxu0 %v5952_v3 }
   0x5   :  { %5955 = vmatpush3.bf16.msra.mxu0 %v5952_v3 }
   0x6   :  { %5957 = vmatprep.subr.bf16.mxu0 %v5956_v6 }
   0x9   :  { %5959 = vmatpush3.bf16.msra.mxu0 %v5956_v6 }
   0xa   :  { %17 = vsyncpa [#allocation3], 0  ;;  %v6418_v8 = vld [vmem:[%s10238_s0 + $0x10] sm:$0xff]  ;;  %v6427_v9 = vld [vmem:[%s10238_s0 + $0x18] sm:$0xff]  ;;  %s6318_s13 = smov 32   ;;  %s6319_s14 = smov 64  }
   0xb   :  { %v6432_v10 = vld [vmem:[%s10238_s0 + $0x20] sm:$0xff]  ;;  %v6441_v11 = vld [vmem:[%s10238_s0 + $0x28] sm:$0xff]  ;;  %v6446_v12 = vld [vmem:[%s10238_s0 + $0x30] sm:$0xff]  ;;  %2895 = vrot.lane.b32.xlu0 %v6406_v5, %s6318_s13  ;;  %s6322_s30 = smov 124  }
   0xc   :  { %5639 = vmatmul.mubr.msk.f32.vlgmr.msra.gmra.mrb[0].mxu0 %vm101_vm0, %v6413_v7  ;;  %v6455_v13 = vld [vmem:[%s10238_s0 + $0x38] sm:$0xff]  ;;  %v6460_v14 = vld [vmem:[%s10238_s0 + $0x40] sm:$0xff]  ;;  %v6469_v15 = vld [vmem:[%s10238_s0 + $0x48] sm:$0xff] }
   0xd   :  { %5641 = vmatprep.mubr.msk.f32.mxu0 %vm101_vm0, %v6418_v8  ;;  %v6474_v16 = vld [vmem:[%s10238_s0 + $0x50] sm:$0xff]  ;;  %v6483_v17 = vld [vmem:[%s10238_s0 + $0x58] sm:$0xff]  ;;  %v54_v18 = vld [vmem:[%s10238_s0 + $0x60] sm:$0xff] }
   0xe   :  { %v55_v19 = vld [vmem:[%s10238_s0 + $0x68] sm:$0xff]  ;;  %v56_v20 = vld [vmem:[%s10238_s0 + $0x70] sm:$0xff]  ;;  %v57_v21 = vld [vmem:[%s10238_s0 + $0x78] sm:$0xff] }
   0xf   :  { %v58_v22 = vld [vmem:[%s10238_s0 + $0x80] sm:$0xff]  ;;  %v59_v23 = vld [vmem:[%s10238_s0 + $0x88] sm:$0xff]  ;;  %v60_v24 = vld [vmem:[%s10238_s0 + $0x90] sm:$0xff]  ;;  %3039 = vrot.lane.b32.xlu0 %v6406_v5, %s6319_s14 }
  0x10   :  { %5642 = vmatmul.mubr.msk.f32.gmra.mrb[2].mxu0 %vm101_vm0, %v6427_v9  ;;  %v61_v25 = vld [vmem:[%s10238_s0 + $0x98] sm:$0xff]  ;;  %v62_v26 = vld [vmem:[%s10238_s0 + $0xa0] sm:$0xff]  ;;  %v63_v27 = vld [vmem:[%s10238_s0 + $0xa8] sm:$0xff] }
  0x11   :  { %5644 = vmatprep.mubr.msk.f32.mxu0 %vm101_vm0, %v6432_v10  ;;  %v695_v28 = vld [vmem:[%s10241_s3] sm:$0xff]  ;;  %v696_v29 = vld [vmem:[%s10241_s3 + $0x8] sm:$0xff]  ;;  %v697_v31 = vld [vmem:[%s10241_s3 + $0x10] sm:$0xff] }
  0x12   :  { %v5960_v30 = vpack.c.bf16 %v696_v29, %v695_v28  ;;  %v698_v32 = vld [vmem:[%s10241_s3 + $0x18] sm:$0xff]  ;;  %v64_v34 = vld [vmem:[%s10238_s0 + $0xb0] sm:$0xff]  ;;  %v66_v36 = vld [vmem:[%s10238_s0 + $0xc0] sm:$0xff] }
  0x13   :  { %v5964_v33 = vpack.c.bf16 %v698_v32, %v697_v31  ;;  %v65_v35 = vld [vmem:[%s10238_s0 + $0xb8] sm:$0xff]  ;;  %v67_v37 = vld [vmem:[%s10238_s0 + $0xc8] sm:$0xff]  ;;  %v68_v38 = vld [vmem:[%s10238_s0 + $0xd0] sm:$0xff]  ;;  %2897 = vrot.lane.b32.xlu0 %v6413_v7, %s6318_s13 }
  0x14   :  { %5645 = vmatmul.mubr.msk.f32.gmra.mrb[4].mxu0 %vm101_vm0, %v6441_v11  ;;  %5961 = vmatprep.subr.bf16.mxu1 %v5960_v30  ;;  %v1300_v39 = vld [vmem:[%s10243_s5 + $0x8] sm:$0xff]  ;;  %v1302_v40 = vld [vmem:[%s10243_s5 + $0x18] sm:$0xff]  ;;  %v1299_v42 = vld [vmem:[%s10243_s5] sm:$0xff] }
  0x15   :  { %5647 = vmatprep.mubr.msk.f32.mxu0 %vm101_vm0, %v6446_v12  ;;  %5963 = vmatpush3.bf16.msra.mxu1 %v5960_v30  ;;  %v5968_v41 = vpack.c.bf16 %v1302_v40, %v1300_v39  ;;  %v1301_v43 = vld [vmem:[%s10243_s5 + $0x10] sm:$0xff]  ;;  %v69_v44 = vld [vmem:[%s10238_s0 + $0xd8] sm:$0xff]  ;;  %v70_v46 = vld [vmem:[%s10238_s0 + $0xe0] sm:$0xff] }
  0x16   :  { %5965 = vmatprep.subr.bf16.mxu1 %v5964_v33  ;;  %v5970_v45 = vpack.c.bf16 %v1301_v43, %v1299_v42  ;;  %v71_v47 = vld [vmem:[%s10238_s0 + $0xe8] sm:$0xff]  ;;  %v72_v49 = vld [vmem:[%s10238_s0 + $0xf0] sm:$0xff]  ;;  %v1306_v50 = vld [vmem:[%s10243_s5 + $0x38] sm:$0xff] }
  0x17   :  { %5969 = vmatprep.subr.bf16.mxu0 %v5968_v41  ;;  %v1304_v48 = vld [vmem:[%s10243_s5 + $0x28] sm:$0xff]  ;;  %v1303_v51 = vld [vmem:[%s10243_s5 + $0x20] sm:$0xff]  ;;  %v1305_v53 = vld [vmem:[%s10243_s5 + $0x30] sm:$0xff]  ;;  %3041 = vrot.lane.b32.xlu0 %v6413_v7, %s6319_s14 }
  0x18   :  { %5648 = vmatmul.mubr.msk.f32.gmra.mrb[6].mxu0 %vm101_vm0, %v6455_v13  ;;  %v5972_v52 = vpack.c.bf16 %v1306_v50, %v1304_v48  ;;  %v5974_v54 = vpack.c.bf16 %v1305_v53, %v1303_v51  ;;  %v73_v55 = vld [vmem:[%s10238_s0 + $0xf8] sm:$0xff]  ;;  %v74_v56 = vld [vmem:[%s10238_s0 + $0x100] sm:$0xff]  ;;  %v75_v57 = vld [vmem:[%s10238_s0 + $0x108] sm:$0xff] }
  0x19   :  { %5650 = vmatprep.mubr.msk.f32.mxu0 %vm101_vm0, %v6460_v14  ;;  %5967 = vmatpush3.bf16.msra.mxu1 %v5964_v33  ;;  %v76_v58 = vld [vmem:[%s10238_s0 + $0x110] sm:$0xff]  ;;  %v77_v59 = vld [vmem:[%s10238_s0 + $0x118] sm:$0xff]  ;;  %v78_v60 = vld [vmem:[%s10238_s0 + $0x120] sm:$0xff] }
  0x1a   :  { %5971 = vmatpush1.bf16.msra.mxu0 %v5970_v45  ;;  %v79_v61 = vld [vmem:[%s10238_s0 + $0x128] sm:$0xff]  ;;  %v80_v62 = vld [vmem:[%s10238_s0 + $0x130] sm:$0xff]  ;;  %v81_v63 = vld [vmem:[%s10238_s0 + $0x138] sm:$0xff] }
  0x1b   :  { %5973 = vmatprep.subr.bf16.mxu0 %v5972_v52  ;;  %v82_v0 = vld [vmem:[%s10238_s0 + $0x140] sm:$0xff]  ;;  %v83_v1 = vld [vmem:[%s10238_s0 + $0x148] sm:$0xff]  ;;  %v84_v2 = vld [vmem:[%s10238_s0 + $0x150] sm:$0xff]  ;;  %2899 = vrot.lane.b32.xlu0 %v6418_v8, %s6318_s13 }
  0x1c   :  { %5651 = vmatmul.mubr.msk.f32.gmra.mrb[8].mxu0 %vm101_vm0, %v6469_v15  ;;  %v85_v3 = vld [vmem:[%s10238_s0 + $0x158] sm:$0xff]  ;;  %v86_v4 = vld [vmem:[%s10238_s0 + $0x160] sm:$0xff]  ;;  %v87_v6 = vld [vmem:[%s10238_s0 + $0x168] sm:$0xff] }
  0x1d   :  { %5653 = vmatprep.mubr.msk.f32.mxu0 %vm101_vm0, %v6474_v16 }
  0x1e   :  { %5975 = vmatpush1.bf16.msra.mxu0 %v5974_v54 }
  0x1f   :  { %3043 = vrot.lane.b32.xlu0 %v6418_v8, %s6319_s14 }
  0x20   :  { %5654 = vmatmul.mubr.msk.f32.gmra.mrb[10].mxu0 %vm101_vm0, %v6483_v17 }
  0x21   :  { %5656 = vmatprep.mubr.msk.f32.mxu0 %vm101_vm0, %v54_v18  ;;  %v88_v18 = vld [vmem:[%s10238_s0 + $0x170] sm:$0xff] }
  0x24   :  { %5657 = vmatmul.mubr.msk.f32.gmra.mrb[12].mxu0 %vm101_vm0, %v55_v19  ;;  %v89_v19 = vld [vmem:[%s10238_s0 + $0x178] sm:$0xff] }
  0x25   :  { %5659 = vmatprep.mubr.msk.f32.mxu0 %vm101_vm0, %v56_v20  ;;  %v6670_v20 = vld [vmem:[%s10240_s2] ss:$0 sm:$0xff]  ;;  %s6317_s2 = smov 96  }
  0x26   :  { %2751 = vrot.lane.b32.xlu1 %v6406_v5, %s6317_s2  ;;  %2759 = vrot.lane.b32.xlu0 %v6432_v10, %s6317_s2 }
  0x28   :  { %5660 = vmatmul.mubr.msk.f32.gmra.mrb[14].mxu0 %vm101_vm0, %v57_v21 }
  0x29   :  { %5662 = vmatprep.mubr.msk.f32.mxu0 %vm101_vm0, %v58_v22 }
  0x2a   :  { %2753 = vrot.lane.b32.xlu1 %v6413_v7, %s6317_s2  ;;  %3047 = vrot.lane.b32.xlu0 %v6432_v10, %s6319_s14 }
  0x2c   :  { %5663 = vmatmul.mubr.msk.f32.gmra.mrb[16].mxu0 %vm101_vm0, %v59_v23 }
  0x2d   :  { %5665 = vmatprep.mubr.msk.f32.mxu0 %vm101_vm0, %v60_v24 }
  0x2e   :  { %2755 = vrot.lane.b32.xlu1 %v6418_v8, %s6317_s2  ;;  %2763 = vrot.lane.b32.xlu0 %v6446_v12, %s6317_s2 }
  0x30   :  { %5666 = vmatmul.mubr.msk.f32.gmra.mrb[18].mxu0 %vm101_vm0, %v61_v25 }
  0x31   :  { %5668 = vmatprep.mubr.msk.f32.mxu0 %vm101_vm0, %v62_v26 }
  0x32   :  { %2757 = vrot.lane.b32.xlu1 %v6427_v9, %s6317_s2  ;;  %3051 = vrot.lane.b32.xlu0 %v6446_v12, %s6319_s14 }
  0x34   :  { %5669 = vmatmul.mubr.msk.f32.gmra.mrb[20].mxu0 %vm101_vm0, %v63_v27 }
  0x35   :  { %5671 = vmatprep.mubr.msk.f32.mxu0 %vm101_vm0, %v64_v34 }
  0x36   :  { %2901 = vrot.lane.b32.xlu1 %v6427_v9, %s6318_s13  ;;  %2767 = vrot.lane.b32.xlu0 %v6460_v14, %s6317_s2 }
  0x38   :  { %5672 = vmatmul.mubr.msk.f32.gmra.mrb[22].mxu0 %vm101_vm0, %v65_v35 }
  0x39   :  { %5674 = vmatprep.mubr.msk.f32.mxu0 %vm101_vm0, %v66_v36 }
  0x3a   :  { %3045 = vrot.lane.b32.xlu1 %v6427_v9, %s6319_s14  ;;  %3055 = vrot.lane.b32.xlu0 %v6460_v14, %s6319_s14 }
  0x3c   :  { %5675 = vmatmul.mubr.msk.f32.gmra.mrb[24].mxu0 %vm101_vm0, %v67_v37 }
  0x3d   :  { %5677 = vmatprep.mubr.msk.f32.mxu0 %vm101_vm0, %v68_v38 }
  0x3e   :  { %2903 = vrot.lane.b32.xlu1 %v6432_v10, %s6318_s13  ;;  %2771 = vrot.lane.b32.xlu0 %v6474_v16, %s6317_s2 }
  0x40   :  { %5678 = vmatmul.mubr.msk.f32.gmra.mrb[26].mxu0 %vm101_vm0, %v69_v44 }
  0x41   :  { %5680 = vmatprep.mubr.msk.f32.mxu0 %vm101_vm0, %v70_v46 }
  0x42   :  { %2761 = vrot.lane.b32.xlu1 %v6441_v11, %s6317_s2  ;;  %3059 = vrot.lane.b32.xlu0 %v6474_v16, %s6319_s14 }
  0x44   :  { %5681 = vmatmul.mubr.msk.f32.gmra.mrb[28].mxu0 %vm101_vm0, %v71_v47 }
  0x45   :  { %5683 = vmatprep.mubr.msk.f32.mxu0 %vm101_vm0, %v72_v49 }
  0x46   :  { %2905 = vrot.lane.b32.xlu1 %v6441_v11, %s6318_s13 }
  0x48   :  { %5684 = vmatmul.mubr.msk.f32.gmra.mrb[30].mxu0 %vm101_vm0, %v73_v55 }
  0x49   :  { %5686 = vmatprep.mubr.msk.f32.mxu0 %vm101_vm0, %v74_v56 }
  0x4a   :  { %3049 = vrot.lane.b32.xlu1 %v6441_v11, %s6319_s14 }
  0x4c   :  { %5687 = vmatmul.mubr.msk.f32.gmra.mrb[32].mxu0 %vm101_vm0, %v75_v57 }
  0x4d   :  { %5689 = vmatprep.mubr.msk.f32.mxu0 %vm101_vm0, %v76_v58 }
  0x4e   :  { %2907 = vrot.lane.b32.xlu1 %v6446_v12, %s6318_s13 }
  0x50   :  { %5690 = vmatmul.mubr.msk.f32.gmra.mrb[34].mxu0 %vm101_vm0, %v77_v59 }
  0x51   :  { %5692 = vmatprep.mubr.msk.f32.mxu0 %vm101_vm0, %v78_v60 }
  0x52   :  { %2765 = vrot.lane.b32.xlu1 %v6455_v13, %s6317_s2 }
  0x54   :  { %5693 = vmatmul.mubr.msk.f32.gmra.mrb[36].mxu0 %vm101_vm0, %v79_v61 }
  0x55   :  { %5695 = vmatprep.mubr.msk.f32.mxu0 %vm101_vm0, %v80_v62 }
  0x56   :  { %2909 = vrot.lane.b32.xlu1 %v6455_v13, %s6318_s13 }
  0x58   :  { %5696 = vmatmul.mubr.msk.f32.gmra.mrb[38].mxu0 %vm101_vm0, %v81_v63 }
  0x59   :  { %5698 = vmatprep.mubr.msk.f32.mxu0 %vm101_vm0, %v82_v0 }
  0x5a   :  { %3053 = vrot.lane.b32.xlu1 %v6455_v13, %s6319_s14 }
  0x5c   :  { %5699 = vmatmul.mubr.msk.f32.gmra.mrb[40].mxu0 %vm101_vm0, %v83_v1 }
  0x5d   :  { %5701 = vmatprep.mubr.msk.f32.mxu0 %vm101_vm0, %v84_v2 }
  0x5e   :  { %2911 = vrot.lane.b32.xlu1 %v6460_v14, %s6318_s13  ;;  %v6837_v14 = vld [vmem:[%s10242_s4] ss:$0 sm:$0xff] }
  0x60   :  { %5702 = vmatmul.mubr.msk.f32.gmra.mrb[42].mxu0 %vm101_vm0, %v85_v3 }
  0x61   :  { %5704 = vmatprep.mubr.msk.f32.mxu0 %vm101_vm0, %v86_v4 }
  0x62   :  { %2769 = vrot.lane.b32.xlu1 %v6469_v15, %s6317_s2 }
  0x64   :  { %5705 = vmatmul.mubr.msk.f32.gmra.mrb[44].mxu0 %vm101_vm0, %v87_v6 }
  0x65   :  { %5707 = vmatprep.mubr.msk.f32.mxu0 %vm101_vm0, %v88_v18 }
  0x66   :  { %2913 = vrot.lane.b32.xlu1 %v6469_v15, %s6318_s13 }
  0x68   :  { %5708 = vmatmul.mubr.msk.f32.gmra.mrb[46].mxu0 %vm101_vm0, %v89_v19 }
  0x6a   :  { %3057 = vrot.lane.b32.xlu1 %v6469_v15, %s6319_s14 }
  0x6e   :  { %2915 = vrot.lane.b32.xlu1 %v6474_v16, %s6318_s13 }
  0x72   :  { %2773 = vrot.lane.b32.xlu1 %v6483_v17, %s6317_s2 }
  0x76   :  { %2917 = vrot.lane.b32.xlu1 %v6483_v17, %s6318_s13 }
  0x7a   :  { %3061 = vrot.lane.b32.xlu1 %v6483_v17, %s6319_s14 }
  0xdf   :  { %v5640_v21 = vpop.f32.mrb[0].mxu0 }
  0xe0   :  { %v318_v22 = vadd.f32 %v5640_v21, %v6670_v20  ;;  %v312_v23 = vpop.f32.mrb[1].mxu0 }
  0xe1   :  { %v313_v24 = vadd.f32 %v6670_v20, %v312_v23 }
  0xe2   :  { %v600_v25 = vmul.f32 0.01, %v318_v22  ;;  %vm552_vm1 = vcmp.gt.f32.partialorder %v318_v22, 0.0 }
  0xe3   :  { %vm551_vm2 = vcmp.gt.f32.partialorder %v313_v24, 0.0  ;;  %v599_v26 = vmul.f32 0.01, %v313_v24  ;;  %v5643_v27 = vpop.f32.mrb[2].mxu0 }
  0xe4   :  { %v328_v28 = vadd.f32 %v5643_v27, %v6670_v20  ;;  %v322_v29 = vpop.f32.mrb[3].mxu0  ;;  %v648_v33 = vsel %vm552_vm1, %v318_v22, %v600_v25 }
  0xe5   :  { %v647_v30 = vsel %vm551_vm2, %v313_v24, %v599_v26  ;;  %v323_v31 = vadd.f32 %v6670_v20, %v322_v29 }
  0xe6   :  { %5718 = vmatprep.mubr.msk.f32.mxu1 %vm101_vm0, %v647_v30  ;;  %vm554_vm3 = vcmp.gt.f32.partialorder %v328_v28, 0.0  ;;  %v602_v32 = vmul.f32 0.01, %v328_v28 }
  0xe7   :  { %5719 = vmatmul.mubr.msk.f32.vlgmr.msra.gmra.mrb[0].mxu1 %vm101_vm0, %v648_v33  ;;  %vm553_vm4 = vcmp.gt.f32.partialorder %v323_v31, 0.0  ;;  %v601_v34 = vmul.f32 0.01, %v323_v31  ;;  %v5646_v35 = vpop.f32.mrb[4].mxu0 }
  0xe8   :  { %v650_v36 = vsel %vm554_vm3, %v328_v28, %v602_v32  ;;  %v338_v37 = vadd.f32 %v5646_v35, %v6670_v20  ;;  %v332_v38 = vpop.f32.mrb[5].mxu0 }
  0xe9   :  { %v649_v39 = vsel %vm553_vm4, %v323_v31, %v601_v34  ;;  %v333_v40 = vadd.f32 %v6670_v20, %v332_v38 }
  0xea   :  { %5721 = vmatprep.mubr.msk.f32.mxu1 %vm101_vm0, %v649_v39  ;;  %vm556_vm5 = vcmp.gt.f32.partialorder %v338_v37, 0.0  ;;  %v604_v41 = vmul.f32 0.01, %v338_v37 }
  0xeb   :  { %5722 = vmatmul.mubr.msk.f32.gmra.mrb[2].mxu1 %vm101_vm0, %v650_v36  ;;  %vm555_vm6 = vcmp.gt.f32.partialorder %v333_v40, 0.0  ;;  %v603_v42 = vmul.f32 0.01, %v333_v40  ;;  %v5649_v43 = vpop.f32.mrb[6].mxu0 }
  0xec   :  { %v652_v44 = vsel %vm556_vm5, %v338_v37, %v604_v41  ;;  %v348_v45 = vadd.f32 %v5649_v43, %v6670_v20  ;;  %v342_v46 = vpop.f32.mrb[7].mxu0 }
  0xed   :  { %v651_v47 = vsel %vm555_vm6, %v333_v40, %v603_v42  ;;  %v343_v48 = vadd.f32 %v6670_v20, %v342_v46 }
  0xee   :  { %5724 = vmatprep.mubr.msk.f32.mxu1 %vm101_vm0, %v651_v47  ;;  %vm558_vm7 = vcmp.gt.f32.partialorder %v348_v45, 0.0  ;;  %v606_v49 = vmul.f32 0.01, %v348_v45 }
  0xef   :  { %5725 = vmatmul.mubr.msk.f32.gmra.mrb[4].mxu1 %vm101_vm0, %v652_v44  ;;  %vm557_vm8 = vcmp.gt.f32.partialorder %v343_v48, 0.0  ;;  %v605_v50 = vmul.f32 0.01, %v343_v48  ;;  %v5652_v51 = vpop.f32.mrb[8].mxu0 }
  0xf0   :  { %v654_v52 = vsel %vm558_vm7, %v348_v45, %v606_v49  ;;  %v358_v53 = vadd.f32 %v5652_v51, %v6670_v20  ;;  %v352_v54 = vpop.f32.mrb[9].mxu0 }
  0xf1   :  { %v653_v55 = vsel %vm557_vm8, %v343_v48, %v605_v50  ;;  %v353_v56 = vadd.f32 %v6670_v20, %v352_v54 }
  0xf2   :  { %5727 = vmatprep.mubr.msk.f32.mxu1 %vm101_vm0, %v653_v55  ;;  %vm560_vm9 = vcmp.gt.f32.partialorder %v358_v53, 0.0  ;;  %v608_v57 = vmul.f32 0.01, %v358_v53 }
  0xf3   :  { %5728 = vmatmul.mubr.msk.f32.gmra.mrb[6].mxu1 %vm101_vm0, %v654_v52  ;;  %vm559_vm10 = vcmp.gt.f32.partialorder %v353_v56, 0.0  ;;  %v607_v58 = vmul.f32 0.01, %v353_v56  ;;  %v5655_v59 = vpop.f32.mrb[10].mxu0 }
  0xf4   :  { %v656_v60 = vsel %vm560_vm9, %v358_v53, %v608_v57  ;;  %v368_v61 = vadd.f32 %v5655_v59, %v6670_v20  ;;  %v362_v62 = vpop.f32.mrb[11].mxu0 }
  0xf5   :  { %v655_v63 = vsel %vm559_vm10, %v353_v56, %v607_v58  ;;  %v363_v0 = vadd.f32 %v6670_v20, %v362_v62  ;;  %v10252_v58 = vmov 0.0  }
  0xf6   :  { %5730 = vmatprep.mubr.msk.f32.mxu1 %vm101_vm0, %v655_v63  ;;  %vm562_vm11 = vcmp.gt.f32.partialorder %v368_v61, 0.0  ;;  %v610_v1 = vmul.f32 0.01, %v368_v61  ;;  %1527 = vmatprep.mubr.f32.mxu0 %v10252_v58 }
  0xf7   :  { %5731 = vmatmul.mubr.msk.f32.gmra.mrb[8].mxu1 %vm101_vm0, %v656_v60  ;;  %vm561_vm12 = vcmp.gt.f32.partialorder %v363_v0, 0.0  ;;  %v609_v2 = vmul.f32 0.01, %v363_v0  ;;  %v5658_v3 = vpop.f32.mrb[12].mxu0 }
  0xf8   :  { %v658_v4 = vsel %vm562_vm11, %v368_v61, %v610_v1  ;;  %v378_v6 = vadd.f32 %v5658_v3, %v6670_v20  ;;  %v372_v18 = vpop.f32.mrb[13].mxu0 }
  0xf9   :  { %v657_v19 = vsel %vm561_vm12, %v363_v0, %v609_v2  ;;  %v373_v21 = vadd.f32 %v6670_v20, %v372_v18 }
  0xfa   :  { %5733 = vmatprep.mubr.msk.f32.mxu1 %vm101_vm0, %v657_v19  ;;  %vm564_vm13 = vcmp.gt.f32.partialorder %v378_v6, 0.0  ;;  %v612_v22 = vmul.f32 0.01, %v378_v6 }
  0xfb   :  { %5734 = vmatmul.mubr.msk.f32.gmra.mrb[10].mxu1 %vm101_vm0, %v658_v4  ;;  %vm563_vm14 = vcmp.gt.f32.partialorder %v373_v21, 0.0  ;;  %v611_v23 = vmul.f32 0.01, %v373_v21  ;;  %v5661_v24 = vpop.f32.mrb[14].mxu0 }
  0xfc   :  { %v660_v25 = vsel %vm564_vm13, %v378_v6, %v612_v22  ;;  %v388_v26 = vadd.f32 %v5661_v24, %v6670_v20  ;;  %v382_v27 = vpop.f32.mrb[15].mxu0 }
  0xfd   :  { %v659_v28 = vsel %vm563_vm14, %v373_v21, %v611_v23  ;;  %v383_v29 = vadd.f32 %v6670_v20, %v382_v27 }
  0xfe   :  { %5736 = vmatprep.mubr.msk.f32.mxu1 %vm101_vm0, %v659_v28  ;;  %vm566_vm15 = vcmp.gt.f32.partialorder %v388_v26, 0.0  ;;  %v614_v30 = vmul.f32 0.01, %v388_v26 }
  0xff   :  { %5737 = vmatmul.mubr.msk.f32.gmra.mrb[12].mxu1 %vm101_vm0, %v660_v25  ;;  %vm565_vm1 = vcmp.gt.f32.partialorder %v383_v29, 0.0  ;;  %v613_v31 = vmul.f32 0.01, %v383_v29  ;;  %v5664_v32 = vpop.f32.mrb[16].mxu0 }
 0x100   :  { %v662_v33 = vsel %vm566_vm15, %v388_v26, %v614_v30  ;;  %v398_v34 = vadd.f32 %v5664_v32, %v6670_v20  ;;  %v392_v35 = vpop.f32.mrb[17].mxu0 }
 0x101   :  { %v661_v36 = vsel %vm565_vm1, %v383_v29, %v613_v31  ;;  %v393_v37 = vadd.f32 %v6670_v20, %v392_v35 }
 0x102   :  { %5739 = vmatprep.mubr.msk.f32.mxu1 %vm101_vm0, %v661_v36  ;;  %vm568_vm2 = vcmp.gt.f32.partialorder %v398_v34, 0.0  ;;  %v616_v38 = vmul.f32 0.01, %v398_v34 }
 0x103   :  { %5740 = vmatmul.mubr.msk.f32.gmra.mrb[14].mxu1 %vm101_vm0, %v662_v33  ;;  %vm567_vm3 = vcmp.gt.f32.partialorder %v393_v37, 0.0  ;;  %v615_v39 = vmul.f32 0.01, %v393_v37  ;;  %v5667_v40 = vpop.f32.mrb[18].mxu0 }
 0x104   :  { %v664_v41 = vsel %vm568_vm2, %v398_v34, %v616_v38  ;;  %v408_v42 = vadd.f32 %v5667_v40, %v6670_v20  ;;  %v402_v43 = vpop.f32.mrb[19].mxu0 }
 0x105   :  { %v663_v44 = vsel %vm567_vm3, %v393_v37, %v615_v39  ;;  %v403_v45 = vadd.f32 %v6670_v20, %v402_v43 }
 0x106   :  { %5742 = vmatprep.mubr.msk.f32.mxu1 %vm101_vm0, %v663_v44  ;;  %vm570_vm4 = vcmp.gt.f32.partialorder %v408_v42, 0.0  ;;  %v618_v46 = vmul.f32 0.01, %v408_v42 }
 0x107   :  { %5743 = vmatmul.mubr.msk.f32.gmra.mrb[16].mxu1 %vm101_vm0, %v664_v41  ;;  %vm569_vm5 = vcmp.gt.f32.partialorder %v403_v45, 0.0  ;;  %v617_v47 = vmul.f32 0.01, %v403_v45  ;;  %v5670_v48 = vpop.f32.mrb[20].mxu0 }
 0x108   :  { %v666_v49 = vsel %vm570_vm4, %v408_v42, %v618_v46  ;;  %v418_v50 = vadd.f32 %v5670_v48, %v6670_v20  ;;  %v412_v51 = vpop.f32.mrb[21].mxu0 }
 0x109   :  { %v665_v52 = vsel %vm569_vm5, %v403_v45, %v617_v47  ;;  %v413_v53 = vadd.f32 %v6670_v20, %v412_v51 }
 0x10a   :  { %5745 = vmatprep.mubr.msk.f32.mxu1 %vm101_vm0, %v665_v52  ;;  %vm572_vm6 = vcmp.gt.f32.partialorder %v418_v50, 0.0  ;;  %v620_v54 = vmul.f32 0.01, %v418_v50 }
 0x10b   :  { %5746 = vmatmul.mubr.msk.f32.gmra.mrb[18].mxu1 %vm101_vm0, %v666_v49  ;;  %vm571_vm7 = vcmp.gt.f32.partialorder %v413_v53, 0.0  ;;  %v619_v55 = vmul.f32 0.01, %v413_v53  ;;  %v5673_v59 = vpop.f32.mrb[22].mxu0 }
 0x10c   :  { %v668_v56 = vsel %vm572_vm6, %v418_v50, %v620_v54  ;;  %v428_v60 = vadd.f32 %v5673_v59, %v6670_v20  ;;  %v422_v61 = vpop.f32.mrb[23].mxu0 }
 0x10d   :  { %v667_v57 = vsel %vm571_vm7, %v413_v53, %v619_v55  ;;  %v423_v62 = vadd.f32 %v6670_v20, %v422_v61 }
 0x10e   :  { %5748 = vmatprep.mubr.msk.f32.mxu1 %vm101_vm0, %v667_v57  ;;  %vm574_vm8 = vcmp.gt.f32.partialorder %v428_v60, 0.0  ;;  %v622_v63 = vmul.f32 0.01, %v428_v60 }
 0x10f   :  { %5749 = vmatmul.mubr.msk.f32.gmra.mrb[20].mxu1 %vm101_vm0, %v668_v56  ;;  %vm573_vm9 = vcmp.gt.f32.partialorder %v423_v62, 0.0  ;;  %v621_v0 = vmul.f32 0.01, %v423_v62  ;;  %v5676_v3 = vpop.f32.mrb[24].mxu0 }
 0x110   :  { %v670_v1 = vsel %vm574_vm8, %v428_v60, %v622_v63  ;;  %v438_v4 = vadd.f32 %v5676_v3, %v6670_v20  ;;  %v432_v6 = vpop.f32.mrb[25].mxu0 }
 0x111   :  { %v669_v2 = vsel %vm573_vm9, %v423_v62, %v621_v0  ;;  %v433_v18 = vadd.f32 %v6670_v20, %v432_v6 }
 0x112   :  { %5751 = vmatprep.mubr.msk.f32.mxu1 %vm101_vm0, %v669_v2  ;;  %v624_v19 = vmul.f32 0.01, %v438_v4  ;;  %vm576_vm10 = vcmp.gt.f32.partialorder %v438_v4, 0.0 }
 0x113   :  { %5752 = vmatmul.mubr.msk.f32.gmra.mrb[22].mxu1 %vm101_vm0, %v670_v1  ;;  %v623_v21 = vmul.f32 0.01, %v433_v18  ;;  %vm575_vm11 = vcmp.gt.f32.partialorder %v433_v18, 0.0  ;;  %v5679_v23 = vpop.f32.mrb[26].mxu0 }
 0x114   :  { %v672_v24 = vsel %vm576_vm10, %v438_v4, %v624_v19  ;;  %v448_v25 = vadd.f32 %v5679_v23, %v6670_v20  ;;  %v442_v26 = vpop.f32.mrb[27].mxu0 }
 0x115   :  { %v671_v22 = vsel %vm575_vm11, %v433_v18, %v623_v21  ;;  %v443_v27 = vadd.f32 %v6670_v20, %v442_v26 }
 0x116   :  { %5754 = vmatprep.mubr.msk.f32.mxu1 %vm101_vm0, %v671_v22  ;;  %vm578_vm12 = vcmp.gt.f32.partialorder %v448_v25, 0.0  ;;  %v626_v28 = vmul.f32 0.01, %v448_v25 }
 0x117   :  { %5755 = vmatmul.mubr.msk.f32.gmra.mrb[24].mxu1 %vm101_vm0, %v672_v24  ;;  %vm577_vm13 = vcmp.gt.f32.partialorder %v443_v27, 0.0  ;;  %v625_v29 = vmul.f32 0.01, %v443_v27  ;;  %v5682_v30 = vpop.f32.mrb[28].mxu0 }
 0x118   :  { %v458_v31 = vadd.f32 %v5682_v30, %v6670_v20  ;;  %v674_v32 = vsel %vm578_vm12, %v448_v25, %v626_v28  ;;  %v452_v33 = vpop.f32.mrb[29].mxu0 }
 0x119   :  { %v673_v34 = vsel %vm577_vm13, %v443_v27, %v625_v29  ;;  %v453_v35 = vadd.f32 %v6670_v20, %v452_v33 }
 0x11a   :  { %5757 = vmatprep.mubr.msk.f32.mxu1 %vm101_vm0, %v673_v34  ;;  %vm580_vm14 = vcmp.gt.f32.partialorder %v458_v31, 0.0  ;;  %v628_v5 = vmul.f32 0.01, %v458_v31 }
 0x11b   :  { %5758 = vmatmul.mubr.msk.f32.gmra.mrb[26].mxu1 %vm101_vm0, %v674_v32  ;;  %vm579_vm15 = vcmp.gt.f32.partialorder %v453_v35, 0.0  ;;  %v627_v36 = vmul.f32 0.01, %v453_v35  ;;  %v5685_v37 = vpop.f32.mrb[30].mxu0 }
 0x11c   :  { %v468_v9 = vadd.f32 %v5685_v37, %v6670_v20  ;;  %v676_v38 = vsel %vm580_vm14, %v458_v31, %v628_v5  ;;  %v462_v39 = vpop.f32.mrb[31].mxu0 }
 0x11d   :  { %v675_v40 = vsel %vm579_vm15, %v453_v35, %v627_v36  ;;  %v463_v41 = vadd.f32 %v6670_v20, %v462_v39 }
 0x11e   :  { %5760 = vmatprep.mubr.msk.f32.mxu1 %vm101_vm0, %v675_v40  ;;  %vm582_vm1 = vcmp.gt.f32.partialorder %v468_v9, 0.0  ;;  %v630_v42 = vmul.f32 0.01, %v468_v9 }
 0x11f   :  { %5761 = vmatmul.mubr.msk.f32.gmra.mrb[28].mxu1 %vm101_vm0, %v676_v38  ;;  %vm581_vm2 = vcmp.gt.f32.partialorder %v463_v41, 0.0  ;;  %v629_v43 = vmul.f32 0.01, %v463_v41  ;;  %v5688_v44 = vpop.f32.mrb[32].mxu0 }
 0x120   :  { %v478_v45 = vadd.f32 %v5688_v44, %v6670_v20  ;;  %v678_v46 = vsel %vm582_vm1, %v468_v9, %v630_v42  ;;  %v472_v47 = vpop.f32.mrb[33].mxu0 }
 0x121   :  { %v677_v48 = vsel %vm581_vm2, %v463_v41, %v629_v43  ;;  %v473_v49 = vadd.f32 %v6670_v20, %v472_v47 }
 0x122   :  { %5763 = vmatprep.mubr.msk.f32.mxu1 %vm101_vm0, %v677_v48  ;;  %vm584_vm3 = vcmp.gt.f32.partialorder %v478_v45, 0.0  ;;  %v632_v50 = vmul.f32 0.01, %v478_v45 }
 0x123   :  { %v5691_v7 = vpop.f32.mrb[34].mxu0  ;;  %5764 = vmatmul.mubr.msk.f32.gmra.mrb[30].mxu1 %vm101_vm0, %v678_v46  ;;  %vm583_vm4 = vcmp.gt.f32.partialorder %v473_v49, 0.0  ;;  %v631_v53 = vmul.f32 0.01, %v473_v49 }
 0x124   :  { %v488_v51 = vadd.f32 %v5691_v7, %v6670_v20  ;;  %v482_v52 = vpop.f32.mrb[35].mxu0  ;;  %v680_v57 = vsel %vm584_vm3, %v478_v45, %v632_v50 }
 0x125   :  { %v483_v54 = vadd.f32 %v6670_v20, %v482_v52  ;;  %v679_v61 = vsel %vm583_vm4, %v473_v49, %v631_v53 }
 0x126   :  { %vm586_vm5 = vcmp.gt.f32.partialorder %v488_v51, 0.0  ;;  %v634_v56 = vmul.f32 0.01, %v488_v51  ;;  %5766 = vmatprep.mubr.msk.f32.mxu1 %vm101_vm0, %v679_v61 }
 0x127   :  { %v5694_v55 = vpop.f32.mrb[36].mxu0  ;;  %vm585_vm6 = vcmp.gt.f32.partialorder %v483_v54, 0.0  ;;  %v633_v62 = vmul.f32 0.01, %v483_v54  ;;  %5767 = vmatmul.mubr.msk.f32.gmra.mrb[32].mxu1 %vm101_vm0, %v680_v57 }
 0x128   :  { %v498_v59 = vadd.f32 %v5694_v55, %v6670_v20  ;;  %v492_v60 = vpop.f32.mrb[37].mxu0  ;;  %v682_v18 = vsel %vm586_vm5, %v488_v51, %v634_v56 }
 0x129   :  { %v493_v63 = vadd.f32 %v6670_v20, %v492_v60  ;;  %v681_v2 = vsel %vm585_vm6, %v483_v54, %v633_v62 }
 0x12a   :  { %5769 = vmatprep.mubr.msk.f32.mxu1 %vm101_vm0, %v681_v2  ;;  %v636_v8 = vmul.f32 0.01, %v498_v59  ;;  %vm588_vm8 = vcmp.gt.f32.partialorder %v498_v59, 0.0 }
 0x12b   :  { %v5697_v0 = vpop.f32.mrb[38].mxu0  ;;  %vm587_vm7 = vcmp.gt.f32.partialorder %v493_v63, 0.0  ;;  %v635_v3 = vmul.f32 0.01, %v493_v63  ;;  %5770 = vmatmul.mubr.msk.f32.gmra.mrb[34].mxu1 %vm101_vm0, %v682_v18 }
 0x12c   :  { %v502_v1 = vpop.f32.mrb[39].mxu0  ;;  %v508_v19 = vadd.f32 %v5697_v0, %v6670_v20  ;;  %v684_v28 = vsel %vm588_vm8, %v498_v59, %v636_v8 }
 0x12d   :  { %v503_v4 = vadd.f32 %v6670_v20, %v502_v1  ;;  %v683_v22 = vsel %vm587_vm7, %v493_v63, %v635_v3 }
 0x12e   :  { %5772 = vmatprep.mubr.msk.f32.mxu1 %vm101_vm0, %v683_v22  ;;  %v638_v27 = vmul.f32 0.01, %v508_v19  ;;  %vm590_vm10 = vcmp.gt.f32.partialorder %v508_v19, 0.0 }
 0x12f   :  { %v5700_v6 = vpop.f32.mrb[40].mxu0  ;;  %v637_v23 = vmul.f32 0.01, %v503_v4  ;;  %vm589_vm9 = vcmp.gt.f32.partialorder %v503_v4, 0.0  ;;  %5773 = vmatmul.mubr.msk.f32.gmra.mrb[36].mxu1 %vm101_vm0, %v684_v28 }
 0x130   :  { %v512_v21 = vpop.f32.mrb[41].mxu0  ;;  %v518_v29 = vadd.f32 %v5700_v6, %v6670_v20  ;;  %v686_v36 = vsel %vm590_vm10, %v508_v19, %v638_v27 }
 0x131   :  { %v513_v24 = vadd.f32 %v6670_v20, %v512_v21  ;;  %v685_v31 = vsel %vm589_vm9, %v503_v4, %v637_v23 }
 0x132   :  { %5775 = vmatprep.mubr.msk.f32.mxu1 %vm101_vm0, %v685_v31  ;;  %v640_v5 = vmul.f32 0.01, %v518_v29  ;;  %vm592_vm12 = vcmp.gt.f32.partialorder %v518_v29, 0.0 }
 0x133   :  { %v5703_v25 = vpop.f32.mrb[42].mxu0  ;;  %v639_v32 = vmul.f32 0.01, %v513_v24  ;;  %vm591_vm11 = vcmp.gt.f32.partialorder %v513_v24, 0.0  ;;  %5776 = vmatmul.mubr.msk.f32.gmra.mrb[38].mxu1 %vm101_vm0, %v686_v36 }
 0x134   :  { %v522_v26 = vpop.f32.mrb[43].mxu0  ;;  %v528_v37 = vadd.f32 %v5703_v25, %v6670_v20  ;;  %v688_v40 = vsel %vm592_vm12, %v518_v29, %v640_v5 }
 0x135   :  { %v523_v33 = vadd.f32 %v6670_v20, %v522_v26  ;;  %v687_v10 = vsel %vm591_vm11, %v513_v24, %v639_v32 }
 0x136   :  { %5778 = vmatprep.mubr.msk.f32.mxu1 %vm101_vm0, %v687_v10  ;;  %v642_v39 = vmul.f32 0.01, %v528_v37  ;;  %vm594_vm14 = vcmp.gt.f32.partialorder %v528_v37, 0.0 }
 0x137   :  { %v5706_v11 = vpop.f32.mrb[44].mxu0  ;;  %v641_v9 = vmul.f32 0.01, %v523_v33  ;;  %vm593_vm13 = vcmp.gt.f32.partialorder %v523_v33, 0.0  ;;  %5779 = vmatmul.mubr.msk.f32.gmra.mrb[40].mxu1 %vm101_vm0, %v688_v40 }
 0x138   :  { %v532_v30 = vpop.f32.mrb[45].mxu0  ;;  %v538_v41 = vadd.f32 %v5706_v11, %v6670_v20  ;;  %v690_v46 = vsel %vm594_vm14, %v528_v37, %v642_v39 }
 0x139   :  { %v533_v38 = vadd.f32 %v6670_v20, %v532_v30  ;;  %v689_v42 = vsel %vm593_vm13, %v523_v33, %v641_v9 }
 0x13a   :  { %5781 = vmatprep.mubr.msk.f32.mxu1 %vm101_vm0, %v689_v42  ;;  %v644_v45 = vmul.f32 0.01, %v538_v41  ;;  %vm596_vm1 = vcmp.gt.f32.partialorder %v538_v41, 0.0 }
 0x13b   :  { %v5709_v34 = vpop.f32.mrb[46].mxu0  ;;  %v643_v43 = vmul.f32 0.01, %v533_v38  ;;  %vm595_vm15 = vcmp.gt.f32.partialorder %v533_v38, 0.0  ;;  %5782 = vmatmul.mubr.msk.f32.gmra.mrb[42].mxu1 %vm101_vm0, %v690_v46 }
 0x13c   :  { %v542_v35 = vpop.f32.mrb[47].mxu0  ;;  %v548_v47 = vadd.f32 %v5709_v34, %v6670_v20  ;;  %v692_v49 = vsel %vm596_vm1, %v538_v41, %v644_v45 }
 0x13d   :  { %v543_v44 = vadd.f32 %v6670_v20, %v542_v35  ;;  %v691_v12 = vsel %vm595_vm15, %v533_v38, %v643_v43 }
 0x13e   :  { %5784 = vmatprep.mubr.msk.f32.mxu1 %vm101_vm0, %v691_v12  ;;  %v646_v13 = vmul.f32 0.01, %v548_v47  ;;  %vm598_vm3 = vcmp.gt.f32.partialorder %v548_v47, 0.0 }
 0x13f   :  { %v645_v48 = vmul.f32 0.01, %v543_v44  ;;  %vm597_vm2 = vcmp.gt.f32.partialorder %v543_v44, 0.0  ;;  %5785 = vmatmul.mubr.msk.f32.gmra.mrb[44].mxu1 %vm101_vm0, %v692_v49 }
 0x140   :  { %v694_v7 = vsel %vm598_vm3, %v548_v47, %v646_v13 }
 0x141   :  { %v693_v20 = vsel %vm597_vm2, %v543_v44, %v645_v48 }
 0x142   :  { %5787 = vmatprep.mubr.msk.f32.mxu1 %vm101_vm0, %v693_v20 }
 0x143   :  { %5788 = vmatmul.mubr.msk.f32.gmra.mrb[46].mxu1 %vm101_vm0, %v694_v7 }
 0x1ba   :  { %v5720_v50 = vpop.f32.mrb[0].mxu1 }
 0x1bb   :  { %v916_v51 = vpop.f32.mrb[1].mxu1  ;;  %v922_v52 = vadd.f32 %v5720_v50, %v6837_v14 }
 0x1bc   :  { %v917_v53 = vadd.f32 %v6837_v14, %v916_v51 }
 0x1bd   :  { %v1204_v56 = vmul.f32 0.01, %v922_v52  ;;  %vm1156_vm5 = vcmp.gt.f32.partialorder %v922_v52, 0.0 }
 0x1be   :  { %vm1155_vm4 = vcmp.gt.f32.partialorder %v917_v53, 0.0  ;;  %v1203_v54 = vmul.f32 0.01, %v917_v53  ;;  %v5723_v55 = vpop.f32.mrb[2].mxu1 }
 0x1bf   :  { %v926_v15 = vpop.f32.mrb[3].mxu1  ;;  %v932_v62 = vadd.f32 %v5723_v55, %v6837_v14  ;;  %v1252_v63 = vsel %vm1156_vm5, %v922_v52, %v1204_v56 }
 0x1c0   :  { %v1251_v57 = vsel %vm1155_vm4, %v917_v53, %v1203_v54  ;;  %v927_v59 = vadd.f32 %v6837_v14, %v926_v15 }
 0x1c1   :  { %5275 = vmatmul.mubr.msk.f32.vlgmr.msra.gmra.mrb[48].mxu0 %vm101_vm0, %v1251_v57  ;;  %v1206_v4 = vmul.f32 0.01, %v932_v62  ;;  %vm1158_vm7 = vcmp.gt.f32.partialorder %v932_v62, 0.0 }
 0x1c2   :  { %v1205_v16 = vmul.f32 0.01, %v927_v59  ;;  %1533 = vmatprep.mubr.f32.mxu0 %v10252_v58  ;;  %v5726_v60 = vpop.f32.mrb[4].mxu1  ;;  %vm1157_vm6 = vcmp.gt.f32.partialorder %v927_v59, 0.0 }
 0x1c3   :  { %v936_v61 = vpop.f32.mrb[5].mxu1  ;;  %v942_v6 = vadd.f32 %v5726_v60, %v6837_v14  ;;  %v1254_v21 = vsel %vm1158_vm7, %v932_v62, %v1206_v4 }
 0x1c4   :  { %v1253_v0 = vsel %vm1157_vm6, %v927_v59, %v1205_v16  ;;  %v937_v1 = vadd.f32 %v6837_v14, %v936_v61 }
 0x1c5   :  { %5276 = vmatmul.mubr.msk.f32.gmra.mrb[50].mxu0 %vm101_vm0, %v1252_v63  ;;  %v1208_v22 = vmul.f32 0.01, %v942_v6  ;;  %vm1160_vm9 = vcmp.gt.f32.partialorder %v942_v6, 0.0 }
 0x1c6   :  { %1539 = vmatprep.mubr.f32.mxu0 %v10252_v58  ;;  %v5729_v2 = vpop.f32.mrb[6].mxu1  ;;  %v1207_v8 = vmul.f32 0.01, %v937_v1  ;;  %vm1159_vm8 = vcmp.gt.f32.partialorder %v937_v1, 0.0 }
 0x1c7   :  { %v946_v3 = vpop.f32.mrb[7].mxu1  ;;  %v1256_v26 = vsel %vm1160_vm9, %v942_v6, %v1208_v22  ;;  %v952_v11 = vadd.f32 %v5729_v2, %v6837_v14 }
 0x1c8   :  { %v1255_v17 = vsel %vm1159_vm8, %v937_v1, %v1207_v8  ;;  %v947_v23 = vadd.f32 %v6837_v14, %v946_v3 }
 0x1c9   :  { %5277 = vmatmul.mubr.msk.f32.gmra.mrb[52].mxu0 %vm101_vm0, %v1253_v0  ;;  %v1210_v30 = vmul.f32 0.01, %v952_v11  ;;  %vm1162_vm11 = vcmp.gt.f32.partialorder %v952_v11, 0.0 }
 0x1ca   :  { %1545 = vmatprep.mubr.f32.mxu0 %v10252_v58  ;;  %v5732_v18 = vpop.f32.mrb[8].mxu1  ;;  %v1209_v27 = vmul.f32 0.01, %v947_v23  ;;  %vm1161_vm10 = vcmp.gt.f32.partialorder %v947_v23, 0.0 }
 0x1cb   :  { %v956_v19 = vpop.f32.mrb[9].mxu1  ;;  %v1258_v35 = vsel %vm1162_vm11, %v952_v11, %v1210_v30  ;;  %v962_v5 = vadd.f32 %v5732_v18, %v6837_v14  ;;  %v3377_v11 = vld [vmem:[%s10246_s8] sm:$0xff] }
 0x1cc   :  { %v1257_v31 = vsel %vm1161_vm10, %v947_v23, %v1209_v27  ;;  %v957_v32 = vadd.f32 %v6837_v14, %v956_v19  ;;  %v3378_v27 = vld [vmem:[%s10246_s8 + $0x8] sm:$0xff] }
 0x1cd   :  { %5278 = vmatmul.mubr.msk.f32.gmra.mrb[54].mxu0 %vm101_vm0, %v1254_v21  ;;  %v1212_v9 = vmul.f32 0.01, %v962_v5  ;;  %vm1164_vm13 = vcmp.gt.f32.partialorder %v962_v5, 0.0 }
 0x1ce   :  { %1551 = vmatprep.mubr.f32.mxu0 %v10252_v58  ;;  %v5735_v24 = vpop.f32.mrb[10].mxu1  ;;  %v1211_v36 = vmul.f32 0.01, %v957_v32  ;;  %vm1163_vm12 = vcmp.gt.f32.partialorder %v957_v32, 0.0 }
 0x1cf   :  { %v966_v25 = vpop.f32.mrb[11].mxu1  ;;  %v1260_v42 = vsel %vm1164_vm13, %v962_v5, %v1212_v9  ;;  %v972_v43 = vadd.f32 %v5735_v24, %v6837_v14 }
 0x1d0   :  { %v1259_v38 = vsel %vm1163_vm12, %v957_v32, %v1211_v36  ;;  %v967_v39 = vadd.f32 %v6837_v14, %v966_v25  ;;  %v3380_v32 = vld [vmem:[%s10246_s8 + $0x18] sm:$0xff]  ;;  %v3381_v36 = vld [vmem:[%s10246_s8 + $0x20] sm:$0xff] }
 0x1d1   :  { %5279 = vmatmul.mubr.msk.f32.gmra.mrb[56].mxu0 %vm101_vm0, %v1255_v17  ;;  %v1214_v47 = vmul.f32 0.01, %v972_v43  ;;  %vm1166_vm15 = vcmp.gt.f32.partialorder %v972_v43, 0.0 }
 0x1d2   :  { %1557 = vmatprep.mubr.f32.mxu0 %v10252_v58  ;;  %v5738_v28 = vpop.f32.mrb[12].mxu1  ;;  %v1213_v44 = vmul.f32 0.01, %v967_v39  ;;  %vm1165_vm14 = vcmp.gt.f32.partialorder %v967_v39, 0.0 }
 0x1d3   :  { %v976_v29 = vpop.f32.mrb[13].mxu1  ;;  %v1262_v13 = vsel %vm1166_vm15, %v972_v43, %v1214_v47  ;;  %v982_v49 = vadd.f32 %v5738_v28, %v6837_v14  ;;  %v6320_v28 = vmov 0.0|0.0  }
 0x1d4   :  { %v1261_v12 = vsel %vm1165_vm14, %v967_v39, %v1213_v44  ;;  %v977_v48 = vadd.f32 %v6837_v14, %v976_v29  ;;  %5976 = vmatprep.subr.bf16.mxu1 %v6320_v28  ;;  %v5977_v29 = vpack.c.bf16 %v3378_v27, %v3377_v11  ;;  %v3383_v44 = vld [vmem:[%s10246_s8 + $0x30] sm:$0xff] }
 0x1d5   :  { %5280 = vmatmul.mubr.msk.f32.gmra.mrb[58].mxu0 %vm101_vm0, %v1256_v26  ;;  %v1216_v7 = vmul.f32 0.01, %v982_v49  ;;  %vm1168_vm2 = vcmp.gt.f32.partialorder %v982_v49, 0.0 }
 0x1d6   :  { %1563 = vmatprep.mubr.f32.mxu0 %v10252_v58  ;;  %v5741_v33 = vpop.f32.mrb[14].mxu1  ;;  %v1215_v20 = vmul.f32 0.01, %v977_v48  ;;  %vm1167_vm1 = vcmp.gt.f32.partialorder %v977_v48, 0.0  ;;  %5978 = vmatpush1.bf16.msra.mxu1 %v5977_v29 }
 0x1d7   :  { %v986_v34 = vpop.f32.mrb[15].mxu1  ;;  %v992_v52 = vadd.f32 %v5741_v33, %v6837_v14  ;;  %v1264_v54 = vsel %vm1168_vm2, %v982_v49, %v1216_v7  ;;  %5979 = vmatprep.subr.bf16.mxu1 %v6320_v28 }
 0x1d8   :  { %v1263_v50 = vsel %vm1167_vm1, %v977_v48, %v1215_v20  ;;  %v987_v51 = vadd.f32 %v6837_v14, %v986_v34  ;;  %v1309_v34 = vlaneseq  ;;  %v6321_v48 = vmov 0  }
 0x1d9   :  { %5281 = vmatmul.mubr.msk.f32.gmra.mrb[60].mxu0 %vm101_vm0, %v1257_v31  ;;  %v1218_v55 = vmul.f32 0.01, %v992_v52  ;;  %vm1170_vm4 = vcmp.gt.f32.partialorder %v992_v52, 0.0  ;;  %v3379_v31 = vld [vmem:[%s10246_s8 + $0x10] sm:$0xff] }
 0x1da   :  { %1569 = vmatprep.mubr.f32.mxu0 %v10252_v58  ;;  %v5744_v37 = vpop.f32.mrb[16].mxu1  ;;  %v1217_v53 = vmul.f32 0.01, %v987_v51  ;;  %vm1169_vm3 = vcmp.gt.f32.partialorder %v987_v51, 0.0  ;;  %v5980_v33 = vpack.c.bf16 %v3380_v32, %v3379_v31 }
 0x1db   :  { %v996_v10 = vpop.f32.mrb[17].mxu1  ;;  %v1002_v57 = vadd.f32 %v5744_v37, %v6837_v14  ;;  %v1266_v16 = vsel %vm1170_vm4, %v992_v52, %v1218_v55  ;;  %v3382_v37 = vld [vmem:[%s10246_s8 + $0x28] sm:$0xff] }
 0x1dc   :  { %v1265_v15 = vsel %vm1169_vm3, %v987_v51, %v1217_v53  ;;  %v997_v56 = vadd.f32 %v6837_v14, %v996_v10  ;;  %5981 = vmatpush1.bf16.msra.mxu1 %v5980_v33  ;;  %v5983_v10 = vpack.c.bf16 %v3382_v37, %v3381_v36  ;;  %v3386_v51 = vld [vmem:[%s10246_s8 + $0x48] sm:$0xff] }
 0x1dd   :  { %5282 = vmatmul.mubr.msk.f32.gmra.mrb[62].mxu0 %vm101_vm0, %v1258_v35  ;;  %v1220_v60 = vmul.f32 0.01, %v1002_v57  ;;  %vm1172_vm6 = vcmp.gt.f32.partialorder %v1002_v57, 0.0  ;;  %5982 = vmatprep.subr.bf16.mxu1 %v6320_v28 }
 0x1de   :  { %1575 = vmatprep.mubr.f32.mxu0 %v10252_v58  ;;  %v5747_v40 = vpop.f32.mrb[18].mxu1  ;;  %v1219_v59 = vmul.f32 0.01, %v997_v56  ;;  %vm1171_vm5 = vcmp.gt.f32.partialorder %v997_v56, 0.0 }
 0x1df   :  { %v1006_v41 = vpop.f32.mrb[19].mxu1  ;;  %v1012_v63 = vadd.f32 %v5747_v40, %v6837_v14  ;;  %v1268_v1 = vsel %vm1172_vm6, %v1002_v57, %v1220_v60  ;;  %v6945_v40 = vshrl.u32 %v1309_v34, 7  ;;  %v3391_v34 = vld [vmem:[%s10246_s8 + $0x70] sm:$0xff] }
 0x1e0   :  { %v1267_v61 = vsel %vm1171_vm5, %v997_v56, %v1219_v59  ;;  %v1007_v62 = vadd.f32 %v6837_v14, %v1006_v41  ;;  %5984 = vmatpush1.bf16.msra.mxu1 %v5983_v10 }
 0x1e1   :  { %5283 = vmatmul.mubr.msk.f32.gmra.mrb[64].mxu0 %vm101_vm0, %v1259_v38  ;;  %v1222_v2 = vmul.f32 0.01, %v1012_v63  ;;  %vm1174_vm8 = vcmp.gt.f32.partialorder %v1012_v63, 0.0  ;;  %v1816_v38 = vld [vmem:[%s10245_s7] sm:$0xf]  ;;  %10298 = vst [vmem:[#allocation5_spill] sm:$0xff] %v6945_v40  ;;  %5985 = vmatprep.subr.bf16.mxu1 %v6320_v28 }
 0x1e2   :  { %1581 = vmatprep.mubr.f32.mxu0 %v10252_v58  ;;  %v6877_v45 = vpop.f32.mrb[20].mxu1  ;;  %v1221_v0 = vmul.f32 0.01, %v1007_v62  ;;  %vm1173_vm7 = vcmp.gt.f32.partialorder %v1007_v62, 0.0  ;;  %vm1817_vm13 = vcmp.gt.f32.partialorder %v1816_v38, 0.5  ;;  %v1311_v47 = vsub.s32 0, %v6945_v40 }
 0x1e3   :  { %v1016_v46 = vpop.f32.mrb[21].mxu1  ;;  %v1270_v6 = vsel %vm1174_vm8, %v1012_v63, %v1222_v2  ;;  %v1022_v19 = vadd.f32 %v6877_v45, %v6837_v14  ;;  %v3384_v45 = vld [vmem:[%s10246_s8 + $0x38] sm:$0xff]  ;;  %v2412_v59 = vsub.s32 3, %v6945_v40 }
 0x1e4   :  { %v1269_v3 = vsel %vm1173_vm7, %v1007_v62, %v1221_v0  ;;  %v1017_v4 = vadd.f32 %v6837_v14, %v1016_v46  ;;  %v5986_v46 = vpack.c.bf16 %v3384_v45, %v3383_v44  ;;  %v3387_v62 = vld [vmem:[%s10246_s8 + $0x50] sm:$0xff]  ;;  %v3388_v63 = vld [vmem:[%s10246_s8 + $0x58] sm:$0xff] }
 0x1e5   :  { %5284 = vmatmul.mubr.msk.f32.gmra.mrb[66].mxu0 %vm101_vm0, %v1260_v42  ;;  %v1224_v21 = vmul.f32 0.01, %v1022_v19  ;;  %vm1176_vm10 = vcmp.gt.f32.partialorder %v1022_v19, 0.0 }
 0x1e6   :  { %1587 = vmatprep.mubr.f32.mxu0 %v10252_v58  ;;  %v1223_v8 = vmul.f32 0.01, %v1017_v4  ;;  %vm1175_vm9 = vcmp.gt.f32.partialorder %v1017_v4, 0.0  ;;  %v5753_v17 = vpop.f32.mrb[22].mxu1  ;;  %5987 = vmatpush1.bf16.msra.mxu1 %v5986_v46 }
 0x1e7   :  { %v1272_v22 = vsel %vm1176_vm10, %v1022_v19, %v1224_v21  ;;  %v1026_v23 = vpop.f32.mrb[23].mxu1  ;;  %v1032_v30 = vadd.f32 %v5753_v17, %v6837_v14  ;;  %5988 = vmatprep.subr.bf16.mxu1 %v6320_v28  ;;  %v3389_v19 = vld [vmem:[%s10246_s8 + $0x60] sm:$0xff]  ;;  %v3390_v21 = vld [vmem:[%s10246_s8 + $0x68] sm:$0xff] }
 0x1e8   :  { %v1271_v18 = vsel %vm1175_vm9, %v1017_v4, %v1223_v8  ;;  %v1027_v24 = vadd.f32 %v6837_v14, %v1026_v23  ;;  %v5995_v23 = vpack.c.bf16 %v3390_v21, %v3389_v19 }
 0x1e9   :  { %5285 = vmatmul.mubr.msk.f32.gmra.mrb[68].mxu0 %vm101_vm0, %v1261_v12  ;;  %v1226_v35 = vmul.f32 0.01, %v1032_v30  ;;  %vm1178_vm12 = vcmp.gt.f32.partialorder %v1032_v30, 0.0  ;;  %v2215_v12 = vsub.s32 2, %v6945_v40 }
 0x1ea   :  { %1593 = vmatprep.mubr.f32.mxu0 %v10252_v58  ;;  %vm1177_vm11 = vcmp.gt.f32.partialorder %v1027_v24, 0.0  ;;  %v1225_v25 = vmul.f32 0.01, %v1027_v24  ;;  %v5756_v5 = vpop.f32.mrb[24].mxu1 }
 0x1eb   :  { %v1036_v9 = vpop.f32.mrb[25].mxu1  ;;  %v1042_v41 = vadd.f32 %v5756_v5, %v6837_v14  ;;  %v1274_v43 = vsel %vm1178_vm12, %v1032_v30, %v1226_v35  ;;  %v3392_v35 = vld [vmem:[%s10246_s8 + $0x78] sm:$0xff] }
 0x1ec   :  { %v1273_v26 = vsel %vm1177_vm11, %v1027_v24, %v1225_v25  ;;  %v1037_v39 = vadd.f32 %v6837_v14, %v1036_v9  ;;  %v7011_v25 = vpop.permute.xlu1 %2751  ;;  %v5998_v5 = vpack.c.bf16 %v3392_v35, %v3391_v34 }
 0x1ed   :  { %5286 = vmatmul.mubr.msk.f32.gmra.mrb[70].mxu0 %vm101_vm0, %v1262_v13  ;;  %v1818_v13 = vsel %vm1817_vm13, 1, %v6321_v48  ;;  %v1228_v49 = vmul.f32 0.01, %v1042_v41  ;;  %vm1180_vm15 = vcmp.gt.f32.partialorder %v1042_v41, 0.0 }
 0x1ee   :  { %1599 = vmatprep.mubr.f32.mxu0 %v10252_v58  ;;  %v1227_v42 = vmul.f32 0.01, %v1037_v39  ;;  %vm1179_vm14 = vcmp.gt.f32.partialorder %v1037_v39, 0.0  ;;  %v5759_v7 = vpop.f32.mrb[26].mxu1  ;;  %v6973_v56 = vrot.slane %v1818_v13, %v1311_v47  ;;  %v6975_v57 = vrot.slane %v1818_v13, %v2215_v12 }
 0x1ef   :  { %v1046_v53 = vpop.f32.mrb[27].mxu1  ;;  %v6996_v4 = vrot.slane %v1818_v13, %v2412_v59 }
 0x1f0   :  { %v1275_v20 = vsel %vm1179_vm14, %v1037_v39, %v1227_v42  ;;  %v1047_v55 = vadd.f32 %v6837_v14, %v1046_v53  ;;  %vm1823_vm2 = vcmp.eq.s32.totalorder %v6973_v56, 1  ;;  %vm2217_vm3 = vcmp.eq.s32.totalorder %v6975_v57, 1  ;;  %v7045_v38 = vpop.permute.xlu1 %2753  ;;  %v3393_v42 = vld [vmem:[%s10246_s8 + $0x80] sm:$0xff] }
 0x1f1   :  { %5287 = vmatmul.mubr.msk.f32.gmra.mrb[72].mxu0 %vm101_vm0, %v1263_v50  ;;  %v3385_v50 = vld [vmem:[%s10246_s8 + $0x40] sm:$0xff]  ;;  %vm2414_vm6 = vcmp.eq.s32.totalorder %v6996_v4, 1 }
 0x1f2   :  { %1605 = vmatprep.mubr.f32.mxu0 %v10252_v58  ;;  %v5989_v52 = vpack.c.bf16 %v3386_v51, %v3385_v50  ;;  %v1229_v60 = vmul.f32 0.01, %v1047_v55  ;;  %vm1181_vm1 = vcmp.gt.f32.partialorder %v1047_v55, 0.0  ;;  %v3395_v50 = vld [vmem:[%s10246_s8 + $0x90] sm:$0xff]  ;;  %v3396_v51 = vld [vmem:[%s10246_s8 + $0x98] sm:$0xff] }
 0x1f4   :  { %5990 = vmatpush1.bf16.msra.mxu1 %v5989_v52  ;;  %v1277_v8 = vsel %vm1181_vm1, %v1047_v55, %v1229_v60  ;;  %v7087_v60 = vpop.permute.xlu1 %2755 }
 0x1f5   :  { %5288 = vmatmul.mubr.msk.f32.gmra.mrb[74].mxu0 %vm101_vm0, %v1264_v54  ;;  %v1307_v54 = vld [vmem:[%s10244_s6] sm:$0x3]  ;;  %5991 = vmatprep.subr.bf16.mxu1 %v6320_v28 }
 0x1f6   :  { %1611 = vmatprep.mubr.f32.mxu0 %v10252_v58  ;;  %v6986_v0 = vrot.slane %v1307_v54, %v1311_v47  ;;  %v6004_v54 = vpack.c.bf16 %v3396_v51, %v3395_v50  ;;  %v3403_v51 = vld [vmem:[%s10246_s8 + $0xd0] sm:$0xff] }
 0x1f9   :  { %5289 = vmatmul.mubr.msk.f32.gmra.mrb[76].mxu0 %vm101_vm0, %v1265_v15  ;;  %v10251_v15 = vsub.s32 1, %v6945_v40 }
 0x1fa   :  { %1617 = vmatprep.mubr.f32.mxu0 %v10252_v58 }
 0x1fd   :  { %5290 = vmatmul.mubr.msk.f32.gmra.mrb[78].mxu0 %vm101_vm0, %v1266_v16  ;;  %v1052_v16 = vadd.f32 %v5759_v7, %v6837_v14 }
 0x1fe   :  { %1623 = vmatprep.mubr.f32.mxu0 %v10252_v58 }
 0x1ff   :  { %vm1182_vm4 = vcmp.gt.f32.partialorder %v1052_v16, 0.0 }
 0x201   :  { %5291 = vmatmul.mubr.msk.f32.gmra.mrb[80].mxu0 %vm101_vm0, %v1267_v61  ;;  %v1276_v61 = vsel %vm1180_vm15, %v1042_v41, %v1228_v49 }
 0x202   :  { %1629 = vmatprep.mubr.f32.mxu0 %v10252_v58 }
 0x205   :  { %5292 = vmatmul.mubr.msk.f32.gmra.mrb[82].mxu0 %vm101_vm0, %v1268_v1  ;;  %v5992_v1 = vpack.c.bf16 %v3388_v63, %v3387_v62  ;;  %v3397_v63 = vld [vmem:[%s10246_s8 + $0xa0] sm:$0xff] }
 0x206   :  { %1635 = vmatprep.mubr.f32.mxu0 %v10252_v58 }
 0x207   :  { %5993 = vmatpush1.bf16.msra.mxu1 %v5992_v1  ;;  %v3398_v1 = vld [vmem:[%s10246_s8 + $0xa8] sm:$0xff] }
 0x208   :  { %5994 = vmatprep.subr.bf16.mxu1 %v6320_v28 }
 0x209   :  { %5293 = vmatmul.mubr.msk.f32.gmra.mrb[84].mxu0 %vm101_vm0, %v1269_v3  ;;  %v6994_v3 = vrot.slane %v1818_v13, %v10251_v15 }
 0x20a   :  { %1641 = vmatprep.mubr.f32.mxu0 %v10252_v58 }
 0x20b   :  { %5996 = vmatpush1.bf16.msra.mxu1 %v5995_v23  ;;  %vm2020_vm5 = vcmp.eq.s32.totalorder %v6994_v3, 1 }
 0x20c   :  { %5997 = vmatprep.subr.bf16.mxu1 %v6320_v28 }
 0x20d   :  { %5294 = vmatmul.mubr.msk.f32.gmra.mrb[86].mxu0 %vm101_vm0, %v1270_v6  ;;  %v1230_v6 = vmul.f32 0.01, %v1052_v16 }
 0x20e   :  { %1647 = vmatprep.mubr.f32.mxu0 %v10252_v58 }
 0x20f   :  { %v1278_v31 = vsel %vm1182_vm4, %v1052_v16, %v1230_v6  ;;  %5999 = vmatpush1.bf16.msra.mxu1 %v5998_v5 }
 0x210   :  { %6000 = vmatprep.subr.bf16.mxu1 %v6320_v28 }
 0x211   :  { %5295 = vmatmul.mubr.msk.f32.gmra.mrb[88].mxu0 %vm101_vm0, %v1271_v18  ;;  %v5762_v18 = vpop.f32.mrb[28].mxu1 }
 0x212   :  { %1653 = vmatprep.mubr.f32.mxu0 %v10252_v58  ;;  %v1056_v24 = vpop.f32.mrb[29].mxu1  ;;  %v1062_v30 = vadd.f32 %v5762_v18, %v6837_v14  ;;  %v6007_v18 = vpack.c.bf16 %v3398_v1, %v3397_v63 }
 0x213   :  { %v5765_v45 = vpop.f32.mrb[30].mxu1 }
 0x214   :  { %v1232_v39 = vmul.f32 0.01, %v1062_v30  ;;  %vm1184_vm8 = vcmp.gt.f32.partialorder %v1062_v30, 0.0  ;;  %v1066_v47 = vpop.f32.mrb[31].mxu1  ;;  %v1072_v52 = vadd.f32 %v5765_v45, %v6837_v14 }
 0x215   :  { %5296 = vmatmul.mubr.msk.f32.gmra.mrb[90].mxu0 %vm101_vm0, %v1272_v22  ;;  %v1067_v13 = vadd.f32 %v6837_v14, %v1066_v47 }
 0x216   :  { %1659 = vmatprep.mubr.f32.mxu0 %v10252_v58  ;;  %vm1186_vm10 = vcmp.gt.f32.partialorder %v1072_v52, 0.0 }
 0x217   :  { %v1233_v53 = vmul.f32 0.01, %v1067_v13  ;;  %vm1185_vm9 = vcmp.gt.f32.partialorder %v1067_v13, 0.0 }
 0x219   :  { %5297 = vmatmul.mubr.msk.f32.gmra.mrb[92].mxu0 %vm101_vm0, %v1273_v26  ;;  %v1057_v26 = vadd.f32 %v6837_v14, %v1056_v24  ;;  %v1281_v6 = vsel %vm1185_vm9, %v1067_v13, %v1233_v53 }
 0x21a   :  { %1665 = vmatprep.mubr.f32.mxu0 %v10252_v58 }
 0x21b   :  { %vm1183_vm7 = vcmp.gt.f32.partialorder %v1057_v26, 0.0  ;;  %v1231_v33 = vmul.f32 0.01, %v1057_v26 }
 0x21d   :  { %5298 = vmatmul.mubr.msk.f32.gmra.mrb[94].mxu0 %vm101_vm0, %v1274_v43  ;;  %v1279_v41 = vsel %vm1183_vm7, %v1057_v26, %v1231_v33  ;;  %v3394_v43 = vld [vmem:[%s10246_s8 + $0x88] sm:$0xff]  ;;  %v7109_v26 = vpop.permute.xlu1 %2757 }
 0x21e   :  { %1671 = vmatprep.mubr.f32.mxu0 %v10252_v58  ;;  %v6001_v46 = vpack.c.bf16 %v3394_v43, %v3393_v42  ;;  %v3402_v42 = vld [vmem:[%s10246_s8 + $0xc8] sm:$0xff] }
 0x220   :  { %6002 = vmatpush1.bf16.msra.mxu1 %v6001_v46 }
 0x221   :  { %5299 = vmatmul.mubr.msk.f32.gmra.mrb[96].mxu0 %vm101_vm0, %v1275_v20  ;;  %v1280_v20 = vsel %vm1184_vm8, %v1062_v30, %v1232_v39  ;;  %6003 = vmatprep.subr.bf16.mxu1 %v6320_v28  ;;  %v3400_v30 = vld [vmem:[%s10246_s8 + $0xb8] sm:$0xff]  ;;  %v7145_v47 = vpop.permute.xlu1 %2901 }
 0x222   :  { %1677 = vmatprep.mubr.f32.mxu0 %v10252_v58 }
 0x224   :  { %6005 = vmatpush1.bf16.msra.mxu1 %v6004_v54 }
 0x225   :  { %5300 = vmatmul.mubr.msk.f32.gmra.mrb[98].mxu0 %vm101_vm0, %v1276_v61  ;;  %6006 = vmatprep.subr.bf16.mxu1 %v6320_v28 }
 0x226   :  { %1683 = vmatprep.mubr.f32.mxu0 %v10252_v58 }
 0x228   :  { %6008 = vmatpush1.bf16.msra.mxu1 %v6007_v18 }
 0x229   :  { %5301 = vmatmul.mubr.msk.f32.gmra.mrb[100].mxu0 %vm101_vm0, %v1277_v8  ;;  %v5768_v8 = vpop.f32.mrb[32].mxu1  ;;  %6009 = vmatprep.subr.bf16.mxu1 %v6320_v28 }
 0x22a   :  { %1689 = vmatprep.mubr.f32.mxu0 %v10252_v58  ;;  %v1076_v24 = vpop.f32.mrb[33].mxu1 }
 0x22d   :  { %5302 = vmatmul.mubr.msk.f32.gmra.mrb[102].mxu0 %vm101_vm0, %v1278_v31  ;;  %v1082_v31 = vadd.f32 %v5768_v8, %v6837_v14 }
 0x22e   :  { %1695 = vmatprep.mubr.f32.mxu0 %v10252_v58 }
 0x22f   :  { %v1236_v43 = vmul.f32 0.01, %v1082_v31  ;;  %vm1188_vm12 = vcmp.gt.f32.partialorder %v1082_v31, 0.0 }
 0x231   :  { %5303 = vmatmul.mubr.msk.f32.gmra.mrb[104].mxu0 %vm101_vm0, %v1279_v41  ;;  %v3401_v41 = vld [vmem:[%s10246_s8 + $0xc0] sm:$0xff] }
 0x232   :  { %1701 = vmatprep.mubr.f32.mxu0 %v10252_v58  ;;  %v6013_v46 = vpack.c.bf16 %v3402_v42, %v3401_v41  ;;  %v3408_v41 = vld [vmem:[%s10246_s8 + $0xf8] sm:$0xff] }
 0x235   :  { %5304 = vmatmul.mubr.msk.f32.gmra.mrb[106].mxu0 %vm101_vm0, %v1280_v20 }
 0x236   :  { %1707 = vmatprep.mubr.f32.mxu0 %v10252_v58 }
 0x239   :  { %5305 = vmatmul.mubr.msk.f32.gmra.mrb[108].mxu0 %vm101_vm0, %v1281_v6 }
 0x23a   :  { %1713 = vmatprep.mubr.f32.mxu0 %v10252_v58 }
 0x294   :  { %v1529_v2 = vpop.f32.mrb[48].mxu0 }
 0x295   :  { %v7006_v22 = vadd.f32 %v1529_v2, %v6986_v0  ;;  %v7008_v17 = vpop.f32.mrb[49].mxu0  ;;  %v1234_v2 = vmul.f32 0.01, %v1072_v52 }
 0x296   :  { %10299 = vst [vmem:[#allocation6_spill] sm:$0xff] %v7008_v17 }
 0x297   :  { %v2218_v11 = vsel %vm2217_vm3, %v7006_v22, -1e+30  ;;  %v1824_v27 = vsel %vm1823_vm2, %v7006_v22, -1e+30  ;;  %v2415_v37 = vsel %vm2414_vm6, %v7006_v22, -1e+30  ;;  %v1282_v33 = vsel %vm1186_vm10, %v1072_v52, %v1234_v2 }
 0x298   :  { %v1535_v29 = vpop.f32.mrb[50].mxu0  ;;  %2266 = vmax.xlane.f32.xlu1 %v2218_v11  ;;  %1872 = vmax.xlane.f32.xlu0 %v1824_v27  ;;  %v2021_v10 = vsel %vm2020_vm5, %v7006_v22, -1e+30  ;;  %v1077_v27 = vadd.f32 %v6837_v14, %v1076_v24  ;;  %v3404_v52 = vld [vmem:[%s10246_s8 + $0xd8] sm:$0xff] }
 0x299   :  { %v7025_v32 = vpop.f32.mrb[51].mxu0  ;;  %v7037_v36 = vadd.f32 %v1535_v29, %v6986_v0  ;;  %v3399_v29 = vld [vmem:[%s10246_s8 + $0xb0] sm:$0xff]  ;;  %5306 = vmatmul.mubr.msk.f32.gmra.mrb[110].mxu0 %vm101_vm0, %v1282_v33 }
 0x29a   :  { %10300 = vst [vmem:[#allocation7_spill] sm:$0xff] %v7025_v32  ;;  %v6010_v34 = vpack.c.bf16 %v3400_v30, %v3399_v29  ;;  %vm1187_vm11 = vcmp.gt.f32.partialorder %v1077_v27, 0.0  ;;  %1719 = vmatprep.mubr.f32.mxu0 %v10252_v58 }
 0x29b   :  { %v2022_v12 = vsel %vm2020_vm5, %v7037_v36, -1e+30  ;;  %v1825_v48 = vsel %vm1823_vm2, %v7037_v36, -1e+30  ;;  %v2416_v59 = vsel %vm2414_vm6, %v7037_v36, -1e+30 }
 0x29c   :  { %v1541_v9 = vpop.f32.mrb[52].mxu0  ;;  %2463 = vmax.xlane.f32.xlu1 %v2415_v37  ;;  %2069 = vmax.xlane.f32.xlu0 %v2021_v10  ;;  %v2219_v16 = vsel %vm2217_vm3, %v7037_v36, -1e+30 }
 0x29d   :  { %v7054_v44 = vpop.f32.mrb[53].mxu0  ;;  %v7079_v55 = vadd.f32 %v1541_v9, %v6986_v0  ;;  %v1235_v9 = vmul.f32 0.01, %v1077_v27  ;;  %6011 = vmatpush1.bf16.msra.mxu1 %v6010_v34 }
 0x29e   :  { %10301 = vst [vmem:[#allocation8_spill] sm:$0xff] %v7054_v44  ;;  %6012 = vmatprep.subr.bf16.mxu1 %v6320_v28 }
 0x29f   :  { %v2023_v19 = vsel %vm2020_vm5, %v7079_v55, -1e+30  ;;  %v1826_v21 = vsel %vm1823_vm2, %v7079_v55, -1e+30  ;;  %v2417_v5 = vsel %vm2414_vm6, %v7079_v55, -1e+30  ;;  %v1283_v45 = vsel %vm1187_vm11, %v1077_v27, %v1235_v9  ;;  %v7191_v27 = vpop.permute.xlu1 %3045 }
 0x2a0   :  { %v1547_v49 = vpop.f32.mrb[54].mxu0  ;;  %2071 = vmax.xlane.f32.xlu1 %v2022_v12  ;;  %1874 = vmax.xlane.f32.xlu0 %v1825_v48  ;;  %v2220_v37 = vsel %vm2217_vm3, %v7079_v55, -1e+30  ;;  %v3407_v9 = vld [vmem:[%s10246_s8 + $0xf0] sm:$0xff] }
 0x2a1   :  { %v7066_v7 = vpop.f32.mrb[55].mxu0  ;;  %v7124_v35 = vadd.f32 %v1547_v49, %v6986_v0  ;;  %5307 = vmatmul.mubr.msk.f32.gmra.mrb[112].mxu0 %vm101_vm0, %v1283_v45  ;;  %v5771_v49 = vpop.f32.mrb[34].mxu1  ;;  %6014 = vmatpush1.bf16.msra.mxu1 %v6013_v46 }
 0x2a2   :  { %10302 = vst [vmem:[#allocation9_spill] sm:$0xff] %v7066_v7  ;;  %v1086_v50 = vpop.f32.mrb[35].mxu1  ;;  %1725 = vmatprep.mubr.f32.mxu0 %v10252_v58  ;;  %v1092_v53 = vadd.f32 %v5771_v49, %v6837_v14  ;;  %6015 = vmatprep.subr.bf16.mxu1 %v6320_v28  ;;  %v6022_v49 = vpack.c.bf16 %v3408_v41, %v3407_v9 }
 0x2a3   :  { %v2024_v12 = vsel %vm2020_vm5, %v7124_v35, -1e+30  ;;  %v1827_v48 = vsel %vm1823_vm2, %v7124_v35, -1e+30  ;;  %v1087_v54 = vadd.f32 %v6837_v14, %v1086_v50  ;;  %v2418_v1 = vsel %vm2414_vm6, %v7124_v35, -1e+30 }
 0x2a4   :  { %2465 = vmax.xlane.f32.xlu1 %v2416_v59  ;;  %2268 = vmax.xlane.f32.xlu0 %v2219_v16  ;;  %v7089_v61 = vpop.f32.mrb[56].mxu0  ;;  %v1284_v59 = vsel %vm1188_vm12, %v1082_v31, %v1236_v43  ;;  %v6016_v16 = vpack.c.bf16 %v3404_v52, %v3403_v51  ;;  %v2221_v2 = vsel %vm2217_vm3, %v7124_v35, -1e+30  ;;  %vm1190_vm14 = vcmp.gt.f32.partialorder %v1092_v53, 0.0  ;;  %v5774_v34 = vpop.f32.mrb[36].mxu1 }
 0x2a5   :  { %v7091_v62 = vpop.f32.mrb[57].mxu0  ;;  %v7170_v63 = vadd.f32 %v7089_v61, %v6986_v0  ;;  %5308 = vmatmul.mubr.msk.f32.gmra.mrb[114].mxu0 %vm101_vm0, %v1284_v59  ;;  %vm1189_vm13 = vcmp.gt.f32.partialorder %v1087_v54, 0.0  ;;  %v1237_v18 = vmul.f32 0.01, %v1087_v54  ;;  %v3405_v61 = vld [vmem:[%s10246_s8 + $0xe0] sm:$0xff]  ;;  %v1102_v42 = vadd.f32 %v5774_v34, %v6837_v14  ;;  %v7230_v52 = vpop.permute.xlu1 %2903 }
 0x2a6   :  { %10303 = vst [vmem:[#allocation10_spill] sm:$0xff] %v7091_v62  ;;  %6017 = vmatpush1.bf16.msra.mxu1 %v6016_v16  ;;  %1731 = vmatprep.mubr.f32.mxu0 %v10252_v58 }
 0x2a7   :  { %6018 = vmatprep.subr.bf16.mxu1 %v6320_v28  ;;  %v2025_v29 = vsel %vm2020_vm5, %v7170_v63, -1e+30  ;;  %v1828_v30 = vsel %vm1823_vm2, %v7170_v63, -1e+30  ;;  %v1285_v31 = vsel %vm1189_vm13, %v1087_v54, %v1237_v18  ;;  %vm1192_vm1 = vcmp.gt.f32.partialorder %v1102_v42, 0.0 }
 0x2a8   :  { %2073 = vmax.xlane.f32.xlu1 %v2023_v19  ;;  %1876 = vmax.xlane.f32.xlu0 %v1826_v21  ;;  %v7107_v23 = vpop.f32.mrb[58].mxu0  ;;  %v3406_v19 = vld [vmem:[%s10246_s8 + $0xe8] sm:$0xff]  ;;  %v1238_v21 = vmul.f32 0.01, %v1092_v53 }
 0x2a9   :  { %v7111_v11 = vpop.f32.mrb[59].mxu0  ;;  %v6019_v24 = vpack.c.bf16 %v3406_v19, %v3405_v61  ;;  %5309 = vmatmul.mubr.msk.f32.gmra.mrb[116].mxu0 %vm101_vm0, %v1285_v31  ;;  %v7216_v46 = vadd.f32 %v7107_v23, %v6986_v0  ;;  %v1240_v23 = vmul.f32 0.01, %v1102_v42  ;;  %v7262_v9 = vpop.permute.xlu1 %2761 }
 0x2aa   :  { %10304 = vst [vmem:[#allocation11_spill] sm:$0xff] %v7111_v11  ;;  %1737 = vmatprep.mubr.f32.mxu0 %v10252_v58  ;;  %v1286_v45 = vsel %vm1190_vm14, %v1092_v53, %v1238_v21 }
 0x2ab   :  { %6020 = vmatpush1.bf16.msra.mxu1 %v6019_v24  ;;  %v2026_v53 = vsel %vm2020_vm5, %v7216_v46, -1e+30  ;;  %v1829_v54 = vsel %vm1823_vm2, %v7216_v46, -1e+30  ;;  %v1288_v21 = vsel %vm1192_vm1, %v1102_v42, %v1240_v23  ;;  %vm3231_vm1 = vcmask 523264  }
 0x2ac   :  { %2467 = vmax.xlane.f32.xlu1 %v2417_v5  ;;  %2270 = vmax.xlane.f32.xlu0 %v2220_v37  ;;  %v7133_v10 = vpop.f32.mrb[60].mxu0  ;;  %v1096_v37 = vpop.f32.mrb[37].mxu1 }
 0x2ad   :  { %v7135_v39 = vpop.f32.mrb[61].mxu0  ;;  %v1097_v43 = vadd.f32 %v6837_v14, %v1096_v37  ;;  %6021 = vmatprep.subr.bf16.mxu1 %v6320_v28  ;;  %5310 = vmatmul.mubr.msk.f32.gmra.mrb[118].mxu0 %vm101_vm0, %v1286_v45  ;;  %v7248_v24 = vadd.f32 %v7133_v10, %v6986_v0 }
 0x2ae   :  { %10305 = vst [vmem:[#allocation12_spill] sm:$0xff] %v7135_v39  ;;  %1743 = vmatprep.mubr.f32.mxu0 %v10252_v58 }
 0x2af   :  { %vm1191_vm15 = vcmp.gt.f32.partialorder %v1097_v43, 0.0  ;;  %v1239_v28 = vmul.f32 0.01, %v1097_v43  ;;  %6023 = vmatpush1.bf16.msra.mxu1 %v6022_v49  ;;  %v2027_v41 = vsel %vm2020_vm5, %v7248_v24, -1e+30 }
 0x2b0   :  { %2075 = vmax.xlane.f32.xlu1 %v2024_v12  ;;  %1878 = vmax.xlane.f32.xlu0 %v1827_v48  ;;  %v7154_v13 = vpop.f32.mrb[62].mxu0  ;;  %v2419_v12 = vsel %vm2414_vm6, %v7170_v63, -1e+30  ;;  %v2222_v48 = vsel %vm2217_vm3, %v7170_v63, -1e+30 }
 0x2b1   :  { %v7156_v20 = vpop.f32.mrb[63].mxu0  ;;  %v1287_v59 = vsel %vm1191_vm15, %v1097_v43, %v1239_v28  ;;  %v1830_v42 = vsel %vm1823_vm2, %v7248_v24, -1e+30 }
 0x2b2   :  { %10306 = vst [vmem:[#allocation13_spill] sm:$0xff] %v7156_v20  ;;  %5311 = vmatmul.mubr.msk.f32.gmra.mrb[120].mxu0 %vm101_vm0, %v1287_v59  ;;  %v2421_v59 = vsel %vm2414_vm6, %v7248_v24, -1e+30 }
 0x2b3   :  { %1749 = vmatprep.mubr.f32.mxu0 %v10252_v58 }
 0x2b4   :  { %2469 = vmax.xlane.f32.xlu1 %v2418_v1  ;;  %2272 = vmax.xlane.f32.xlu0 %v2221_v2  ;;  %v7179_v6 = vpop.f32.mrb[64].mxu0  ;;  %v5777_v1 = vpop.f32.mrb[38].mxu1 }
 0x2b5   :  { %v7181_v8 = vpop.f32.mrb[65].mxu0  ;;  %v1106_v18 = vpop.f32.mrb[39].mxu1  ;;  %v1112_v61 = vadd.f32 %v5777_v1, %v6837_v14  ;;  %v2224_v1 = vsel %vm2217_vm3, %v7248_v24, -1e+30 }
 0x2b6   :  { %10307 = vst [vmem:[#allocation14_spill] sm:$0xff] %v7181_v8  ;;  %v1107_v19 = vadd.f32 %v6837_v14, %v1106_v18  ;;  %5312 = vmatmul.mubr.msk.f32.gmra.mrb[122].mxu0 %vm101_vm0, %v1288_v21 }
 0x2b7   :  { %v1242_v10 = vmul.f32 0.01, %v1112_v61  ;;  %1755 = vmatprep.mubr.f32.mxu0 %v10252_v58  ;;  %vm1194_vm7 = vcmp.gt.f32.partialorder %v1112_v61, 0.0 }
 0x2b8   :  { %2077 = vmax.xlane.f32.xlu1 %v2025_v29  ;;  %1880 = vmax.xlane.f32.xlu0 %v1828_v30  ;;  %v7199_v33 = vpop.f32.mrb[66].mxu0  ;;  %v2420_v29 = vsel %vm2414_vm6, %v7216_v46, -1e+30  ;;  %v2223_v30 = vsel %vm2217_vm3, %v7216_v46, -1e+30  ;;  %vm1193_vm4 = vcmp.gt.f32.partialorder %v1107_v19, 0.0 }
 0x2b9   :  { %v7201_v5 = vpop.f32.mrb[67].mxu0  ;;  %v1241_v37 = vmul.f32 0.01, %v1107_v19 }
 0x2ba   :  { %10308 = vst [vmem:[#allocation15_spill] sm:$0xff] %v7201_v5 }
 0x2bb   :  { %v1289_v43 = vsel %vm1193_vm4, %v1107_v19, %v1241_v37  ;;  %v7292_v19 = vadd.f32 %v7179_v6, %v6986_v0  ;;  %vm3280_vm4 = vcmask 785408  }
 0x2bc   :  { %2471 = vmax.xlane.f32.xlu1 %v2419_v12  ;;  %2274 = vmax.xlane.f32.xlu0 %v2222_v48  ;;  %v7224_v50 = vpop.f32.mrb[68].mxu0  ;;  %v5780_v12 = vpop.f32.mrb[40].mxu1 }
 0x2bd   :  { %v7226_v51 = vpop.f32.mrb[69].mxu0  ;;  %5313 = vmatmul.mubr.msk.f32.gmra.mrb[124].mxu0 %vm101_vm0, %v1289_v43  ;;  %v1116_v49 = vpop.f32.mrb[41].mxu1  ;;  %v1122_v28 = vadd.f32 %v5780_v12, %v6837_v14  ;;  %v1832_v43 = vsel %vm1823_vm2, %v7292_v19, -1e+30 }
 0x2be   :  { %10309 = vst [vmem:[#allocation16_spill] sm:$0xff] %v7226_v51  ;;  %v1117_v23 = vadd.f32 %v6837_v14, %v1116_v49  ;;  %1761 = vmatprep.mubr.f32.mxu0 %v10252_v58 }
 0x2bf   :  { %v1244_v21 = vmul.f32 0.01, %v1122_v28  ;;  %vm1196_vm9 = vcmp.gt.f32.partialorder %v1122_v28, 0.0 }
 0x2c0   :  { %2079 = vmax.xlane.f32.xlu1 %v2026_v53  ;;  %1882 = vmax.xlane.f32.xlu0 %v1829_v54  ;;  %v7238_v16 = vpop.f32.mrb[70].mxu0  ;;  %v1290_v53 = vsel %vm1194_vm7, %v1112_v61, %v1242_v10  ;;  %v7280_v54 = vadd.f32 %v7154_v13, %v6986_v0  ;;  %vm1195_vm8 = vcmp.gt.f32.partialorder %v1117_v23, 0.0  ;;  %v1243_v13 = vmul.f32 0.01, %v1117_v23 }
 0x2c1   :  { %v7240_v2 = vpop.f32.mrb[71].mxu0  ;;  %5314 = vmatmul.mubr.msk.f32.gmra.mrb[126].mxu0 %vm101_vm0, %v1290_v53  ;;  %vm4148_vm7 = vcmask 1043456  }
 0x2c2   :  { %10310 = vst [vmem:[#allocation17_spill] sm:$0xff] %v7240_v2  ;;  %1767 = vmatprep.mubr.f32.mxu0 %v10252_v58  ;;  %v2028_v37 = vsel %vm2020_vm5, %v7280_v54, -1e+30  ;;  %v1831_v6 = vsel %vm1823_vm2, %v7280_v54, -1e+30  ;;  %v1291_v10 = vsel %vm1195_vm8, %v1117_v23, %v1243_v13  ;;  %v1292_v23 = vsel %vm1196_vm9, %v1122_v28, %v1244_v21 }
 0x2c4   :  { %2473 = vmax.xlane.f32.xlu1 %v2420_v29  ;;  %2276 = vmax.xlane.f32.xlu0 %v2223_v30  ;;  %v7256_v31 = vpop.f32.mrb[72].mxu0  ;;  %v7298_v29 = vpop.permute.xlu0 %2895 }
 0x2c5   :  { %v7258_v34 = vpop.f32.mrb[73].mxu0  ;;  %v7300_v30 = vpop.permute.xlu1 %2905  ;;  %5315 = vmatmul.mubr.msk.f32.gmra.mrb[128].mxu0 %vm101_vm0, %v1291_v10 }
 0x2c6   :  { %10311 = vst [vmem:[#allocation18_spill] sm:$0xff] %v7258_v34  ;;  %1773 = vmatprep.mubr.f32.mxu0 %v10252_v58 }
 0x2c8   :  { %2081 = vmax.xlane.f32.xlu1 %v2027_v41  ;;  %1884 = vmax.xlane.f32.xlu0 %v1830_v42  ;;  %v7270_v45 = vpop.f32.mrb[74].mxu0  ;;  %v5783_v42 = vpop.f32.mrb[42].mxu1 }
 0x2c9   :  { %v7272_v48 = vpop.f32.mrb[75].mxu0  ;;  %v1126_v49 = vpop.f32.mrb[43].mxu1  ;;  %v1132_v53 = vadd.f32 %v5783_v42, %v6837_v14  ;;  %5316 = vmatmul.mubr.msk.f32.gmra.mrb[130].mxu0 %vm101_vm0, %v1292_v23  ;;  %v7337_v42 = vadd.f32 %v7199_v33, %v6986_v0  ;;  %v6242_v33 = vld [vmem:[%s10242_s4] ss:$0 sm:$0xff] }
 0x2ca   :  { %10312 = vst [vmem:[#allocation19_spill] sm:$0xff] %v7272_v48  ;;  %1779 = vmatprep.mubr.f32.mxu0 %v10252_v58  ;;  %v7331_v28 = vpop.permute.xlu0 %3039  ;;  %v7333_v21 = vpop.permute.xlu1 %3049 }
 0x2cb   :  { %v1246_v10 = vmul.f32 0.01, %v1132_v53  ;;  %vm1198_vm11 = vcmp.gt.f32.partialorder %v1132_v53, 0.0 }
 0x2cc   :  { %2475 = vmax.xlane.f32.xlu1 %v2421_v59  ;;  %2278 = vmax.xlane.f32.xlu0 %v2224_v1  ;;  %v7288_v18 = vpop.f32.mrb[76].mxu0  ;;  %v1127_v59 = vadd.f32 %v6837_v14, %v1126_v49  ;;  %v2225_v1 = vsel %vm2217_vm3, %v7280_v54, -1e+30  ;;  %v2422_v14 = vsel %vm2414_vm6, %v7280_v54, -1e+30 }
 0x2cd   :  { %v7294_v61 = vpop.f32.mrb[77].mxu0  ;;  %v1294_v34 = vsel %vm1198_vm11, %v1132_v53, %v1246_v10 }
 0x2ce   :  { %10313 = vst [vmem:[#allocation20_spill] sm:$0xff] %v7294_v61  ;;  %vm1197_vm10 = vcmp.gt.f32.partialorder %v1127_v59, 0.0 }
 0x2d0   :  { %2083 = vmax.xlane.f32.xlu1 %v2028_v37  ;;  %1886 = vmax.xlane.f32.xlu0 %v1831_v6  ;;  %v7308_v41 = vpop.f32.mrb[78].mxu0  ;;  %v1245_v6 = vmul.f32 0.01, %v1127_v59 }
 0x2d1   :  { %v7313_v12 = vpop.f32.mrb[79].mxu0 }
 0x2d2   :  { %10314 = vst [vmem:[#allocation21_spill] sm:$0xff] %v7313_v12  ;;  %v1293_v49 = vsel %vm1197_vm10, %v1127_v59, %v1245_v6  ;;  %v10317_v12 = vmov 0.0   ;;  %v1833_v59 = vsel %vm1823_vm2, %v7337_v42, -1e+30  ;;  %v2029_v6 = vsel %vm2020_vm5, %v7292_v19, -1e+30 }
 0x2d3   :  { %5317 = vmatmul.mubr.msk.f32.gmra.mrb[132].mxu0 %vm101_vm0, %v1293_v49  ;;  %v7367_v49 = vpop.permute.xlu0 %2897 }
 0x2d4   :  { %1888 = vmax.xlane.f32.xlu1 %v1832_v43  ;;  %2280 = vmax.xlane.f32.xlu0 %v2225_v1  ;;  %v7322_v13 = vpop.f32.mrb[80].mxu0  ;;  %v2226_v43 = vsel %vm2217_vm3, %v7292_v19, -1e+30  ;;  %v5786_v1 = vpop.f32.mrb[44].mxu1 }
 0x2d5   :  { %v7324_v37 = vpop.f32.mrb[81].mxu0  ;;  %v1136_v58 = vpop.f32.mrb[45].mxu1  ;;  %1785 = vmatprep.mubr.f32.mxu0 %v10317_v12 }
 0x2d6   :  { %10315 = vst [vmem:[#allocation22_spill] sm:$0xff] %v7324_v37  ;;  %v1142_v37 = vadd.f32 %v6242_v33, %v5786_v1  ;;  %v1137_v61 = vadd.f32 %v6242_v33, %v1136_v58  ;;  %v7369_v1 = vpop.permute.xlu1 %2907 }
 0x2d7   :  { %5318 = vmatmul.mubr.msk.f32.gmra.mrb[134].mxu0 %vm101_vm0, %v1294_v34 }
 0x2d8   :  { %2282 = vmax.xlane.f32.xlu1 %v2226_v43  ;;  %2477 = vmax.xlane.f32.xlu0 %v2422_v14  ;;  %v7342_v23 = vpop.f32.mrb[82].mxu0  ;;  %v7361_v43 = vadd.f32 %v7224_v50, %v6986_v0  ;;  %vm1199_vm12 = vcmp.gt.f32.partialorder %v1137_v61, 0.0  ;;  %v1247_v53 = vmul.f32 0.01, %v1137_v61  ;;  %v1248_v10 = vmul.f32 0.01, %v1142_v37 }
 0x2d9   :  { %v7344_v15 = vpop.f32.mrb[83].mxu0  ;;  %1791 = vmatprep.mubr.f32.mxu0 %v10317_v12  ;;  %v2423_v50 = vsel %vm2414_vm6, %v7292_v19, -1e+30  ;;  %vm1200_vm13 = vcmp.gt.f32.partialorder %v1142_v37, 0.0  ;;  %v7504_v11 = vadd.f32 %v7342_v23, %v6986_v0 }
 0x2da   :  { %10316 = vst [vmem:[#allocation23_spill] sm:$0xff] %v7344_v15  ;;  %v1834_v15 = vsel %vm1823_vm2, %v7361_v43, -1e+30  ;;  %v1296_v5 = vsel %vm1200_vm13, %v1142_v37, %v1248_v10 }
 0x2db   :  { %v2235_v23 = vsel %vm2217_vm3, %v7504_v11, -1e+30 }
 0x2dc   :  { %1890 = vmax.xlane.f32.xlu1 %v1833_v59  ;;  %2085 = vmax.xlane.f32.xlu0 %v2029_v6  ;;  %v7357_v14 = vpop.f32.mrb[84].mxu0  ;;  %v2227_v59 = vsel %vm2217_vm3, %v7337_v42, -1e+30  ;;  %v1295_v6 = vsel %vm1199_vm12, %v1137_v61, %v1247_v53  ;;  %v2030_v61 = vsel %vm2020_vm5, %v7337_v42, -1e+30 }
 0x2dd   :  { %v7363_v58 = vpop.f32.mrb[85].mxu0  ;;  %5319 = vmatmul.mubr.msk.f32.gmra.mrb[136].mxu0 %vm101_vm0, %v1295_v6 }
 0x2de   :  { %10318 = vst [vmem:[#allocation24_spill] sm:$0xff] %v7363_v58  ;;  %v5789_v58 = vpop.f32.mrb[46].mxu1  ;;  %1797 = vmatprep.mubr.f32.mxu0 %v10317_v12 }
 0x2df   :  { %v1146_v51 = vpop.f32.mrb[47].mxu1  ;;  %v1152_v2 = vadd.f32 %v6242_v33, %v5789_v58 }
 0x2e0   :  { %2284 = vmax.xlane.f32.xlu1 %v2227_v59  ;;  %2479 = vmax.xlane.f32.xlu0 %v2423_v50  ;;  %v7377_v34 = vpop.f32.mrb[86].mxu0  ;;  %v1147_v8 = vadd.f32 %v6242_v33, %v1146_v51  ;;  %v7391_v59 = vpop.permute.xlu0 %3041  ;;  %v2424_v51 = vsel %vm2414_vm6, %v7337_v42, -1e+30  ;;  %v2228_v33 = vsel %vm2217_vm3, %v7361_v43, -1e+30 }
 0x2e1   :  { %v7382_v48 = vpop.f32.mrb[87].mxu0  ;;  %v7393_v50 = vpop.permute.xlu1 %2765  ;;  %5320 = vmatmul.mubr.msk.f32.gmra.mrb[138].mxu0 %vm101_vm0, %v1296_v5  ;;  %v1250_v37 = vmul.f32 0.01, %v1152_v2  ;;  %vm1202_vm15 = vcmp.gt.f32.partialorder %v1152_v2, 0.0  ;;  %v7409_v5 = vadd.f32 %v7256_v31, %v6986_v0  ;;  %v7544_v40 = vadd.f32 %v7377_v34, %v6986_v0 }
 0x2e2   :  { %10319 = vst [vmem:[#allocation25_spill] sm:$0xff] %v7382_v48  ;;  %vm1201_vm14 = vcmp.gt.f32.partialorder %v1147_v8, 0.0  ;;  %v1249_v6 = vmul.f32 0.01, %v1147_v8  ;;  %1803 = vmatprep.mubr.f32.mxu0 %v10317_v12 }
 0x2e3   :  { %10320 = vst [vmem:[#allocation26_spill] sm:$0xff] %v7409_v5  ;;  %v1298_v10 = vsel %vm1202_vm15, %v1152_v2, %v1250_v37  ;;  %v1836_v31 = vsel %vm1823_vm2, %v7409_v5, -1e+30  ;;  %v2425_v2 = vsel %vm2414_vm6, %v7361_v43, -1e+30 }
 0x2e4   :  { %1892 = vmax.xlane.f32.xlu1 %v1834_v15  ;;  %2087 = vmax.xlane.f32.xlu0 %v2030_v61  ;;  %v7389_v53 = vpop.f32.mrb[88].mxu0  ;;  %v7402_v15 = vadd.f32 %v7238_v16, %v6986_v0  ;;  %v1297_v58 = vsel %vm1201_vm14, %v1147_v8, %v1249_v6  ;;  %v7413_v61 = vpop.permute.xlu0 %2899  ;;  %v2031_v8 = vsel %vm2020_vm5, %v7361_v43, -1e+30  ;;  %v2427_v20 = vsel %vm2414_vm6, %v7409_v5, -1e+30 }
 0x2e5   :  { %5321 = vmatmul.mubr.msk.f32.gmra.mrb[140].mxu0 %vm101_vm0, %v1297_v58  ;;  %v7415_v16 = vpop.permute.xlu1 %2909  ;;  %v7512_v44 = vpop.f32.mrb[89].mxu0 }
 0x2e6   :  { %1809 = vmatprep.mubr.f32.mxu0 %v10317_v12  ;;  %v2229_v48 = vsel %vm2217_vm3, %v7402_v15, -1e+30  ;;  %v1835_v37 = vsel %vm1823_vm2, %v7402_v15, -1e+30  ;;  %10325 = vst [vmem:[#allocation31_spill] sm:$0xff] %v7512_v44 }
 0x2e8   :  { %2286 = vmax.xlane.f32.xlu1 %v2228_v33  ;;  %2481 = vmax.xlane.f32.xlu0 %v2424_v51  ;;  %v7430_v12 = vpop.permute.xlu0 %3043  ;;  %v2230_v51 = vsel %vm2217_vm3, %v7409_v5, -1e+30  ;;  %v7446_v33 = vadd.f32 %v7288_v18, %v6986_v0  ;;  %v2426_v18 = vsel %vm2414_vm6, %v7402_v15, -1e+30 }
 0x2e9   :  { %5322 = vmatmul.mubr.msk.f32.gmra.mrb[142].mxu0 %vm101_vm0, %v1298_v10  ;;  %v7432_v6 = vpop.permute.xlu1 %3053 }
 0x2ea   :  { %10322 = vst [vmem:[#allocation28_spill] sm:$0xff] %v7446_v33 }
 0x2ec   :  { %2288 = vmax.xlane.f32.xlu1 %v2229_v48  ;;  %2089 = vmax.xlane.f32.xlu0 %v2031_v8  ;;  %v7436_v48 = vadd.f32 %v7270_v45, %v6986_v0  ;;  %v7451_v45 = vpop.permute.xlu0 %2759  ;;  %v2032_v8 = vsel %vm2020_vm5, %v7402_v15, -1e+30 }
 0x2ed   :  { %v7453_v10 = vpop.permute.xlu1 %2911 }
 0x2ee   :  { %10321 = vst [vmem:[#allocation27_spill] sm:$0xff] %v7436_v48  ;;  %v2231_v58 = vsel %vm2217_vm3, %v7436_v48, -1e+30 }
 0x2f0   :  { %1896 = vmax.xlane.f32.xlu1 %v1836_v31  ;;  %2483 = vmax.xlane.f32.xlu0 %v2425_v2  ;;  %v1838_v31 = vsel %vm1823_vm2, %v7446_v33, -1e+30  ;;  %v7464_v2 = vpop.permute.xlu0 %3047 }
 0x2f4   :  { %2290 = vmax.xlane.f32.xlu1 %v2230_v51  ;;  %1894 = vmax.xlane.f32.xlu0 %v1835_v37  ;;  %v7466_v51 = vpop.permute.xlu1 %2769  ;;  %v7470_v37 = vadd.f32 %v7308_v41, %v6986_v0  ;;  %v7485_v41 = vpop.permute.xlu0 %2763 }
 0x2f6   :  { %10323 = vst [vmem:[#allocation29_spill] sm:$0xff] %v7470_v37  ;;  %v1839_v34 = vsel %vm1823_vm2, %v7470_v37, -1e+30 }
 0x2f8   :  { %2292 = vmax.xlane.f32.xlu1 %v2231_v58  ;;  %2091 = vmax.xlane.f32.xlu0 %v2032_v8  ;;  %v2232_v58 = vsel %vm2217_vm3, %v7446_v33, -1e+30  ;;  %v2033_v8 = vsel %vm2020_vm5, %v7409_v5, -1e+30  ;;  %v7487_v39 = vpop.permute.xlu1 %2913 }
 0x2fc   :  { %1900 = vmax.xlane.f32.xlu1 %v1838_v31  ;;  %2485 = vmax.xlane.f32.xlu0 %v2426_v18  ;;  %v7480_v31 = vadd.f32 %v7322_v13, %v6986_v0  ;;  %v2233_v18 = vsel %vm2217_vm3, %v7470_v37, -1e+30  ;;  %v1837_v13 = vsel %vm1823_vm2, %v7436_v48, -1e+30  ;;  %v7500_v62 = vpop.permute.xlu1 %3057 }
 0x2fe   :  { %10324 = vst [vmem:[#allocation30_spill] sm:$0xff] %v7480_v31 }
 0x300   :  { %2294 = vmax.xlane.f32.xlu1 %v2232_v58  ;;  %2093 = vmax.xlane.f32.xlu0 %v2033_v8  ;;  %v1840_v58 = vsel %vm1823_vm2, %v7480_v31, -1e+30  ;;  %v7498_v8 = vpop.permute.xlu0 %3051  ;;  %v7527_v32 = vpop.permute.xlu1 %2915 }
 0x304   :  { %2296 = vmax.xlane.f32.xlu1 %v2233_v18  ;;  %2487 = vmax.xlane.f32.xlu0 %v2427_v20  ;;  %v2234_v20 = vsel %vm2217_vm3, %v7480_v31, -1e+30  ;;  %v2034_v18 = vsel %vm2020_vm5, %v7436_v48, -1e+30  ;;  %v7525_v17 = vpop.permute.xlu0 %2767  ;;  %v7538_v44 = vpop.permute.xlu1 %2773 }
 0x305   :  { %10328 = vst [vmem:[#allocation34_spill] sm:$0xff] %v7538_v44 }
 0x308   :  { %1904 = vmax.xlane.f32.xlu1 %v1840_v58  ;;  %1898 = vmax.xlane.f32.xlu0 %v1837_v13  ;;  %v7514_v58 = vpop.f32.mrb[90].mxu0  ;;  %v7518_v13 = vadd.f32 %v7357_v14, %v6986_v0 }
 0x309   :  { %10326 = vst [vmem:[#allocation32_spill] sm:$0xff] %v7514_v58  ;;  %v7523_v7 = vpop.f32.mrb[91].mxu0 }
 0x30a   :  { %10327 = vst [vmem:[#allocation33_spill] sm:$0xff] %v7523_v7  ;;  %v1842_v14 = vsel %vm1823_vm2, %v7518_v13, -1e+30  ;;  %v7540_v7 = vpop.permute.xlu0 %3055 }
 0x30c   :  { %2298 = vmax.xlane.f32.xlu1 %v2234_v20  ;;  %2095 = vmax.xlane.f32.xlu0 %v2034_v18  ;;  %v2428_v20 = vsel %vm2414_vm6, %v7436_v48, -1e+30  ;;  %v2035_v18 = vsel %vm2020_vm5, %v7446_v33, -1e+30 }
 0x30e   :  { %v7557_v48 = vpop.permute.xlu0 %2771 }
 0x310   :  { %2300 = vmax.xlane.f32.xlu1 %v2235_v23  ;;  %2489 = vmax.xlane.f32.xlu0 %v2428_v20  ;;  %v2236_v23 = vsel %vm2217_vm3, %v7518_v13, -1e+30  ;;  %v2429_v20 = vsel %vm2414_vm6, %v7446_v33, -1e+30  ;;  %v2036_v33 = vsel %vm2020_vm5, %v7470_v37, -1e+30 }
 0x314   :  { %1908 = vmax.xlane.f32.xlu1 %v1842_v14  ;;  %2097 = vmax.xlane.f32.xlu0 %v2035_v18  ;;  %v2237_v14 = vsel %vm2217_vm3, %v7544_v40, -1e+30  ;;  %v7555_v18 = vpop.permute.xlu1 %2917 }
 0x315   :  { %10329 = vst [vmem:[#allocation35_spill] sm:$0xff] %v7555_v18  ;;  %v2430_v18 = vsel %vm2414_vm6, %v7470_v37, -1e+30 }
 0x318   :  { %2302 = vmax.xlane.f32.xlu1 %v2236_v23  ;;  %2491 = vmax.xlane.f32.xlu0 %v2429_v20  ;;  %v7565_v23 = vpop.permute.xlu1 %3061  ;;  %v7567_v20 = vpop.permute.xlu0 %3059 }
 0x319   :  { %10330 = vst [vmem:[#allocation36_spill] sm:$0xff] %v7565_v23  ;;  %10331 = vst [vmem:[#allocation37_spill] sm:$0xff] %v7567_v20 }
 0x31c   :  { %2304 = vmax.xlane.f32.xlu1 %v2237_v14  ;;  %1902 = vmax.xlane.f32.xlu0 %v1839_v34  ;;  %v2037_v14 = vsel %vm2020_vm5, %v7480_v31, -1e+30 }
 0x320   :  { %2099 = vmax.xlane.f32.xlu0 %v2036_v33 }
 0x324   :  { %2493 = vmax.xlane.f32.xlu0 %v2430_v18  ;;  %v2431_v18 = vsel %vm2414_vm6, %v7480_v31, -1e+30 }
 0x325   :  { %v2267_v5 = vpop.xlane.xlu1 %2266  ;;  %v1873_v44 = vpop.xlane.xlu0 %1872 }
 0x326   :  { %v1968_v34 = vsel %vm1823_vm2, %v1873_v44, 0.0  ;;  %v7590_v44 = vld [vmem:[%s10238_s0 + $0x60] sm:$0xff] }
 0x328   :  { %2101 = vmax.xlane.f32.xlu0 %v2037_v14 }
 0x329   :  { %v2464_v58 = vpop.xlane.xlu1 %2463  ;;  %v2070_v23 = vpop.xlane.xlu0 %2069 }
 0x32a   :  { %v2165_v33 = vsel %vm2020_vm5, %v2070_v23, %v1968_v34 }
 0x32b   :  { %v2362_v20 = vsel %vm2217_vm3, %v2267_v5, %v2165_v33 }
 0x32c   :  { %v2559_v37 = vsel %vm2414_vm6, %v2464_v58, %v2362_v20  ;;  %2495 = vmax.xlane.f32.xlu0 %v2431_v18  ;;  %v1841_v58 = vsel %vm1823_vm2, %v7504_v11, -1e+30 }
 0x32d   :  { %v2607_v14 = vsub.f32 %v7006_v22, %v2559_v37  ;;  %2919 = vrot.lane.b32.xlu1 %v7590_v44, %s6318_s13  ;;  %v2072_v23 = vpop.xlane.xlu1 %2071  ;;  %v1875_v5 = vpop.xlane.xlu0 %1874 }
 0x32e   :  { %v1969_v34 = vsel %vm1823_vm2, %v1875_v5, 0.0 }
 0x32f   :  { %v2655_v33 = vmul.f32 1.442695, %v2607_v14  ;;  %v2166_v37 = vsel %vm2020_vm5, %v2072_v23, %v1969_v34  ;;  %v2038_v14 = vsel %vm2020_vm5, %v7504_v11, -1e+30 }
 0x330   :  { %1906 = vmax.xlane.f32.xlu0 %v1841_v58 }
 0x331   :  { %6050 = vpow2.f32 %v2655_v33  ;;  %v2466_v22 = vpop.xlane.xlu1 %2465  ;;  %v2269_v20 = vpop.xlane.xlu0 %2268  ;;  %v6244_v33 = vld [vmem:[%s10238_s0] sm:$0xff] }
 0x332   :  { %v2363_v18 = vsel %vm2217_vm3, %v2269_v20, %v2166_v37  ;;  %v3183_v23 = vsel %vm101_vm0, %v7011_v25, %v6244_v33  ;;  %v2432_v20 = vsel %vm2414_vm6, %v7504_v11, -1e+30 }
 0x333   :  { %v2560_v31 = vsel %vm2414_vm6, %v2466_v22, %v2363_v18 }
 0x334   :  { %v2608_v5 = vsub.f32 %v7037_v36, %v2560_v31  ;;  %2103 = vmax.xlane.f32.xlu0 %v2038_v14  ;;  %v3232_v36 = vsel %vm3231_vm1, %v3183_v23, %v7298_v29  ;;  %v2039_v29 = vsel %vm2020_vm5, %v7518_v13, -1e+30  ;;  %v6245_v23 = vld [vmem:[%s10238_s0 + $0x8] sm:$0xff] }
 0x335   :  { %v2074_v34 = vpop.xlane.xlu1 %2073  ;;  %v1877_v58 = vpop.xlane.xlu0 %1876  ;;  %v3281_v33 = vsel %vm3280_vm4, %v3232_v36, %v7331_v28 }
 0x336   :  { %v2657_v37 = vmul.f32 1.442695, %v2608_v5  ;;  %v1970_v22 = vsel %vm1823_vm2, %v1877_v58, 0.0 }
 0x337   :  { %v2167_v25 = vsel %vm2020_vm5, %v2074_v34, %v1970_v22  ;;  %v3184_v34 = vsel %vm101_vm0, %v7045_v38, %v6245_v23  ;;  %v1843_v23 = vsel %vm1823_vm2, %v7544_v40, -1e+30 }
 0x338   :  { %6052 = vpow2.f32 %v2657_v37  ;;  %2497 = vmax.xlane.f32.xlu0 %v2432_v20 }
 0x339   :  { %v2468_v31 = vpop.xlane.xlu1 %2467  ;;  %v2271_v18 = vpop.xlane.xlu0 %2270 }
 0x33a   :  { %v2364_v14 = vsel %vm2217_vm3, %v2271_v18, %v2167_v25  ;;  %v3233_v25 = vsel %vm3231_vm1, %v3184_v34, %v7367_v49  ;;  %v2433_v18 = vsel %vm2414_vm6, %v7518_v13, -1e+30 }
 0x33b   :  { %v6051_v5 = vpop.eup %6050  ;;  %v2561_v58 = vsel %vm2414_vm6, %v2468_v31, %v2364_v14 }
 0x33c   :  { %v2609_v37 = vsub.f32 %v7079_v55, %v2561_v58  ;;  %2105 = vmax.xlane.f32.xlu0 %v2039_v29  ;;  %3473 = vmatprep.mubr.f32.mxu1 %v6051_v5  ;;  %v3329_v22 = vmul.f32 %v6051_v5, %v3281_v33  ;;  %v3282_v33 = vsel %vm3280_vm4, %v3233_v25, %v7391_v59  ;;  %v7651_v29 = vpop.f32.mrb[92].mxu0 }
 0x33d   :  { %v2076_v28 = vpop.xlane.xlu1 %2075  ;;  %v1879_v20 = vpop.xlane.xlu0 %1878 }
 0x33e   :  { %v2659_v36 = vmul.f32 1.442695, %v2609_v37  ;;  %v1971_v31 = vsel %vm1823_vm2, %v1879_v20, 0.0  ;;  %3474 = vmatmul.mubr.f32.vlgmr.msra.gmra.mrb[48].mxu1 %v3329_v22  ;;  %v6246_v37 = vld [vmem:[%s10238_s0 + $0x10] sm:$0xff] }
 0x33f   :  { %v2168_v55 = vsel %vm2020_vm5, %v2076_v28, %v1971_v31  ;;  %v3185_v59 = vsel %vm101_vm0, %v7087_v60, %v6246_v37 }
 0x340   :  { %6054 = vpow2.f32 %v2659_v36  ;;  %2499 = vmax.xlane.f32.xlu0 %v2433_v18  ;;  %v3234_v25 = vsel %vm3231_vm1, %v3185_v59, %v7413_v61  ;;  %v2040_v18 = vsel %vm2020_vm5, %v7544_v40, -1e+30  ;;  %v7679_v61 = vadd.f32 %v7389_v53, %v6986_v0 }
 0x341   :  { %v2470_v38 = vpop.xlane.xlu1 %2469  ;;  %v2273_v14 = vpop.xlane.xlu0 %2272 }
 0x342   :  { %v6053_v5 = vpop.eup %6052  ;;  %v2365_v58 = vsel %vm2217_vm3, %v2273_v14, %v2168_v55  ;;  %v3283_v14 = vsel %vm3280_vm4, %v3234_v25, %v7430_v12 }
 0x343   :  { %v2562_v49 = vsel %vm2414_vm6, %v2470_v38, %v2365_v58  ;;  %3478 = vmatprep.mubr.f32.mxu1 %v6053_v5  ;;  %v3330_v34 = vmul.f32 %v6053_v5, %v3282_v33 }
 0x344   :  { %v2610_v22 = vsub.f32 %v7124_v35, %v2562_v49  ;;  %1910 = vmax.xlane.f32.xlu0 %v1843_v23  ;;  %v6247_v49 = vld [vmem:[%s10238_s0 + $0x18] sm:$0xff] }
 0x345   :  { %v2078_v28 = vpop.xlane.xlu1 %2077  ;;  %3479 = vmatmul.mubr.f32.gmra.mrb[50].mxu1 %v3330_v34  ;;  %v1881_v20 = vpop.xlane.xlu0 %1880  ;;  %v3186_v23 = vsel %vm101_vm0, %v7109_v26, %v6247_v49 }
 0x346   :  { %v2661_v36 = vmul.f32 1.442695, %v2610_v22  ;;  %v1972_v31 = vsel %vm1823_vm2, %v1881_v20, 0.0  ;;  %v1844_v22 = vsel %vm1823_vm2, %v7679_v61, -1e+30 }
 0x347   :  { %v2169_v35 = vsel %vm2020_vm5, %v2078_v28, %v1972_v31  ;;  %v3235_v28 = vsel %vm3231_vm1, %v3186_v23, %v7145_v47 }
 0x348   :  { %6056 = vpow2.f32 %v2661_v36  ;;  %2107 = vmax.xlane.f32.xlu0 %v2040_v18  ;;  %v3284_v31 = vsel %vm3280_vm4, %v3235_v28, %v7191_v27  ;;  %v2238_v18 = vsel %vm2217_vm3, %v7679_v61, -1e+30 }
 0x349   :  { %v2472_v60 = vpop.xlane.xlu1 %2471  ;;  %v2275_v38 = vpop.xlane.xlu0 %2274 }
 0x34a   :  { %v6055_v55 = vpop.eup %6054  ;;  %v2366_v5 = vsel %vm2217_vm3, %v2275_v38, %v2169_v35  ;;  %v6248_v35 = vld [vmem:[%s10238_s0 + $0x20] sm:$0xff] }
 0x34b   :  { %v2563_v33 = vsel %vm2414_vm6, %v2472_v60, %v2366_v5  ;;  %3483 = vmatprep.mubr.f32.mxu1 %v6055_v55  ;;  %v3331_v58 = vmul.f32 %v6055_v55, %v3283_v14  ;;  %v3187_v38 = vsel %vm101_vm0, %v7451_v45, %v6248_v35 }
 0x34c   :  { %v2611_v12 = vsub.f32 %v7170_v63, %v2563_v33 }
 0x34d   :  { %v2080_v34 = vpop.xlane.xlu1 %2079  ;;  %3484 = vmatmul.mubr.f32.gmra.mrb[52].mxu1 %v3331_v58  ;;  %v1883_v37 = vpop.xlane.xlu0 %1882  ;;  %v3236_v58 = vsel %vm3231_vm1, %v3187_v38, %v7230_v52  ;;  %v6249_v52 = vld [vmem:[%s10238_s0 + $0x28] sm:$0xff] }
 0x34e   :  { %v2663_v59 = vmul.f32 1.442695, %v2611_v12  ;;  %v1973_v53 = vsel %vm1823_vm2, %v1883_v37, 0.0 }
 0x34f   :  { %v2170_v26 = vsel %vm2020_vm5, %v2080_v34, %v1973_v53  ;;  %v3188_v53 = vsel %vm101_vm0, %v7262_v9, %v6249_v52 }
 0x350   :  { %6058 = vpow2.f32 %v2663_v59 }
 0x351   :  { %1912 = vmax.xlane.f32.xlu1 %v1844_v22  ;;  %v2474_v20 = vpop.xlane.xlu1 %2473  ;;  %v2277_v63 = vpop.xlane.xlu0 %2276 }
 0x352   :  { %v6057_v36 = vpop.eup %6056  ;;  %v2367_v25 = vsel %vm2217_vm3, %v2277_v63, %v2170_v26  ;;  %v3237_v26 = vsel %vm3231_vm1, %v3188_v53, %v7300_v30 }
 0x353   :  { %v2564_v47 = vsel %vm2414_vm6, %v2474_v20, %v2367_v25  ;;  %3488 = vmatprep.mubr.f32.mxu1 %v6057_v36  ;;  %v3332_v60 = vmul.f32 %v6057_v36, %v3284_v31 }
 0x354   :  { %v2612_v27 = vsub.f32 %v7216_v46, %v2564_v47  ;;  %v3285_v46 = vsel %vm3280_vm4, %v3236_v58, %v7464_v2 }
 0x355   :  { %2306 = vmax.xlane.f32.xlu1 %v2238_v18  ;;  %v2082_v55 = vpop.xlane.xlu1 %2081  ;;  %3489 = vmatmul.mubr.f32.gmra.mrb[54].mxu1 %v3332_v60  ;;  %v1885_v14 = vpop.xlane.xlu0 %1884  ;;  %v6250_v18 = vld [vmem:[%s10238_s0 + $0x30] sm:$0xff] }
 0x356   :  { %v2665_v5 = vmul.f32 1.442695, %v2612_v27  ;;  %v1974_v33 = vsel %vm1823_vm2, %v1885_v14, 0.0  ;;  %v3189_v47 = vsel %vm101_vm0, %v7485_v41, %v6250_v18  ;;  %v7753_v27 = vld [vmem:[%s10238_s0 + $0x68] sm:$0xff] }
 0x357   :  { %v2171_v23 = vsel %vm2020_vm5, %v2082_v55, %v1974_v33  ;;  %v3238_v41 = vsel %vm3231_vm1, %v3189_v47, %v7369_v1 }
 0x358   :  { %6060 = vpow2.f32 %v2665_v5 }
 0x359   :  { %v2476_v49 = vpop.xlane.xlu1 %2475  ;;  %v2279_v12 = vpop.xlane.xlu0 %2278 }
 0x35a   :  { %v6059_v45 = vpop.eup %6058  ;;  %v2368_v34 = vsel %vm2217_vm3, %v2279_v12, %v2171_v23 }
 0x35b   :  { %v2565_v37 = vsel %vm2414_vm6, %v2476_v49, %v2368_v34  ;;  %3493 = vmatprep.mubr.f32.mxu1 %v6059_v45  ;;  %v3333_v59 = vmul.f32 %v6059_v45, %v3285_v46  ;;  %v3287_v49 = vsel %vm3280_vm4, %v3238_v41, %v7498_v8  ;;  %v6252_v8 = vld [vmem:[%s10238_s0 + $0x38] sm:$0xff] }
 0x35c   :  { %v2613_v22 = vsub.f32 %v7248_v24, %v2565_v37  ;;  %v3286_v24 = vsel %vm3280_vm4, %v3237_v26, %v7333_v21  ;;  %v3190_v34 = vsel %vm101_vm0, %v7393_v50, %v6252_v8 }
 0x35d   :  { %v2084_v28 = vpop.xlane.xlu1 %2083  ;;  %3494 = vmatmul.mubr.f32.gmra.mrb[56].mxu1 %v3333_v59  ;;  %v1887_v2 = vpop.xlane.xlu0 %1886 }
 0x35e   :  { %v2667_v20 = vmul.f32 1.442695, %v2613_v22  ;;  %2775 = vrot.lane.b32.xlu0 %v7590_v44, %s6317_s2  ;;  %v1975_v63 = vsel %vm1823_vm2, %v1887_v2, 0.0 }
 0x35f   :  { %v2172_v30 = vsel %vm2020_vm5, %v2084_v28, %v1975_v63  ;;  %v3239_v28 = vsel %vm3231_vm1, %v3190_v34, %v7415_v16  ;;  %v6255_v34 = vld [vmem:[%s10238_s0 + $0x50] sm:$0xff] }
 0x360   :  { %6062 = vpow2.f32 %v2667_v20  ;;  %v7786_v20 = vpop.f32.mrb[93].mxu0 }
 0x361   :  { %v1889_v36 = vpop.xlane.xlu1 %1888  ;;  %v2281_v31 = vpop.xlane.xlu0 %2280  ;;  %10332 = vst [vmem:[#allocation38_spill] sm:$0xff] %v7786_v20 }
 0x362   :  { %v6061_v25 = vpop.eup %6060  ;;  %v2369_v60 = vsel %vm2217_vm3, %v2281_v31, %v2172_v30  ;;  %v1976_v14 = vsel %vm1823_vm2, %v1889_v36, 0.0  ;;  %v7788_v26 = vpop.f32.mrb[94].mxu0 }
 0x363   :  { %3498 = vmatprep.mubr.f32.mxu1 %v6061_v25  ;;  %v3334_v9 = vmul.f32 %v6061_v25, %v3286_v24  ;;  %v7796_v24 = vpop.f32.mrb[95].mxu0 }
 0x364   :  { %10333 = vst [vmem:[#allocation39_spill] sm:$0xff] %v7796_v24 }
 0x365   :  { %v2283_v35 = vpop.xlane.xlu1 %2282  ;;  %3499 = vmatmul.mubr.f32.gmra.mrb[58].mxu1 %v3334_v9  ;;  %v2478_v38 = vpop.xlane.xlu0 %2477  ;;  %v6253_v9 = vld [vmem:[%s10238_s0 + $0x40] sm:$0xff] }
 0x366   :  { %v2566_v21 = vsel %vm2414_vm6, %v2478_v38, %v2369_v60  ;;  %2777 = vrot.lane.b32.xlu1 %v7753_v27, %s6317_s2  ;;  %v3191_v18 = vsel %vm101_vm0, %v7525_v17, %v6253_v9  ;;  %v2434_v17 = vsel %vm2414_vm6, %v7544_v40, -1e+30 }
 0x367   :  { %v2614_v55 = vsub.f32 %v7280_v54, %v2566_v21 }
 0x369   :  { %v2669_v5 = vmul.f32 1.442695, %v2614_v55  ;;  %v2086_v33 = vpop.xlane.xlu0 %2085  ;;  %v1891_v23 = vpop.xlane.xlu1 %1890 }
 0x36a   :  { %v6063_v58 = vpop.eup %6062  ;;  %v2173_v12 = vsel %vm2020_vm5, %v2086_v33, %v1976_v14  ;;  %2921 = vrot.lane.b32.xlu1 %v7753_v27, %s6318_s13  ;;  %v1977_v52 = vsel %vm1823_vm2, %v1891_v23, 0.0  ;;  %v6254_v33 = vld [vmem:[%s10238_s0 + $0x48] sm:$0xff] }
 0x36b   :  { %6064 = vpow2.f32 %v2669_v5  ;;  %3503 = vmatprep.mubr.f32.mxu1 %v6063_v58  ;;  %v3335_v1 = vmul.f32 %v6063_v58, %v3287_v49  ;;  %v2370_v54 = vsel %vm2217_vm3, %v2283_v35, %v2173_v12  ;;  %v3240_v35 = vsel %vm3231_vm1, %v3191_v18, %v7453_v10 }
 0x36c   :  { %v3192_v58 = vsel %vm101_vm0, %v7466_v51, %v6254_v33 }
 0x36d   :  { %3504 = vmatmul.mubr.f32.gmra.mrb[60].mxu1 %v3335_v1  ;;  %v2480_v45 = vpop.xlane.xlu0 %2479  ;;  %v2285_v59 = vpop.xlane.xlu1 %2284  ;;  %v3241_v12 = vsel %vm3231_vm1, %v3192_v58, %v7487_v39  ;;  %v3193_v39 = vsel %vm101_vm0, %v7557_v48, %v6255_v34 }
 0x36e   :  { %v2567_v46 = vsel %vm2414_vm6, %v2480_v45, %v2370_v54  ;;  %3065 = vrot.lane.b32.xlu1 %v7753_v27, %s6319_s14  ;;  %v3290_v45 = vsel %vm3280_vm4, %v3241_v12, %v7500_v62 }
 0x36f   :  { %v2615_v37 = vsub.f32 %v7292_v19, %v2567_v46  ;;  %v3288_v19 = vsel %vm3280_vm4, %v3239_v28, %v7432_v6 }
 0x371   :  { %v2671_v53 = vmul.f32 1.442695, %v2615_v37  ;;  %v2088_v22 = vpop.xlane.xlu0 %2087  ;;  %v1893_v31 = vpop.xlane.xlu1 %1892 }
 0x372   :  { %v2174_v2 = vsel %vm2020_vm5, %v2088_v22, %v1977_v52  ;;  %v1978_v47 = vsel %vm1823_vm2, %v1893_v31, 0.0 }
 0x373   :  { %6066 = vpow2.f32 %v2671_v53  ;;  %v2371_v63 = vsel %vm2217_vm3, %v2285_v59, %v2174_v2  ;;  %v3242_v59 = vsel %vm3231_vm1, %v3193_v39, %v7527_v32  ;;  %v10334_v2 = vld [vmem:[#allocation37_spill] sm:$0xff] }
 0x375   :  { %v6065_v50 = vpop.eup %6064  ;;  %v2482_v36 = vpop.xlane.xlu0 %2481 }
 0x376   :  { %v2568_v16 = vsel %vm2414_vm6, %v2482_v36, %v2371_v63  ;;  %3508 = vmatprep.mubr.f32.mxu1 %v6065_v50  ;;  %v3336_v25 = vmul.f32 %v6065_v50, %v3288_v19  ;;  %v2287_v21 = vpop.xlane.xlu1 %2286  ;;  %v3291_v50 = vsel %vm3280_vm4, %v3242_v59, %v10334_v2  ;;  %v10335_v63 = vld [vmem:[#allocation32_spill] sm:$0xff] }
 0x377   :  { %v2616_v6 = vsub.f32 %v7337_v42, %v2568_v16  ;;  %v3289_v42 = vsel %vm3280_vm4, %v3240_v35, %v7540_v7  ;;  %v7851_v36 = vadd.f32 %v10335_v63, %v6986_v0  ;;  %v10337_v35 = vld [vmem:[#allocation34_spill] sm:$0xff] }
 0x378   :  { %3509 = vmatmul.mubr.f32.gmra.mrb[62].mxu1 %v3336_v25  ;;  %v7855_v25 = vpop.f32.mrb[96].mxu0 }
 0x379   :  { %v2673_v30 = vmul.f32 1.442695, %v2616_v6  ;;  %v2090_v60 = vpop.xlane.xlu0 %2089  ;;  %v2239_v6 = vsel %vm2217_vm3, %v7851_v36, -1e+30 }
 0x37a   :  { %v2175_v38 = vsel %vm2020_vm5, %v2090_v60, %v1978_v47  ;;  %v2289_v1 = vpop.xlane.xlu1 %2288  ;;  %v6256_v60 = vld [vmem:[%s10238_s0 + $0x58] sm:$0xff] }
 0x37b   :  { %6068 = vpow2.f32 %v2673_v30  ;;  %v2372_v55 = vsel %vm2217_vm3, %v2287_v21, %v2175_v38  ;;  %v7864_v30 = vpop.f32.mrb[97].mxu0  ;;  %v3194_v38 = vsel %vm101_vm0, %v10337_v35, %v6256_v60  ;;  %v10338_v21 = vld [vmem:[#allocation26_spill] sm:$0xff]  ;;  %v2435_v60 = vsel %vm2414_vm6, %v7679_v61, -1e+30 }
 0x37c   :  { %10336 = vst [vmem:[#allocation37_spill] sm:$0xff] %v7864_v30 }
 0x37d   :  { %v6067_v41 = vpop.eup %6066  ;;  %2501 = vmax.xlane.f32.xlu0 %v2434_v17  ;;  %v2484_v14 = vpop.xlane.xlu0 %2483 }
 0x37e   :  { %v2569_v10 = vsel %vm2414_vm6, %v2484_v14, %v2372_v55  ;;  %3513 = vmatprep.mubr.f32.mxu1 %v6067_v41  ;;  %v3337_v5 = vmul.f32 %v6067_v41, %v3289_v42  ;;  %v1897_v52 = vpop.xlane.xlu1 %1896  ;;  %v7874_v41 = vpop.f32.mrb[98].mxu0  ;;  %v10340_v14 = vld [vmem:[#allocation35_spill] sm:$0xff] }
 0x37f   :  { %v2617_v49 = vsub.f32 %v7361_v43, %v2569_v10  ;;  %v1980_v48 = vsel %vm1823_vm2, %v1897_v52, 0.0  ;;  %v7876_v42 = vpop.f32.mrb[99].mxu0  ;;  %v3243_v10 = vsel %vm3231_vm1, %v3194_v38, %v10340_v14  ;;  %v1845_v14 = vsel %vm1823_vm2, %v7851_v36, -1e+30 }
 0x380   :  { %3514 = vmatmul.mubr.f32.gmra.mrb[64].mxu1 %v3337_v5  ;;  %10339 = vst [vmem:[#allocation32_spill] sm:$0xff] %v7876_v42  ;;  %v7880_v5 = vpop.f32.mrb[100].mxu0 }
 0x381   :  { %v2675_v7 = vmul.f32 1.442695, %v2617_v49  ;;  %v1895_v23 = vpop.xlane.xlu0 %1894  ;;  %v7882_v33 = vpop.f32.mrb[101].mxu0 }
 0x382   :  { %v1979_v46 = vsel %vm1823_vm2, %v1895_v23, 0.0  ;;  %10341 = vst [vmem:[#allocation34_spill] sm:$0xff] %v7882_v33  ;;  %v7884_v58 = vpop.f32.mrb[102].mxu0 }
 0x383   :  { %6070 = vpow2.f32 %v2675_v7  ;;  %v10342_v7 = vld [vmem:[#allocation36_spill] sm:$0xff] }
 0x384   :  { %v3292_v23 = vsel %vm3280_vm4, %v3243_v10, %v10342_v7 }
 0x385   :  { %v6069_v54 = vpop.eup %6068  ;;  %v2092_v8 = vpop.xlane.xlu0 %2091 }
 0x386   :  { %v2176_v51 = vsel %vm2020_vm5, %v2092_v8, %v1979_v46  ;;  %3518 = vmatprep.mubr.f32.mxu1 %v6069_v54  ;;  %v3338_v43 = vmul.f32 %v6069_v54, %v3290_v45 }
 0x387   :  { %v2373_v62 = vsel %vm2217_vm3, %v2289_v1, %v2176_v51  ;;  %v7888_v1 = vpop.f32.mrb[103].mxu0 }
 0x388   :  { %3519 = vmatmul.mubr.f32.gmra.mrb[66].mxu1 %v3338_v43  ;;  %10343 = vst [vmem:[#allocation26_spill] sm:$0xff] %v7888_v1  ;;  %v7890_v54 = vpop.f32.mrb[104].mxu0 }
 0x389   :  { %v2486_v37 = vpop.xlane.xlu0 %2485  ;;  %v7892_v45 = vpop.f32.mrb[105].mxu0 }
 0x38a   :  { %v2570_v53 = vsel %vm2414_vm6, %v2486_v37, %v2373_v62  ;;  %10344 = vst [vmem:[#allocation35_spill] sm:$0xff] %v7892_v45  ;;  %v7894_v46 = vpop.f32.mrb[106].mxu0  ;;  %v7910_v62 = vld [vmem:[%s10238_s0 + $0x70] sm:$0xff] }
 0x38b   :  { %v2618_v22 = vsub.f32 %v7402_v15, %v2570_v53  ;;  %v2291_v15 = vpop.xlane.xlu1 %2290  ;;  %v7896_v8 = vpop.f32.mrb[107].mxu0 }
 0x38c   :  { %10345 = vst [vmem:[#allocation36_spill] sm:$0xff] %v7896_v8  ;;  %v7900_v43 = vpop.f32.mrb[108].mxu0 }
 0x38d   :  { %v6071_v28 = vpop.eup %6070  ;;  %v2677_v19 = vmul.f32 1.442695, %v2618_v22  ;;  %v2094_v31 = vpop.xlane.xlu0 %2093 }
 0x38e   :  { %v2177_v32 = vsel %vm2020_vm5, %v2094_v31, %v1980_v48  ;;  %3523 = vmatprep.mubr.f32.mxu1 %v6071_v28  ;;  %v3339_v16 = vmul.f32 %v6071_v28, %v3291_v50  ;;  %v7905_v39 = vpop.f32.mrb[109].mxu0 }
 0x38f   :  { %6072 = vpow2.f32 %v2677_v19  ;;  %v2374_v9 = vsel %vm2217_vm3, %v2291_v15, %v2177_v32  ;;  %10346 = vst [vmem:[#allocation40_spill] sm:$0xff] %v7905_v39  ;;  %v7914_v37 = vpop.f32.mrb[110].mxu0 }
 0x390   :  { %3524 = vmatmul.mubr.f32.gmra.mrb[68].mxu1 %v3339_v16  ;;  %v7916_v59 = vpop.f32.mrb[111].mxu0  ;;  %v2041_v16 = vsel %vm2020_vm5, %v7679_v61, -1e+30 }
 0x391   :  { %v2488_v18 = vpop.xlane.xlu0 %2487  ;;  %10347 = vst [vmem:[#allocation41_spill] sm:$0xff] %v7916_v59  ;;  %v7920_v53 = vpop.f32.mrb[112].mxu0 }
 0x392   :  { %v2571_v47 = vsel %vm2414_vm6, %v2488_v18, %v2374_v9  ;;  %2308 = vmax.xlane.f32.xlu1 %v2239_v6  ;;  %v7922_v22 = vpop.f32.mrb[113].mxu0 }
 0x393   :  { %v2619_v17 = vsub.f32 %v10338_v21, %v2571_v47  ;;  %3063 = vrot.lane.b32.xlu0 %v7590_v44, %s6319_s14  ;;  %10348 = vst [vmem:[#allocation42_spill] sm:$0xff] %v7922_v22  ;;  %v7924_v28 = vpop.f32.mrb[114].mxu0 }
 0x394   :  { %10349 = vst [vmem:[#allocation43_spill] sm:$0xff] %v7924_v28  ;;  %v7926_v2 = vpop.f32.mrb[115].mxu0 }
 0x395   :  { %v2679_v55 = vmul.f32 1.442695, %v2619_v17  ;;  %v7898_v51 = vpop.xlane.xlu0 %1898  ;;  %10350 = vst [vmem:[#allocation44_spill] sm:$0xff] %v7926_v2  ;;  %v7928_v50 = vpop.f32.mrb[116].mxu0 }
 0x396   :  { %10351 = vst [vmem:[#allocation45_spill] sm:$0xff] %v7928_v50  ;;  %v7932_v19 = vpop.f32.mrb[117].mxu0 }
 0x397   :  { %6074 = vpow2.f32 %v2679_v55  ;;  %10352 = vst [vmem:[#allocation46_spill] sm:$0xff] %v7932_v19  ;;  %v7934_v63 = vpop.f32.mrb[118].mxu0 }
 0x398   :  { %10353 = vst [vmem:[#allocation47_spill] sm:$0xff] %v7934_v63  ;;  %v7936_v31 = vpop.f32.mrb[119].mxu0 }
 0x399   :  { %v6073_v49 = vpop.eup %6072  ;;  %v7918_v52 = vpop.xlane.xlu0 %2095  ;;  %10354 = vst [vmem:[#allocation48_spill] sm:$0xff] %v7936_v31 }
 0x39a   :  { %3528 = vmatprep.mubr.f32.mxu1 %v6073_v49  ;;  %v3340_v12 = vmul.f32 %v6073_v49, %v3292_v23  ;;  %v7938_v32 = vpop.f32.mrb[120].mxu0  ;;  %v2293_v23 = vpop.xlane.xlu1 %2292 }
 0x39b   :  { %10355 = vst [vmem:[#allocation49_spill] sm:$0xff] %v7938_v32  ;;  %v7943_v15 = vpop.f32.mrb[121].mxu0  ;;  %v10379_v32 = vld [vmem:[#allocation27_spill] sm:$0xff] }
 0x39c   :  { %3529 = vmatmul.mubr.f32.gmra.mrb[70].mxu1 %v3340_v12  ;;  %10356 = vst [vmem:[#allocation50_spill] sm:$0xff] %v7943_v15  ;;  %v7947_v18 = vpop.f32.mrb[122].mxu0 }
 0x39d   :  { %v7930_v48 = vpop.xlane.xlu0 %2489  ;;  %10357 = vst [vmem:[#allocation51_spill] sm:$0xff] %v7947_v18  ;;  %v7949_v6 = vpop.f32.mrb[123].mxu0 }
 0x39e   :  { %10358 = vst [vmem:[#allocation52_spill] sm:$0xff] %v7949_v6  ;;  %v7951_v47 = vpop.f32.mrb[124].mxu0 }
 0x39f   :  { %10359 = vst [vmem:[#allocation53_spill] sm:$0xff] %v7951_v47  ;;  %v7956_v35 = vpop.f32.mrb[125].mxu0 }
 0x3a0   :  { %10360 = vst [vmem:[#allocation54_spill] sm:$0xff] %v7956_v35  ;;  %v7958_v38 = vpop.f32.mrb[126].mxu0 }
 0x3a1   :  { %v7902_v34 = vpop.eup %6074  ;;  %v7945_v9 = vpop.xlane.xlu0 %2097  ;;  %10361 = vst [vmem:[#allocation55_spill] sm:$0xff] %v7958_v38 }
 0x3a2   :  { %3533 = vmatprep.mubr.f32.mxu1 %v7902_v34  ;;  %v7960_v21 = vpop.f32.mrb[127].mxu0 }
 0x3a3   :  { %2923 = vrot.lane.b32.xlu1 %v7910_v62, %s6318_s13  ;;  %10362 = vst [vmem:[#allocation56_spill] sm:$0xff] %v7960_v21  ;;  %v7964_v55 = vpop.f32.mrb[128].mxu0 }
 0x3a4   :  { %10363 = vst [vmem:[#allocation57_spill] sm:$0xff] %v7964_v55  ;;  %v7969_v10 = vpop.f32.mrb[129].mxu0 }
 0x3a5   :  { %v7962_v17 = vpop.xlane.xlu0 %2491  ;;  %10364 = vst [vmem:[#allocation58_spill] sm:$0xff] %v7969_v10  ;;  %v7971_v49 = vpop.f32.mrb[130].mxu0 }
 0x3a6   :  { %10365 = vst [vmem:[#allocation59_spill] sm:$0xff] %v7971_v49  ;;  %v7973_v7 = vpop.f32.mrb[131].mxu0 }
 0x3a7   :  { %10366 = vst [vmem:[#allocation60_spill] sm:$0xff] %v7973_v7  ;;  %v7975_v12 = vpop.f32.mrb[132].mxu0  ;;  %v7990_v7 = vadd.f32 %v7651_v29, %v6986_v0 }
 0x3a8   :  { %10367 = vst [vmem:[#allocation61_spill] sm:$0xff] %v7975_v12  ;;  %v1981_v12 = vsel %vm1823_vm2, %v7898_v51, 0.0 }
 0x3a9   :  { %v7982_v35 = vpop.xlane.xlu0 %1902  ;;  %v2178_v49 = vsel %vm2020_vm5, %v7918_v52, %v1981_v12 }
 0x3b2   :  { %2109 = vmax.xlane.f32.xlu0 %v2041_v16  ;;  %v2042_v16 = vsel %vm2020_vm5, %v7851_v36, -1e+30 }
 0x3b6   :  { %2503 = vmax.xlane.f32.xlu0 %v2435_v60  ;;  %v7980_v60 = vpop.f32.mrb[133].mxu0 }
 0x3b7   :  { %10368 = vst [vmem:[#allocation62_spill] sm:$0xff] %v7980_v60  ;;  %v7984_v21 = vpop.f32.mrb[134].mxu0  ;;  %v8000_v60 = vpop.xlane.xlu0 %2099 }
 0x3b8   :  { %10369 = vst [vmem:[#allocation63_spill] sm:$0xff] %v7984_v21  ;;  %v7986_v10 = vpop.f32.mrb[135].mxu0 }
 0x3b9   :  { %10370 = vst [vmem:[#allocation64_spill] sm:$0xff] %v7986_v10  ;;  %v7992_v15 = vpop.f32.mrb[136].mxu0 }
 0x3ba   :  { %1914 = vmax.xlane.f32.xlu0 %v1845_v14  ;;  %v1901_v14 = vpop.xlane.xlu1 %1900  ;;  %10371 = vst [vmem:[#allocation65_spill] sm:$0xff] %v7992_v15  ;;  %v7994_v6 = vpop.f32.mrb[137].mxu0 }
 0x3bb   :  { %10372 = vst [vmem:[#allocation66_spill] sm:$0xff] %v7994_v6  ;;  %v7996_v19 = vpop.f32.mrb[138].mxu0  ;;  %v2240_v6 = vsel %vm2217_vm3, %v7990_v7, -1e+30  ;;  %v1982_v38 = vsel %vm1823_vm2, %v1901_v14, 0.0  ;;  %v8094_v14 = vadd.f32 %v7788_v26, %v6986_v0 }
 0x3bc   :  { %10373 = vst [vmem:[#allocation67_spill] sm:$0xff] %v7996_v19  ;;  %v7998_v31 = vpop.f32.mrb[139].mxu0  ;;  %v2436_v19 = vsel %vm2414_vm6, %v7851_v36, -1e+30  ;;  %v2179_v51 = vsel %vm2020_vm5, %v7945_v9, %v1982_v38 }
 0x3bd   :  { %10374 = vst [vmem:[#allocation68_spill] sm:$0xff] %v7998_v31  ;;  %v8005_v10 = vpop.f32.mrb[140].mxu0  ;;  %v8016_v31 = vpop.xlane.xlu0 %2493 }
 0x3be   :  { %2111 = vmax.xlane.f32.xlu0 %v2042_v16  ;;  %v1846_v16 = vsel %vm1823_vm2, %v7990_v7, -1e+30  ;;  %10375 = vst [vmem:[#allocation69_spill] sm:$0xff] %v8005_v10  ;;  %v8007_v22 = vpop.f32.mrb[141].mxu0  ;;  %v2295_v29 = vpop.xlane.xlu1 %2294 }
 0x3bf   :  { %10376 = vst [vmem:[#allocation70_spill] sm:$0xff] %v8007_v22  ;;  %v8009_v2 = vpop.f32.mrb[142].mxu0  ;;  %v2376_v12 = vsel %vm2217_vm3, %v2295_v29, %v2179_v51 }
 0x3c0   :  { %10377 = vst [vmem:[#allocation71_spill] sm:$0xff] %v8009_v2  ;;  %v8011_v39 = vpop.f32.mrb[143].mxu0 }
 0x3c1   :  { %10378 = vst [vmem:[#allocation72_spill] sm:$0xff] %v8011_v39  ;;  %v8022_v8 = vpop.xlane.xlu0 %2101 }
 0x3c2   :  { %v8018_v59 = vpop.xlane.xlu1 %2296 }
 0x3c6   :  { %v8020_v45 = vpop.xlane.xlu1 %1904 }
 0x3c7   :  { %1916 = vmax.xlane.f32.xlu1 %v1846_v16  ;;  %v8028_v16 = vpop.xlane.xlu0 %2495 }
 0x3ca   :  { %v8026_v22 = vpop.xlane.xlu1 %2298 }
 0x3cb   :  { %2310 = vmax.xlane.f32.xlu1 %v2240_v6  ;;  %v8032_v33 = vpop.xlane.xlu0 %1906  ;;  %v8037_v6 = vld [vmem:[%s10238_s0 + $0x78] sm:$0xff] }
 0x3ce   :  { %v8030_v39 = vpop.xlane.xlu1 %2300 }
 0x3cf   :  { %v8045_v30 = vpop.xlane.xlu0 %2103 }
 0x3d2   :  { %v8041_v1 = vpop.xlane.xlu1 %1908 }
 0x3d3   :  { %v8051_v20 = vpop.xlane.xlu0 %2497 }
 0x3d4   :  { %2779 = vrot.lane.b32.xlu0 %v7910_v62, %s6317_s2 }
 0x3d6   :  { %v8049_v42 = vpop.xlane.xlu1 %2302 }
 0x3d7   :  { %v8055_v2 = vpop.xlane.xlu0 %2105 }
 0x3da   :  { %v8053_v24 = vpop.xlane.xlu1 %2304 }
 0x3db   :  { %v8060_v15 = vpop.xlane.xlu0 %2499 }
 0x3dc   :  { %2781 = vrot.lane.b32.xlu1 %v8037_v6, %s6317_s2 }
 0x3de   :  { %v2920_v10 = vpop.permute.xlu1 %2919 }
 0x3df   :  { %v8070_v55 = vpop.xlane.xlu0 %1910 }
 0x3e0   :  { %2925 = vrot.lane.b32.xlu1 %v8037_v6, %s6318_s13 }
 0x3e2   :  { %v8062_v21 = vpop.xlane.xlu1 %1912 }
 0x3e3   :  { %v8087_v63 = vpop.xlane.xlu0 %2107 }
 0x3e4   :  { %3069 = vrot.lane.b32.xlu1 %v8037_v6, %s6319_s14 }
 0x3e6   :  { %v8076_v47 = vpop.xlane.xlu1 %2306 }
 0x3e7   :  { %v2776_v9 = vpop.permute.xlu0 %2775 }
 0x3e8   :  { %v3195_v26 = vsel %vm101_vm0, %v2776_v9, %v7590_v44 }
 0x3e9   :  { %v3244_v51 = vsel %vm3231_vm1, %v3195_v26, %v2920_v10 }
 0x3f3   :  { %2505 = vmax.xlane.f32.xlu0 %v2436_v19  ;;  %v2375_v19 = vsel %vm2217_vm3, %v2293_v23, %v2178_v49  ;;  %v2573_v49 = vsel %vm2414_vm6, %v7962_v17, %v2376_v12  ;;  %v2778_v23 = vpop.permute.xlu1 %2777 }
 0x3f4   :  { %v2572_v18 = vsel %vm2414_vm6, %v7930_v48, %v2375_v19  ;;  %v10380_v19 = vld [vmem:[#allocation28_spill] sm:$0xff]  ;;  %v3196_v29 = vsel %vm101_vm0, %v2778_v23, %v7753_v27 }
 0x3f5   :  { %v2620_v52 = vsub.f32 %v10379_v32, %v2572_v18  ;;  %v2621_v50 = vsub.f32 %v10380_v19, %v2573_v49  ;;  %v2241_v32 = vsel %vm2217_vm3, %v8094_v14, -1e+30 }
 0x3f7   :  { %v2681_v48 = vmul.f32 1.442695, %v2620_v52  ;;  %v2683_v18 = vmul.f32 1.442695, %v2621_v50  ;;  %v2922_v38 = vpop.permute.xlu1 %2921 }
 0x3f8   :  { %v3245_v52 = vsel %vm3231_vm1, %v3196_v29, %v2922_v38 }
 0x3f9   :  { %6076 = vpow2.f32 %v2681_v48 }
 0x3fa   :  { %6078 = vpow2.f32 %v2683_v18 }
 0x3fb   :  { %v3066_v12 = vpop.permute.xlu1 %3065 }
 0x3fc   :  { %v3294_v19 = vsel %vm3280_vm4, %v3245_v52, %v3066_v12  ;;  %v1847_v52 = vsel %vm1823_vm2, %v8094_v14, -1e+30 }
 0x403   :  { %v6077_v28 = vpop.eup %6076 }
 0x404   :  { %v3342_v27 = vmul.f32 %v6077_v28, %v3294_v19  ;;  %v8115_v23 = vpop.eup %6078 }
 0x408   :  { %2312 = vmax.xlane.f32.xlu1 %v2241_v32 }
 0x409   :  { %3067 = vrot.lane.b32.xlu0 %v7910_v62, %s6319_s14 }
 0x40a   :  { %v8102_v17 = vpop.xlane.xlu0 %2501 }
 0x40e   :  { %v3064_v50 = vpop.permute.xlu0 %3063 }
 0x40f   :  { %v3293_v49 = vsel %vm3280_vm4, %v3244_v51, %v3064_v50  ;;  %v2437_v51 = vsel %vm2414_vm6, %v7990_v7, -1e+30 }
 0x410   :  { %v3341_v48 = vmul.f32 %v7902_v34, %v3293_v49  ;;  %v8123_v34 = vld [vmem:[%s10238_s0 + $0x80] sm:$0xff]  ;;  %v2044_v49 = vsel %vm2020_vm5, %v8094_v14, -1e+30 }
 0x411   :  { %v8113_v32 = vpop.f32.mrb[48].mxu1 }
 0x412   :  { %10381 = vst [vmem:[#allocation27_spill] sm:$0xff] %v8113_v32  ;;  %v3477_v44 = vpop.f32.mrb[49].mxu1  ;;  %3534 = vmatmul.mubr.f32.gmra.mrb[72].mxu1 %v3341_v48  ;;  %v8147_v48 = vadd.f32 %v7855_v25, %v6986_v0 }
 0x413   :  { %3538 = vmatprep.mubr.f32.mxu1 %v6077_v28  ;;  %v2043_v28 = vsel %vm2020_vm5, %v7990_v7, -1e+30 }
 0x416   :  { %3539 = vmatmul.mubr.f32.gmra.mrb[74].mxu1 %v3342_v27  ;;  %v1848_v27 = vsel %vm1823_vm2, %v8147_v48, -1e+30 }
 0x417   :  { %3543 = vmatprep.mubr.f32.mxu1 %v8115_v23 }
 0x418   :  { %v8118_v10 = vpop.f32.mrb[50].mxu1 }
 0x419   :  { %2927 = vrot.lane.b32.xlu1 %v8123_v34, %s6318_s13  ;;  %v3482_v9 = vpop.f32.mrb[51].mxu1 }
 0x420   :  { %v8127_v18 = vpop.f32.mrb[52].mxu1 }
 0x421   :  { %10382 = vst [vmem:[#allocation28_spill] sm:$0xff] %v8127_v18  ;;  %v3487_v38 = vpop.f32.mrb[53].mxu1 }
 0x422   :  { %v2242_v38 = vsel %vm2217_vm3, %v8147_v48, -1e+30 }
 0x428   :  { %2113 = vmax.xlane.f32.xlu0 %v2043_v28  ;;  %v8132_v26 = vpop.f32.mrb[54].mxu1 }
 0x429   :  { %10383 = vst [vmem:[#allocation73_spill] sm:$0xff] %v8132_v26  ;;  %v3492_v29 = vpop.f32.mrb[55].mxu1 }
 0x42c   :  { %2507 = vmax.xlane.f32.xlu0 %v2437_v51  ;;  %v8166_v51 = vld [vmem:[%s10238_s0 + $0x88] sm:$0xff] }
 0x430   :  { %1918 = vmax.xlane.f32.xlu0 %v1847_v52  ;;  %v8140_v12 = vpop.f32.mrb[56].mxu1 }
 0x431   :  { %10384 = vst [vmem:[#allocation74_spill] sm:$0xff] %v8140_v12  ;;  %v3497_v50 = vpop.f32.mrb[57].mxu1 }
 0x434   :  { %2115 = vmax.xlane.f32.xlu0 %v2044_v49 }
 0x438   :  { %v8149_v19 = vpop.f32.mrb[58].mxu1 }
 0x439   :  { %10385 = vst [vmem:[#allocation75_spill] sm:$0xff] %v8149_v19  ;;  %v3502_v44 = vpop.f32.mrb[59].mxu1  ;;  %v10393_v19 = vld [vmem:[#allocation30_spill] sm:$0xff] }
 0x43d   :  { %1920 = vmax.xlane.f32.xlu1 %v1848_v27  ;;  %v8178_v27 = vpop.xlane.xlu1 %2308 }
 0x440   :  { %v8154_v9 = vpop.f32.mrb[60].mxu1 }
 0x441   :  { %10386 = vst [vmem:[#allocation76_spill] sm:$0xff] %v8154_v9  ;;  %2314 = vmax.xlane.f32.xlu1 %v2242_v38  ;;  %v3507_v28 = vpop.f32.mrb[61].mxu1  ;;  %v2924_v9 = vpop.permute.xlu1 %2923 }
 0x442   :  { %v8182_v28 = vpop.xlane.xlu0 %2109 }
 0x44a   :  { %2783 = vrot.lane.b32.xlu0 %v8123_v34, %s6317_s2 }
 0x44b   :  { %v8161_v25 = vpop.f32.mrb[62].mxu1 }
 0x44c   :  { %10387 = vst [vmem:[#allocation77_spill] sm:$0xff] %v8161_v25  ;;  %v3512_v29 = vpop.f32.mrb[63].mxu1 }
 0x452   :  { %2785 = vrot.lane.b32.xlu1 %v8166_v51, %s6317_s2 }
 0x453   :  { %v8170_v52 = vpop.f32.mrb[64].mxu1 }
 0x454   :  { %10388 = vst [vmem:[#allocation78_spill] sm:$0xff] %v8170_v52  ;;  %v3517_v50 = vpop.f32.mrb[65].mxu1  ;;  %v8187_v52 = vpop.xlane.xlu0 %2503 }
 0x455   :  { %v2438_v50 = vsel %vm2414_vm6, %v8094_v14, -1e+30  ;;  %v8189_v12 = vpop.xlane.xlu1 %1916 }
 0x456   :  { %2929 = vrot.lane.b32.xlu1 %v8166_v51, %s6318_s13 }
 0x459   :  { %v8207_v25 = vpop.xlane.xlu1 %2310 }
 0x45a   :  { %3073 = vrot.lane.b32.xlu1 %v8166_v51, %s6319_s14 }
 0x45b   :  { %v8176_v49 = vpop.f32.mrb[66].mxu1 }
 0x45c   :  { %10389 = vst [vmem:[#allocation79_spill] sm:$0xff] %v8176_v49  ;;  %v3522_v44 = vpop.f32.mrb[67].mxu1 }
 0x45d   :  { %v1983_v44 = vsel %vm1823_vm2, %v7982_v35, 0.0 }
 0x463   :  { %v8180_v38 = vpop.f32.mrb[68].mxu1 }
 0x464   :  { %10390 = vst [vmem:[#allocation80_spill] sm:$0xff] %v8180_v38  ;;  %v3527_v29 = vpop.f32.mrb[69].mxu1  ;;  %v2180_v38 = vsel %vm2020_vm5, %v8000_v60, %v1983_v44  ;;  %v10392_v44 = vld [vmem:[#allocation29_spill] sm:$0xff] }
 0x465   :  { %v8199_v29 = vpop.xlane.xlu0 %1914  ;;  %v2377_v49 = vsel %vm2217_vm3, %v8018_v59, %v2180_v38  ;;  %v2782_v38 = vpop.permute.xlu1 %2781 }
 0x466   :  { %v2574_v35 = vsel %vm2414_vm6, %v8016_v31, %v2377_v49  ;;  %v8226_v31 = vadd.f32 %v7874_v41, %v6986_v0 }
 0x469   :  { %2509 = vmax.xlane.f32.xlu0 %v2438_v50  ;;  %v1984_v50 = vsel %vm1823_vm2, %v8020_v45, 0.0 }
 0x46a   :  { %v2181_v60 = vsel %vm2020_vm5, %v8022_v8, %v1984_v50 }
 0x46b   :  { %v2378_v45 = vsel %vm2217_vm3, %v8026_v22, %v2181_v60  ;;  %v2926_v60 = vpop.permute.xlu1 %2925 }
 0x46c   :  { %v2575_v59 = vsel %vm2414_vm6, %v8028_v16, %v2378_v45 }
 0x46d   :  { %v2623_v8 = vsub.f32 %v10393_v19, %v2575_v59  ;;  %v3198_v19 = vsel %vm101_vm0, %v2782_v38, %v8037_v6  ;;  %v8251_v6 = vld [vmem:[%s10238_s0 + $0x90] sm:$0xff]  ;;  %v2046_v38 = vsel %vm2020_vm5, %v8226_v31, -1e+30 }
 0x46f   :  { %v8197_v18 = vpop.f32.mrb[70].mxu1  ;;  %v2687_v22 = vmul.f32 1.442695, %v2623_v8  ;;  %v3070_v45 = vpop.permute.xlu1 %3069 }
 0x470   :  { %10391 = vst [vmem:[#allocation81_spill] sm:$0xff] %v8197_v18  ;;  %v3532_v32 = vpop.f32.mrb[71].mxu1  ;;  %v8219_v18 = vpop.xlane.xlu0 %2111 }
 0x471   :  { %v2622_v32 = vsub.f32 %v10392_v44, %v2574_v35  ;;  %v2243_v35 = vsel %vm2217_vm3, %v8226_v31, -1e+30 }
 0x473   :  { %v2685_v49 = vmul.f32 1.442695, %v2622_v32  ;;  %v3247_v32 = vsel %vm3231_vm1, %v3198_v19, %v2926_v60  ;;  %v8282_v19 = vld [vmem:[%s10238_s0 + $0x98] sm:$0xff] }
 0x474   :  { %v2780_v50 = vpop.permute.xlu0 %2779 }
 0x475   :  { %6080 = vpow2.f32 %v2685_v49  ;;  %v3197_v41 = vsel %vm101_vm0, %v2780_v50, %v7910_v62 }
 0x476   :  { %6082 = vpow2.f32 %v2687_v22  ;;  %v3246_v44 = vsel %vm3231_vm1, %v3197_v41, %v2924_v9  ;;  %v1849_v9 = vsel %vm1823_vm2, %v8226_v31, -1e+30  ;;  %v8269_v22 = vadd.f32 %v7880_v5, %v6986_v0 }
 0x478   :  { %v1850_v60 = vsel %vm1823_vm2, %v8269_v22, -1e+30  ;;  %v2244_v41 = vsel %vm2217_vm3, %v8269_v22, -1e+30 }
 0x47e   :  { %2316 = vmax.xlane.f32.xlu1 %v2243_v35  ;;  %v3296_v35 = vsel %vm3280_vm4, %v3247_v32, %v3070_v45  ;;  %v2440_v45 = vsel %vm2414_vm6, %v8226_v31, -1e+30 }
 0x47f   :  { %3071 = vrot.lane.b32.xlu0 %v8123_v34, %s6319_s14  ;;  %v6081_v26 = vpop.eup %6080 }
 0x480   :  { %v8234_v16 = vpop.xlane.xlu0 %2505  ;;  %v3344_v62 = vmul.f32 %v6081_v26, %v3296_v35  ;;  %v8245_v50 = vpop.eup %6082 }
 0x484   :  { %v3068_v59 = vpop.permute.xlu0 %3067 }
 0x485   :  { %v3295_v49 = vsel %vm3280_vm4, %v3246_v44, %v3068_v59 }
 0x486   :  { %v3343_v8 = vmul.f32 %v8115_v23, %v3295_v49  ;;  %v2045_v23 = vsel %vm2020_vm5, %v8147_v48, -1e+30 }
 0x488   :  { %3544 = vmatmul.mubr.f32.gmra.mrb[76].mxu1 %v3343_v8  ;;  %v1985_v8 = vsel %vm1823_vm2, %v8032_v33, 0.0 }
 0x489   :  { %3548 = vmatprep.mubr.f32.mxu1 %v6081_v26  ;;  %v2439_v26 = vsel %vm2414_vm6, %v8147_v48, -1e+30  ;;  %v2182_v35 = vsel %vm2020_vm5, %v8045_v30, %v1985_v8 }
 0x48c   :  { %3549 = vmatmul.mubr.f32.gmra.mrb[78].mxu1 %v3344_v62 }
 0x48d   :  { %3553 = vmatprep.mubr.f32.mxu1 %v8245_v50 }
 0x48f   :  { %2931 = vrot.lane.b32.xlu1 %v8251_v6, %s6318_s13 }
 0x495   :  { %v8290_v5 = vpop.xlane.xlu1 %2312 }
 0x499   :  { %v2928_v32 = vpop.permute.xlu1 %2927 }
 0x49e   :  { %2117 = vmax.xlane.f32.xlu0 %v2045_v23 }
 0x4a2   :  { %2511 = vmax.xlane.f32.xlu0 %v2439_v26 }
 0x4a6   :  { %1922 = vmax.xlane.f32.xlu0 %v1849_v9  ;;  %v1986_v9 = vsel %vm1823_vm2, %v8041_v1, 0.0 }
 0x4a7   :  { %v2183_v30 = vsel %vm2020_vm5, %v8055_v2, %v1986_v9 }
 0x4a8   :  { %v2380_v1 = vsel %vm2217_vm3, %v8049_v42, %v2183_v30 }
 0x4aa   :  { %2119 = vmax.xlane.f32.xlu0 %v2046_v38  ;;  %v2379_v38 = vsel %vm2217_vm3, %v8030_v39, %v2182_v35  ;;  %v2577_v35 = vsel %vm2414_vm6, %v8060_v15, %v2380_v1 }
 0x4ab   :  { %v2576_v33 = vsel %vm2414_vm6, %v8051_v20, %v2379_v38  ;;  %v2625_v9 = vsub.f32 %v7518_v13, %v2577_v35 }
 0x4ac   :  { %v2624_v8 = vsub.f32 %v7504_v11, %v2576_v33 }
 0x4ad   :  { %v2691_v42 = vmul.f32 1.442695, %v2625_v9 }
 0x4ae   :  { %v2689_v2 = vmul.f32 1.442695, %v2624_v8 }
 0x4b0   :  { %6084 = vpow2.f32 %v2689_v2 }
 0x4b1   :  { %6086 = vpow2.f32 %v2691_v42 }
 0x4b3   :  { %1924 = vmax.xlane.f32.xlu1 %v1850_v60 }
 0x4b5   :  { %v8292_v44 = vpop.xlane.xlu0 %2113 }
 0x4b7   :  { %2318 = vmax.xlane.f32.xlu1 %v2244_v41 }
 0x4b9   :  { %v8297_v59 = vpop.xlane.xlu0 %2507 }
 0x4bd   :  { %v8309_v23 = vpop.xlane.xlu0 %1918 }
 0x4c0   :  { %2787 = vrot.lane.b32.xlu0 %v8251_v6, %s6317_s2 }
 0x4c1   :  { %v8331_v39 = vpop.xlane.xlu0 %2115 }
 0x4c5   :  { %v2784_v38 = vpop.permute.xlu0 %2783 }
 0x4c8   :  { %2789 = vrot.lane.b32.xlu1 %v8282_v19, %s6317_s2 }
 0x4ca   :  { %v8299_v49 = vpop.xlane.xlu1 %1920 }
 0x4cc   :  { %2933 = vrot.lane.b32.xlu1 %v8282_v19, %s6318_s13 }
 0x4ce   :  { %v8317_v60 = vpop.xlane.xlu1 %2314 }
 0x4d0   :  { %3077 = vrot.lane.b32.xlu1 %v8282_v19, %s6319_s14 }
 0x4d2   :  { %v2786_v20 = vpop.permute.xlu1 %2785 }
 0x4d3   :  { %v3200_v13 = vsel %vm101_vm0, %v2786_v20, %v8166_v51  ;;  %v8363_v51 = vld [vmem:[%s10238_s0 + $0xa0] sm:$0xff] }
 0x4d6   :  { %v2930_v33 = vpop.permute.xlu1 %2929 }
 0x4da   :  { %v3074_v8 = vpop.permute.xlu1 %3073 }
 0x4df   :  { %2513 = vmax.xlane.f32.xlu0 %v2440_v45 }
 0x4e5   :  { %v8307_v62 = vpop.f32.mrb[72].mxu1 }
 0x4e6   :  { %10394 = vst [vmem:[#allocation29_spill] sm:$0xff] %v8307_v62  ;;  %v3537_v26 = vpop.f32.mrb[73].mxu1 }
 0x4e7   :  { %v8338_v26 = vadd.f32 %v7884_v58, %v6986_v0  ;;  %v3199_v58 = vsel %vm101_vm0, %v2784_v38, %v8123_v34 }
 0x4e8   :  { %v3248_v30 = vsel %vm3231_vm1, %v3199_v58, %v2928_v32  ;;  %v2441_v32 = vsel %vm2414_vm6, %v8269_v22, -1e+30 }
 0x4e9   :  { %v8325_v41 = vpop.f32.mrb[74].mxu1  ;;  %v2245_v11 = vsel %vm2217_vm3, %v8338_v26, -1e+30  ;;  %v1851_v20 = vsel %vm1823_vm2, %v8338_v26, -1e+30 }
 0x4ea   :  { %10395 = vst [vmem:[#allocation30_spill] sm:$0xff] %v8325_v41  ;;  %v3542_v45 = vpop.f32.mrb[75].mxu1  ;;  %v2048_v42 = vsel %vm2020_vm5, %v8338_v26, -1e+30 }
 0x4eb   :  { %v3249_v45 = vsel %vm3231_vm1, %v3200_v13, %v2930_v33  ;;  %v8381_v33 = vadd.f32 %v7890_v54, %v6986_v0 }
 0x4ec   :  { %v3298_v9 = vsel %vm3280_vm4, %v3249_v45, %v3074_v8 }
 0x4ed   :  { %v1852_v58 = vsel %vm1823_vm2, %v8381_v33, -1e+30  ;;  %v2246_v13 = vsel %vm2217_vm3, %v8381_v33, -1e+30 }
 0x4f4   :  { %2320 = vmax.xlane.f32.xlu1 %v2245_v11  ;;  %v6085_v11 = vpop.eup %6084 }
 0x4f5   :  { %3075 = vrot.lane.b32.xlu0 %v8251_v6, %s6319_s14  ;;  %v3346_v34 = vmul.f32 %v6085_v11, %v3298_v9  ;;  %v8357_v38 = vpop.eup %6086  ;;  %v1987_v9 = vsel %vm1823_vm2, %v8070_v55, 0.0 }
 0x4f6   :  { %v8346_v15 = vpop.xlane.xlu0 %2509 }
 0x4fa   :  { %v3072_v1 = vpop.permute.xlu0 %3071 }
 0x4fb   :  { %v3297_v35 = vsel %vm3280_vm4, %v3248_v30, %v3072_v1  ;;  %v8394_v30 = vld [vmem:[%s10238_s0 + $0xa8] sm:$0xff]  ;;  %v2442_v1 = vsel %vm2414_vm6, %v8338_v26, -1e+30 }
 0x4fc   :  { %v3345_v2 = vmul.f32 %v8245_v50, %v3297_v35  ;;  %v2047_v50 = vsel %vm2020_vm5, %v8269_v22, -1e+30 }
 0x4fe   :  { %3554 = vmatmul.mubr.f32.gmra.mrb[80].mxu1 %v3345_v2 }
 0x4ff   :  { %3558 = vmatprep.mubr.f32.mxu1 %v6085_v11  ;;  %v2184_v11 = vsel %vm2020_vm5, %v8087_v63, %v1987_v9 }
 0x502   :  { %3559 = vmatmul.mubr.f32.gmra.mrb[82].mxu1 %v3346_v34 }
 0x503   :  { %3563 = vmatprep.mubr.f32.mxu1 %v8357_v38 }
 0x505   :  { %2935 = vrot.lane.b32.xlu1 %v8363_v51, %s6318_s13 }
 0x50b   :  { %v8402_v54 = vpop.xlane.xlu1 %2316 }
 0x50f   :  { %v2932_v8 = vpop.permute.xlu1 %2931 }
 0x514   :  { %2121 = vmax.xlane.f32.xlu0 %v2047_v50 }
 0x518   :  { %2515 = vmax.xlane.f32.xlu0 %v2441_v32 }
 0x51c   :  { %1926 = vmax.xlane.f32.xlu0 %v1851_v20  ;;  %v1988_v20 = vsel %vm1823_vm2, %v8062_v21, 0.0 }
 0x51d   :  { %v2185_v63 = vsel %vm2020_vm5, %v8182_v28, %v1988_v20 }
 0x51e   :  { %v2382_v21 = vsel %vm2217_vm3, %v8076_v47, %v2185_v63 }
 0x520   :  { %2123 = vmax.xlane.f32.xlu0 %v2048_v42  ;;  %v2381_v42 = vsel %vm2217_vm3, %v8053_v24, %v2184_v11  ;;  %v2579_v11 = vsel %vm2414_vm6, %v8187_v52, %v2382_v21 }
 0x521   :  { %v2578_v55 = vsel %vm2414_vm6, %v8102_v17, %v2381_v42  ;;  %v2627_v20 = vsub.f32 %v7679_v61, %v2579_v11 }
 0x522   :  { %v2626_v9 = vsub.f32 %v7544_v40, %v2578_v55 }
 0x523   :  { %v2695_v47 = vmul.f32 1.442695, %v2627_v20 }
 0x524   :  { %v2693_v28 = vmul.f32 1.442695, %v2626_v9 }
 0x526   :  { %6088 = vpow2.f32 %v2693_v28 }
 0x527   :  { %6090 = vpow2.f32 %v2695_v47 }
 0x529   :  { %1928 = vmax.xlane.f32.xlu1 %v1852_v58 }
 0x52b   :  { %v8404_v45 = vpop.xlane.xlu0 %2117 }
 0x52d   :  { %2322 = vmax.xlane.f32.xlu1 %v2246_v13 }
 0x52f   :  { %v8409_v35 = vpop.xlane.xlu0 %2511 }
 0x533   :  { %v8421_v50 = vpop.xlane.xlu0 %1922 }
 0x536   :  { %2791 = vrot.lane.b32.xlu0 %v8363_v51, %s6317_s2 }
 0x537   :  { %v8443_v24 = vpop.xlane.xlu0 %2119 }
 0x53b   :  { %v2788_v42 = vpop.permute.xlu0 %2787 }
 0x53e   :  { %2793 = vrot.lane.b32.xlu1 %v8394_v30, %s6317_s2 }
 0x540   :  { %v8411_v2 = vpop.xlane.xlu1 %1924 }
 0x542   :  { %2937 = vrot.lane.b32.xlu1 %v8394_v30, %s6318_s13 }
 0x544   :  { %v8429_v58 = vpop.xlane.xlu1 %2318 }
 0x546   :  { %3081 = vrot.lane.b32.xlu1 %v8394_v30, %s6319_s14 }
 0x548   :  { %v2790_v17 = vpop.permute.xlu1 %2789 }
 0x549   :  { %v3202_v61 = vsel %vm101_vm0, %v2790_v17, %v8282_v19  ;;  %v8475_v19 = vld [vmem:[%s10238_s0 + $0xb0] sm:$0xff] }
 0x54c   :  { %v2934_v55 = vpop.permute.xlu1 %2933 }
 0x550   :  { %v3078_v9 = vpop.permute.xlu1 %3077 }
 0x555   :  { %2517 = vmax.xlane.f32.xlu0 %v2442_v1 }
 0x55b   :  { %v8419_v34 = vpop.f32.mrb[76].mxu1 }
 0x55c   :  { %10396 = vst [vmem:[#allocation82_spill] sm:$0xff] %v8419_v34  ;;  %v3547_v32 = vpop.f32.mrb[77].mxu1 }
 0x55d   :  { %v8450_v32 = vadd.f32 %v7894_v46, %v6986_v0  ;;  %v3201_v46 = vsel %vm101_vm0, %v2788_v42, %v8251_v6 }
 0x55e   :  { %v3250_v63 = vsel %vm3231_vm1, %v3201_v46, %v2932_v8  ;;  %v2443_v8 = vsel %vm2414_vm6, %v8381_v33, -1e+30 }
 0x55f   :  { %v8437_v13 = vpop.f32.mrb[78].mxu1  ;;  %v2247_v40 = vsel %vm2217_vm3, %v8450_v32, -1e+30  ;;  %v1853_v17 = vsel %vm1823_vm2, %v8450_v32, -1e+30 }
 0x560   :  { %v3552_v1 = vpop.f32.mrb[79].mxu1  ;;  %v2050_v47 = vsel %vm2020_vm5, %v8450_v32, -1e+30 }
 0x561   :  { %v3251_v1 = vsel %vm3231_vm1, %v3202_v61, %v2934_v55  ;;  %v8493_v55 = vadd.f32 %v7900_v43, %v6986_v0 }
 0x562   :  { %v3300_v20 = vsel %vm3280_vm4, %v3251_v1, %v3078_v9 }
 0x563   :  { %v1854_v46 = vsel %vm1823_vm2, %v8493_v55, -1e+30  ;;  %v2248_v61 = vsel %vm2217_vm3, %v8493_v55, -1e+30 }
 0x56a   :  { %2324 = vmax.xlane.f32.xlu1 %v2247_v40  ;;  %v6089_v40 = vpop.eup %6088 }
 0x56b   :  { %3079 = vrot.lane.b32.xlu0 %v8363_v51, %s6319_s14  ;;  %v3348_v6 = vmul.f32 %v6089_v40, %v3300_v20  ;;  %v8469_v42 = vpop.eup %6090  ;;  %v1989_v20 = vsel %vm1823_vm2, %v8199_v29, 0.0 }
 0x56c   :  { %v8458_v52 = vpop.xlane.xlu0 %2513 }
 0x570   :  { %v3076_v21 = vpop.permute.xlu0 %3075 }
 0x571   :  { %v3299_v11 = vsel %vm3280_vm4, %v3250_v63, %v3076_v21  ;;  %v8506_v63 = vld [vmem:[%s10238_s0 + $0xb8] sm:$0xff]  ;;  %v2444_v21 = vsel %vm2414_vm6, %v8450_v32, -1e+30 }
 0x572   :  { %v3347_v28 = vmul.f32 %v8357_v38, %v3299_v11  ;;  %v2049_v38 = vsel %vm2020_vm5, %v8381_v33, -1e+30 }
 0x574   :  { %3564 = vmatmul.mubr.f32.gmra.mrb[84].mxu1 %v3347_v28 }
 0x575   :  { %3568 = vmatprep.mubr.f32.mxu1 %v6089_v40  ;;  %v2186_v40 = vsel %vm2020_vm5, %v8219_v18, %v1989_v20 }
 0x578   :  { %3569 = vmatmul.mubr.f32.gmra.mrb[86].mxu1 %v3348_v6 }
 0x579   :  { %3573 = vmatprep.mubr.f32.mxu1 %v8469_v42 }
 0x57b   :  { %2939 = vrot.lane.b32.xlu1 %v8475_v19, %s6318_s13 }
 0x581   :  { %v8514_v43 = vpop.xlane.xlu1 %2320 }
 0x585   :  { %v2936_v9 = vpop.permute.xlu1 %2935 }
 0x58a   :  { %2125 = vmax.xlane.f32.xlu0 %v2049_v38 }
 0x58e   :  { %2519 = vmax.xlane.f32.xlu0 %v2443_v8 }
 0x592   :  { %1930 = vmax.xlane.f32.xlu0 %v1853_v17  ;;  %v1990_v17 = vsel %vm1823_vm2, %v8189_v12, 0.0 }
 0x593   :  { %v2187_v18 = vsel %vm2020_vm5, %v8292_v44, %v1990_v17 }
 0x594   :  { %v2384_v12 = vsel %vm2217_vm3, %v8207_v25, %v2187_v18 }
 0x596   :  { %2127 = vmax.xlane.f32.xlu0 %v2050_v47  ;;  %v2383_v47 = vsel %vm2217_vm3, %v8178_v27, %v2186_v40  ;;  %v2581_v40 = vsel %vm2414_vm6, %v8297_v59, %v2384_v12 }
 0x597   :  { %v2580_v29 = vsel %vm2414_vm6, %v8234_v16, %v2383_v47  ;;  %v2629_v17 = vsub.f32 %v7990_v7, %v2581_v40 }
 0x598   :  { %v2628_v20 = vsub.f32 %v7851_v36, %v2580_v29 }
 0x599   :  { %v2699_v25 = vmul.f32 1.442695, %v2629_v17 }
 0x59a   :  { %v2697_v44 = vmul.f32 1.442695, %v2628_v20 }
 0x59c   :  { %6092 = vpow2.f32 %v2697_v44 }
 0x59d   :  { %6094 = vpow2.f32 %v2699_v25 }
 0x59f   :  { %1932 = vmax.xlane.f32.xlu1 %v1854_v46 }
 0x5a1   :  { %v8516_v1 = vpop.xlane.xlu0 %2121 }
 0x5a3   :  { %2326 = vmax.xlane.f32.xlu1 %v2248_v61 }
 0x5a5   :  { %v8521_v11 = vpop.xlane.xlu0 %2515 }
 0x5a9   :  { %v8533_v38 = vpop.xlane.xlu0 %1926 }
 0x5ac   :  { %2795 = vrot.lane.b32.xlu0 %v8475_v19, %s6317_s2 }
 0x5ad   :  { %v8555_v27 = vpop.xlane.xlu0 %2123 }
 0x5b1   :  { %v2792_v47 = vpop.permute.xlu0 %2791 }
 0x5b4   :  { %2797 = vrot.lane.b32.xlu1 %v8506_v63, %s6317_s2 }
 0x5b6   :  { %v8523_v28 = vpop.xlane.xlu1 %1928 }
 0x5b8   :  { %2941 = vrot.lane.b32.xlu1 %v8506_v63, %s6318_s13 }
 0x5ba   :  { %v8541_v46 = vpop.xlane.xlu1 %2322 }
 0x5bc   :  { %3085 = vrot.lane.b32.xlu1 %v8506_v63, %s6319_s14 }
 0x5be   :  { %v2794_v16 = vpop.permute.xlu1 %2793 }
 0x5bf   :  { %v3204_v7 = vsel %vm101_vm0, %v2794_v16, %v8394_v30  ;;  %v8587_v30 = vld [vmem:[%s10238_s0 + $0xc0] sm:$0xff] }
 0x5c2   :  { %v2938_v29 = vpop.permute.xlu1 %2937 }
 0x5c6   :  { %v3082_v20 = vpop.permute.xlu1 %3081 }
 0x5cb   :  { %2521 = vmax.xlane.f32.xlu0 %v2444_v21 }
 0x5d1   :  { %v8531_v6 = vpop.f32.mrb[80].mxu1 }
 0x5d2   :  { %10397 = vst [vmem:[#allocation83_spill] sm:$0xff] %v8531_v6  ;;  %v3557_v8 = vpop.f32.mrb[81].mxu1 }
 0x5d3   :  { %v8562_v8 = vadd.f32 %v7914_v37, %v6986_v0  ;;  %v3203_v37 = vsel %vm101_vm0, %v2792_v47, %v8363_v51 }
 0x5d4   :  { %v3252_v18 = vsel %vm3231_vm1, %v3203_v37, %v2936_v9  ;;  %v2445_v9 = vsel %vm2414_vm6, %v8493_v55, -1e+30 }
 0x5d5   :  { %v8549_v61 = vpop.f32.mrb[82].mxu1  ;;  %v2249_v36 = vsel %vm2217_vm3, %v8562_v8, -1e+30  ;;  %v1855_v16 = vsel %vm1823_vm2, %v8562_v8, -1e+30 }
 0x5d6   :  { %v3562_v21 = vpop.f32.mrb[83].mxu1  ;;  %v2052_v25 = vsel %vm2020_vm5, %v8562_v8, -1e+30 }
 0x5d7   :  { %v3253_v21 = vsel %vm3231_vm1, %v3204_v7, %v2938_v29  ;;  %v8605_v29 = vadd.f32 %v7920_v53, %v6986_v0 }
 0x5d8   :  { %v3302_v17 = vsel %vm3280_vm4, %v3253_v21, %v3082_v20 }
 0x5d9   :  { %v1856_v37 = vsel %vm1823_vm2, %v8605_v29, -1e+30  ;;  %v2250_v7 = vsel %vm2217_vm3, %v8605_v29, -1e+30 }
 0x5e0   :  { %2328 = vmax.xlane.f32.xlu1 %v2249_v36  ;;  %v6093_v36 = vpop.eup %6092 }
 0x5e1   :  { %3083 = vrot.lane.b32.xlu0 %v8475_v19, %s6319_s14  ;;  %v3350_v51 = vmul.f32 %v6093_v36, %v3302_v17  ;;  %v8581_v47 = vpop.eup %6094  ;;  %v1991_v17 = vsel %vm1823_vm2, %v8309_v23, 0.0 }
 0x5e2   :  { %v8570_v59 = vpop.xlane.xlu0 %2517 }
 0x5e6   :  { %v3080_v12 = vpop.permute.xlu0 %3079 }
 0x5e7   :  { %v3301_v40 = vsel %vm3280_vm4, %v3252_v18, %v3080_v12  ;;  %v8618_v18 = vld [vmem:[%s10238_s0 + $0xc8] sm:$0xff]  ;;  %v2446_v12 = vsel %vm2414_vm6, %v8562_v8, -1e+30 }
 0x5e8   :  { %v3349_v44 = vmul.f32 %v8469_v42, %v3301_v40  ;;  %v2051_v42 = vsel %vm2020_vm5, %v8493_v55, -1e+30 }
 0x5ea   :  { %3574 = vmatmul.mubr.f32.gmra.mrb[88].mxu1 %v3349_v44 }
 0x5eb   :  { %3578 = vmatprep.mubr.f32.mxu1 %v6093_v36  ;;  %v2188_v36 = vsel %vm2020_vm5, %v8331_v39, %v1991_v17 }
 0x5ee   :  { %3579 = vmatmul.mubr.f32.gmra.mrb[90].mxu1 %v3350_v51 }
 0x5ef   :  { %3583 = vmatprep.mubr.f32.mxu1 %v8581_v47 }
 0x5f1   :  { %2943 = vrot.lane.b32.xlu1 %v8587_v30, %s6318_s13 }
 0x5f7   :  { %v8626_v53 = vpop.xlane.xlu1 %2324 }
 0x5fb   :  { %v2940_v20 = vpop.permute.xlu1 %2939 }
 0x600   :  { %2129 = vmax.xlane.f32.xlu0 %v2051_v42 }
 0x604   :  { %2523 = vmax.xlane.f32.xlu0 %v2445_v9 }
 0x608   :  { %1934 = vmax.xlane.f32.xlu0 %v1855_v16  ;;  %v1992_v16 = vsel %vm1823_vm2, %v8299_v49, 0.0 }
 0x609   :  { %v2189_v39 = vsel %vm2020_vm5, %v8404_v45, %v1992_v16 }
 0x60a   :  { %v2386_v49 = vsel %vm2217_vm3, %v8317_v60, %v2189_v39 }
 0x60c   :  { %2131 = vmax.xlane.f32.xlu0 %v2052_v25  ;;  %v2385_v25 = vsel %vm2217_vm3, %v8290_v5, %v2188_v36  ;;  %v2583_v36 = vsel %vm2414_vm6, %v8409_v35, %v2386_v49 }
 0x60d   :  { %v2582_v23 = vsel %vm2414_vm6, %v8346_v15, %v2385_v25  ;;  %v2631_v16 = vsub.f32 %v8147_v48, %v2583_v36 }
 0x60e   :  { %v2630_v17 = vsub.f32 %v8094_v14, %v2582_v23 }
 0x60f   :  { %v2703_v60 = vmul.f32 1.442695, %v2631_v16 }
 0x610   :  { %v2701_v45 = vmul.f32 1.442695, %v2630_v17 }
 0x612   :  { %6096 = vpow2.f32 %v2701_v45 }
 0x613   :  { %6098 = vpow2.f32 %v2703_v60  ;;  %v10401_v60 = vld [vmem:[#allocation45_spill] sm:$0xff] }
 0x615   :  { %1936 = vmax.xlane.f32.xlu1 %v1856_v37 }
 0x617   :  { %v8628_v21 = vpop.xlane.xlu0 %2125 }
 0x619   :  { %2330 = vmax.xlane.f32.xlu1 %v2250_v7 }
 0x61b   :  { %v8633_v40 = vpop.xlane.xlu0 %2519 }
 0x61f   :  { %v8645_v42 = vpop.xlane.xlu0 %1930 }
 0x622   :  { %2799 = vrot.lane.b32.xlu0 %v8587_v30, %s6317_s2 }
 0x623   :  { %v8667_v5 = vpop.xlane.xlu0 %2127 }
 0x62a   :  { %2801 = vrot.lane.b32.xlu1 %v8618_v18, %s6317_s2 }
 0x62c   :  { %v8635_v44 = vpop.xlane.xlu1 %1932 }
 0x62e   :  { %2945 = vrot.lane.b32.xlu1 %v8618_v18, %s6318_s13 }
 0x630   :  { %v8653_v37 = vpop.xlane.xlu1 %2326 }
 0x632   :  { %3089 = vrot.lane.b32.xlu1 %v8618_v18, %s6319_s14 }
 0x634   :  { %v2798_v15 = vpop.permute.xlu1 %2797 }
 0x635   :  { %v3206_v48 = vsel %vm101_vm0, %v2798_v15, %v8506_v63  ;;  %v8699_v63 = vld [vmem:[%s10238_s0 + $0xd0] sm:$0xff] }
 0x638   :  { %v2942_v23 = vpop.permute.xlu1 %2941 }
 0x639   :  { %v3255_v49 = vsel %vm3231_vm1, %v3206_v48, %v2942_v23  ;;  %v8717_v23 = vadd.f32 %v10401_v60, %v6986_v0  ;;  %v1994_v60 = vsel %vm1823_vm2, %v8411_v2, 0.0 }
 0x63b   :  { %v2252_v48 = vsel %vm2217_vm3, %v8717_v23, -1e+30 }
 0x63c   :  { %v3086_v36 = vpop.permute.xlu1 %3085 }
 0x641   :  { %2525 = vmax.xlane.f32.xlu0 %v2446_v12 }
 0x647   :  { %v8643_v51 = vpop.f32.mrb[84].mxu1 }
 0x648   :  { %10398 = vst [vmem:[#allocation84_spill] sm:$0xff] %v8643_v51  ;;  %v3567_v9 = vpop.f32.mrb[85].mxu1  ;;  %v6097_v51 = vpop.eup %6096 }
 0x649   :  { %v10400_v9 = vld [vmem:[#allocation43_spill] sm:$0xff] }
 0x64a   :  { %v8674_v25 = vadd.f32 %v10400_v9, %v6986_v0 }
 0x64b   :  { %v8661_v7 = vpop.f32.mrb[86].mxu1 }
 0x64c   :  { %10399 = vst [vmem:[#allocation85_spill] sm:$0xff] %v8661_v7  ;;  %v3572_v12 = vpop.f32.mrb[87].mxu1  ;;  %v2251_v14 = vsel %vm2217_vm3, %v8674_v25, -1e+30  ;;  %v2054_v15 = vsel %vm2020_vm5, %v8674_v25, -1e+30 }
 0x64d   :  { %v2796_v12 = vpop.permute.xlu0 %2795 }
 0x64e   :  { %v3205_v39 = vsel %vm101_vm0, %v2796_v12, %v8475_v19  ;;  %v8693_v12 = vpop.eup %6098 }
 0x64f   :  { %v3254_v17 = vsel %vm3231_vm1, %v3205_v39, %v2940_v20  ;;  %v2447_v20 = vsel %vm2414_vm6, %v8605_v29, -1e+30  ;;  %v1858_v39 = vsel %vm1823_vm2, %v8717_v23, -1e+30 }
 0x656   :  { %2332 = vmax.xlane.f32.xlu1 %v2251_v14  ;;  %v3304_v14 = vsel %vm3280_vm4, %v3255_v49, %v3086_v36 }
 0x657   :  { %3087 = vrot.lane.b32.xlu0 %v8587_v30, %s6319_s14  ;;  %v3352_v19 = vmul.f32 %v6097_v51, %v3304_v14 }
 0x658   :  { %v8682_v35 = vpop.xlane.xlu0 %2521 }
 0x65c   :  { %v3084_v9 = vpop.permute.xlu0 %3083 }
 0x65d   :  { %v3303_v45 = vsel %vm3280_vm4, %v3254_v17, %v3084_v9  ;;  %v8730_v17 = vld [vmem:[%s10238_s0 + $0xd8] sm:$0xff] }
 0x65e   :  { %v3351_v16 = vmul.f32 %v8581_v47, %v3303_v45  ;;  %v2053_v47 = vsel %vm2020_vm5, %v8605_v29, -1e+30  ;;  %v2448_v45 = vsel %vm2414_vm6, %v8674_v25, -1e+30 }
 0x660   :  { %3584 = vmatmul.mubr.f32.gmra.mrb[92].mxu1 %v3351_v16 }
 0x661   :  { %3588 = vmatprep.mubr.f32.mxu1 %v6097_v51  ;;  %v1857_v51 = vsel %vm1823_vm2, %v8674_v25, -1e+30 }
 0x664   :  { %3589 = vmatmul.mubr.f32.gmra.mrb[94].mxu1 %v3352_v19  ;;  %v1993_v19 = vsel %vm1823_vm2, %v8421_v50, 0.0 }
 0x665   :  { %3593 = vmatprep.mubr.f32.mxu1 %v8693_v12 }
 0x667   :  { %2947 = vrot.lane.b32.xlu1 %v8699_v63, %s6318_s13 }
 0x66d   :  { %v8738_v49 = vpop.xlane.xlu1 %2328 }
 0x671   :  { %v2944_v9 = vpop.permute.xlu1 %2943 }
 0x676   :  { %2133 = vmax.xlane.f32.xlu0 %v2053_v47  ;;  %v2190_v47 = vsel %vm2020_vm5, %v8443_v24, %v1993_v19  ;;  %v2191_v24 = vsel %vm2020_vm5, %v8516_v1, %v1994_v60 }
 0x677   :  { %v2388_v2 = vsel %vm2217_vm3, %v8429_v58, %v2191_v24 }
 0x67a   :  { %2527 = vmax.xlane.f32.xlu0 %v2447_v20 }
 0x67e   :  { %1938 = vmax.xlane.f32.xlu0 %v1857_v51 }
 0x682   :  { %2135 = vmax.xlane.f32.xlu0 %v2054_v15 }
 0x68b   :  { %1940 = vmax.xlane.f32.xlu1 %v1858_v39  ;;  %v2387_v39 = vsel %vm2217_vm3, %v8402_v54, %v2190_v47  ;;  %v2585_v47 = vsel %vm2414_vm6, %v8521_v11, %v2388_v2 }
 0x68c   :  { %v2584_v50 = vsel %vm2414_vm6, %v8458_v52, %v2387_v39  ;;  %v10404_v39 = vld [vmem:[#allocation47_spill] sm:$0xff]  ;;  %v2633_v60 = vsub.f32 %v8269_v22, %v2585_v47 }
 0x68d   :  { %v8740_v36 = vpop.xlane.xlu0 %2129 }
 0x68e   :  { %v2707_v58 = vmul.f32 1.442695, %v2633_v60 }
 0x68f   :  { %2334 = vmax.xlane.f32.xlu1 %v2252_v48 }
 0x691   :  { %v8745_v16 = vpop.xlane.xlu0 %2523 }
 0x695   :  { %v8757_v51 = vpop.xlane.xlu0 %1934 }
 0x698   :  { %2803 = vrot.lane.b32.xlu0 %v8699_v63, %s6317_s2 }
 0x699   :  { %v8779_v54 = vpop.xlane.xlu0 %2131 }
 0x6a0   :  { %2805 = vrot.lane.b32.xlu1 %v8730_v17, %s6317_s2 }
 0x6a2   :  { %v8747_v14 = vpop.xlane.xlu1 %1936 }
 0x6a4   :  { %2949 = vrot.lane.b32.xlu1 %v8730_v17, %s6318_s13 }
 0x6a6   :  { %v8765_v48 = vpop.xlane.xlu1 %2330 }
 0x6a8   :  { %3093 = vrot.lane.b32.xlu1 %v8730_v17, %s6319_s14 }
 0x6aa   :  { %v2802_v52 = vpop.permute.xlu1 %2801 }
 0x6ab   :  { %v3208_v22 = vsel %vm101_vm0, %v2802_v52, %v8618_v18  ;;  %v8811_v18 = vld [vmem:[%s10238_s0 + $0xe0] sm:$0xff] }
 0x6b7   :  { %2529 = vmax.xlane.f32.xlu0 %v2448_v45 }
 0x6bd   :  { %v8755_v20 = vpop.f32.mrb[88].mxu1 }
 0x6be   :  { %10402 = vst [vmem:[#allocation43_spill] sm:$0xff] %v8755_v20  ;;  %v3577_v15 = vpop.f32.mrb[89].mxu1  ;;  %v8786_v20 = vadd.f32 %v10404_v39, %v6986_v0 }
 0x6bf   :  { %v2632_v15 = vsub.f32 %v8226_v31, %v2584_v50  ;;  %v2946_v50 = vpop.permute.xlu1 %2945 }
 0x6c0   :  { %v2253_v31 = vsel %vm2217_vm3, %v8786_v20, -1e+30  ;;  %v3257_v2 = vsel %vm3231_vm1, %v3208_v22, %v2946_v50  ;;  %v2056_v52 = vsel %vm2020_vm5, %v8786_v20, -1e+30 }
 0x6c1   :  { %v8773_v45 = vpop.f32.mrb[90].mxu1  ;;  %v2705_v1 = vmul.f32 1.442695, %v2632_v15 }
 0x6c2   :  { %10403 = vst [vmem:[#allocation45_spill] sm:$0xff] %v8773_v45  ;;  %v3582_v19 = vpop.f32.mrb[91].mxu1 }
 0x6c3   :  { %v2800_v19 = vpop.permute.xlu0 %2799  ;;  %6100 = vpow2.f32 %v2705_v1  ;;  %v3090_v47 = vpop.permute.xlu1 %3089 }
 0x6c4   :  { %v3207_v24 = vsel %vm101_vm0, %v2800_v19, %v8587_v30  ;;  %6102 = vpow2.f32 %v2707_v58  ;;  %v10405_v58 = vld [vmem:[#allocation49_spill] sm:$0xff] }
 0x6c5   :  { %v3256_v15 = vsel %vm3231_vm1, %v3207_v24, %v2944_v9  ;;  %v1859_v9 = vsel %vm1823_vm2, %v8786_v20, -1e+30  ;;  %v8829_v50 = vadd.f32 %v10405_v58, %v6986_v0  ;;  %v1996_v58 = vsel %vm1823_vm2, %v8523_v28, 0.0 }
 0x6c7   :  { %v1860_v24 = vsel %vm1823_vm2, %v8829_v50, -1e+30  ;;  %v2254_v22 = vsel %vm2217_vm3, %v8829_v50, -1e+30 }
 0x6cc   :  { %2336 = vmax.xlane.f32.xlu1 %v2253_v31  ;;  %v3306_v31 = vsel %vm3280_vm4, %v3257_v2, %v3090_v47 }
 0x6cd   :  { %3091 = vrot.lane.b32.xlu0 %v8699_v63, %s6319_s14  ;;  %v6101_v6 = vpop.eup %6100 }
 0x6ce   :  { %v8794_v11 = vpop.xlane.xlu0 %2525  ;;  %v3354_v30 = vmul.f32 %v6101_v6, %v3306_v31  ;;  %v8805_v19 = vpop.eup %6102 }
 0x6d2   :  { %v3088_v39 = vpop.permute.xlu0 %3087 }
 0x6d3   :  { %v3305_v1 = vsel %vm3280_vm4, %v3256_v15, %v3088_v39  ;;  %v8842_v15 = vld [vmem:[%s10238_s0 + $0xe8] sm:$0xff] }
 0x6d4   :  { %v3353_v60 = vmul.f32 %v8693_v12, %v3305_v1  ;;  %v2055_v12 = vsel %vm2020_vm5, %v8717_v23, -1e+30  ;;  %v2450_v1 = vsel %vm2414_vm6, %v8786_v20, -1e+30 }
 0x6d6   :  { %3594 = vmatmul.mubr.f32.gmra.mrb[96].mxu1 %v3353_v60 }
 0x6d7   :  { %3598 = vmatprep.mubr.f32.mxu1 %v6101_v6  ;;  %v2449_v6 = vsel %vm2414_vm6, %v8717_v23, -1e+30 }
 0x6da   :  { %3599 = vmatmul.mubr.f32.gmra.mrb[98].mxu1 %v3354_v30  ;;  %v1995_v30 = vsel %vm1823_vm2, %v8533_v38, 0.0 }
 0x6db   :  { %3603 = vmatprep.mubr.f32.mxu1 %v8805_v19 }
 0x6dd   :  { %2951 = vrot.lane.b32.xlu1 %v8811_v18, %s6318_s13 }
 0x6e3   :  { %v8850_v2 = vpop.xlane.xlu1 %2332 }
 0x6e7   :  { %v2948_v39 = vpop.permute.xlu1 %2947 }
 0x6ec   :  { %2137 = vmax.xlane.f32.xlu0 %v2055_v12  ;;  %v2192_v12 = vsel %vm2020_vm5, %v8555_v27, %v1995_v30  ;;  %v2193_v27 = vsel %vm2020_vm5, %v8628_v21, %v1996_v58 }
 0x6ed   :  { %v2390_v28 = vsel %vm2217_vm3, %v8541_v46, %v2193_v27 }
 0x6f0   :  { %2531 = vmax.xlane.f32.xlu0 %v2449_v6 }
 0x6f4   :  { %1942 = vmax.xlane.f32.xlu0 %v1859_v9 }
 0x6f8   :  { %2139 = vmax.xlane.f32.xlu0 %v2056_v52 }
 0x701   :  { %1944 = vmax.xlane.f32.xlu1 %v1860_v24  ;;  %v2389_v24 = vsel %vm2217_vm3, %v8514_v43, %v2192_v12  ;;  %v2587_v12 = vsel %vm2414_vm6, %v8633_v40, %v2390_v28 }
 0x702   :  { %v2586_v38 = vsel %vm2414_vm6, %v8570_v59, %v2389_v24  ;;  %v10408_v24 = vld [vmem:[#allocation51_spill] sm:$0xff]  ;;  %v2635_v58 = vsub.f32 %v8381_v33, %v2587_v12 }
 0x703   :  { %v8852_v47 = vpop.xlane.xlu0 %2133 }
 0x704   :  { %v2711_v46 = vmul.f32 1.442695, %v2635_v58 }
 0x705   :  { %2338 = vmax.xlane.f32.xlu1 %v2254_v22 }
 0x707   :  { %v8857_v60 = vpop.xlane.xlu0 %2527 }
 0x70b   :  { %v8869_v9 = vpop.xlane.xlu0 %1938 }
 0x70e   :  { %2807 = vrot.lane.b32.xlu0 %v8811_v18, %s6317_s2 }
 0x70f   :  { %v8891_v43 = vpop.xlane.xlu0 %2135 }
 0x716   :  { %2809 = vrot.lane.b32.xlu1 %v8842_v15, %s6317_s2 }
 0x718   :  { %v8859_v31 = vpop.xlane.xlu1 %1940 }
 0x71a   :  { %2953 = vrot.lane.b32.xlu1 %v8842_v15, %s6318_s13 }
 0x71c   :  { %v8877_v22 = vpop.xlane.xlu1 %2334 }
 0x71e   :  { %3097 = vrot.lane.b32.xlu1 %v8842_v15, %s6319_s14 }
 0x720   :  { %v2806_v59 = vpop.permute.xlu1 %2805 }
 0x721   :  { %v3210_v33 = vsel %vm101_vm0, %v2806_v59, %v8730_v17  ;;  %v8923_v17 = vld [vmem:[%s10238_s0 + $0xf0] sm:$0xff] }
 0x72d   :  { %2533 = vmax.xlane.f32.xlu0 %v2450_v1 }
 0x733   :  { %v8867_v6 = vpop.f32.mrb[92].mxu1 }
 0x734   :  { %10406 = vst [vmem:[#allocation47_spill] sm:$0xff] %v8867_v6  ;;  %v3587_v52 = vpop.f32.mrb[93].mxu1  ;;  %v8898_v6 = vadd.f32 %v10408_v24, %v6986_v0 }
 0x735   :  { %v2634_v52 = vsub.f32 %v8338_v26, %v2586_v38  ;;  %v2950_v38 = vpop.permute.xlu1 %2949 }
 0x736   :  { %v2255_v26 = vsel %vm2217_vm3, %v8898_v6, -1e+30  ;;  %v3259_v28 = vsel %vm3231_vm1, %v3210_v33, %v2950_v38  ;;  %v2058_v59 = vsel %vm2020_vm5, %v8898_v6, -1e+30 }
 0x737   :  { %v8885_v1 = vpop.f32.mrb[94].mxu1  ;;  %v2709_v21 = vmul.f32 1.442695, %v2634_v52 }
 0x738   :  { %10407 = vst [vmem:[#allocation49_spill] sm:$0xff] %v8885_v1  ;;  %v3592_v30 = vpop.f32.mrb[95].mxu1 }
 0x739   :  { %v2804_v30 = vpop.permute.xlu0 %2803  ;;  %6104 = vpow2.f32 %v2709_v21  ;;  %v3094_v12 = vpop.permute.xlu1 %3093 }
 0x73a   :  { %v3209_v27 = vsel %vm101_vm0, %v2804_v30, %v8699_v63  ;;  %6106 = vpow2.f32 %v2711_v46  ;;  %v10409_v46 = vld [vmem:[#allocation53_spill] sm:$0xff] }
 0x73b   :  { %v3258_v52 = vsel %vm3231_vm1, %v3209_v27, %v2948_v39  ;;  %v1861_v39 = vsel %vm1823_vm2, %v8898_v6, -1e+30  ;;  %v8941_v38 = vadd.f32 %v10409_v46, %v6986_v0  ;;  %v1998_v46 = vsel %vm1823_vm2, %v8635_v44, 0.0 }
 0x73d   :  { %v1862_v27 = vsel %vm1823_vm2, %v8941_v38, -1e+30  ;;  %v2256_v33 = vsel %vm2217_vm3, %v8941_v38, -1e+30 }
 0x742   :  { %2340 = vmax.xlane.f32.xlu1 %v2255_v26  ;;  %v3308_v26 = vsel %vm3280_vm4, %v3259_v28, %v3094_v12 }
 0x743   :  { %3095 = vrot.lane.b32.xlu0 %v8811_v18, %s6319_s14  ;;  %v6105_v34 = vpop.eup %6104 }
 0x744   :  { %v8906_v40 = vpop.xlane.xlu0 %2529  ;;  %v3356_v63 = vmul.f32 %v6105_v34, %v3308_v26  ;;  %v8917_v30 = vpop.eup %6106 }
 0x748   :  { %v3092_v24 = vpop.permute.xlu0 %3091 }
 0x749   :  { %v3307_v21 = vsel %vm3280_vm4, %v3258_v52, %v3092_v24  ;;  %v8954_v52 = vld [vmem:[%s10238_s0 + $0xf8] sm:$0xff] }
 0x74a   :  { %v3355_v58 = vmul.f32 %v8805_v19, %v3307_v21  ;;  %v2057_v19 = vsel %vm2020_vm5, %v8829_v50, -1e+30  ;;  %v2452_v21 = vsel %vm2414_vm6, %v8898_v6, -1e+30 }
 0x74c   :  { %3604 = vmatmul.mubr.f32.gmra.mrb[100].mxu1 %v3355_v58 }
 0x74d   :  { %3608 = vmatprep.mubr.f32.mxu1 %v6105_v34  ;;  %v2451_v34 = vsel %vm2414_vm6, %v8829_v50, -1e+30 }
 0x750   :  { %3609 = vmatmul.mubr.f32.gmra.mrb[102].mxu1 %v3356_v63  ;;  %v1997_v63 = vsel %vm1823_vm2, %v8645_v42, 0.0 }
 0x751   :  { %3613 = vmatprep.mubr.f32.mxu1 %v8917_v30 }
 0x753   :  { %2955 = vrot.lane.b32.xlu1 %v8923_v17, %s6318_s13 }
 0x759   :  { %v8962_v28 = vpop.xlane.xlu1 %2336 }
 0x75d   :  { %v2952_v24 = vpop.permute.xlu1 %2951 }
 0x762   :  { %2141 = vmax.xlane.f32.xlu0 %v2057_v19  ;;  %v2194_v19 = vsel %vm2020_vm5, %v8667_v5, %v1997_v63  ;;  %v2195_v5 = vsel %vm2020_vm5, %v8740_v36, %v1998_v46 }
 0x763   :  { %v2392_v44 = vsel %vm2217_vm3, %v8653_v37, %v2195_v5 }
 0x766   :  { %2535 = vmax.xlane.f32.xlu0 %v2451_v34 }
 0x76a   :  { %1946 = vmax.xlane.f32.xlu0 %v1861_v39 }
 0x76e   :  { %2143 = vmax.xlane.f32.xlu0 %v2058_v59 }
 0x777   :  { %1948 = vmax.xlane.f32.xlu1 %v1862_v27  ;;  %v2391_v27 = vsel %vm2217_vm3, %v8626_v53, %v2194_v19  ;;  %v2589_v19 = vsel %vm2414_vm6, %v8745_v16, %v2392_v44 }
 0x778   :  { %v2588_v42 = vsel %vm2414_vm6, %v8682_v35, %v2391_v27  ;;  %v10412_v27 = vld [vmem:[#allocation55_spill] sm:$0xff]  ;;  %v2637_v46 = vsub.f32 %v8493_v55, %v2589_v19 }
 0x779   :  { %v8964_v12 = vpop.xlane.xlu0 %2137 }
 0x77a   :  { %v2715_v37 = vmul.f32 1.442695, %v2637_v46 }
 0x77b   :  { %2342 = vmax.xlane.f32.xlu1 %v2256_v33 }
 0x77d   :  { %v8969_v58 = vpop.xlane.xlu0 %2531 }
 0x781   :  { %v8981_v39 = vpop.xlane.xlu0 %1942 }
 0x784   :  { %2811 = vrot.lane.b32.xlu0 %v8923_v17, %s6317_s2 }
 0x785   :  { %v9003_v53 = vpop.xlane.xlu0 %2139 }
 0x78c   :  { %2813 = vrot.lane.b32.xlu1 %v8954_v52, %s6317_s2 }
 0x78e   :  { %v8971_v26 = vpop.xlane.xlu1 %1944 }
 0x790   :  { %2957 = vrot.lane.b32.xlu1 %v8954_v52, %s6318_s13 }
 0x792   :  { %v8989_v33 = vpop.xlane.xlu1 %2338 }
 0x794   :  { %3101 = vrot.lane.b32.xlu1 %v8954_v52, %s6319_s14 }
 0x796   :  { %v2810_v35 = vpop.permute.xlu1 %2809 }
 0x797   :  { %v3212_v55 = vsel %vm101_vm0, %v2810_v35, %v8842_v15  ;;  %v9035_v15 = vld [vmem:[%s10238_s0 + $0x100] sm:$0xff] }
 0x7a3   :  { %2537 = vmax.xlane.f32.xlu0 %v2452_v21 }
 0x7a9   :  { %v8979_v34 = vpop.f32.mrb[96].mxu1 }
 0x7aa   :  { %10410 = vst [vmem:[#allocation51_spill] sm:$0xff] %v8979_v34  ;;  %v3597_v59 = vpop.f32.mrb[97].mxu1  ;;  %v9010_v34 = vadd.f32 %v10412_v27, %v6986_v0 }
 0x7ab   :  { %v2636_v59 = vsub.f32 %v8450_v32, %v2588_v42  ;;  %v2954_v42 = vpop.permute.xlu1 %2953 }
 0x7ac   :  { %v2257_v32 = vsel %vm2217_vm3, %v9010_v34, -1e+30  ;;  %v3261_v44 = vsel %vm3231_vm1, %v3212_v55, %v2954_v42  ;;  %v2060_v35 = vsel %vm2020_vm5, %v9010_v34, -1e+30 }
 0x7ad   :  { %v8997_v21 = vpop.f32.mrb[98].mxu1  ;;  %v2713_v36 = vmul.f32 1.442695, %v2636_v59 }
 0x7ae   :  { %10411 = vst [vmem:[#allocation53_spill] sm:$0xff] %v8997_v21  ;;  %v3602_v63 = vpop.f32.mrb[99].mxu1 }
 0x7af   :  { %v2808_v63 = vpop.permute.xlu0 %2807  ;;  %6108 = vpow2.f32 %v2713_v36  ;;  %v3098_v19 = vpop.permute.xlu1 %3097 }
 0x7b0   :  { %v3211_v5 = vsel %vm101_vm0, %v2808_v63, %v8811_v18  ;;  %6110 = vpow2.f32 %v2715_v37  ;;  %v10413_v37 = vld [vmem:[#allocation57_spill] sm:$0xff] }
 0x7b1   :  { %v3260_v59 = vsel %vm3231_vm1, %v3211_v5, %v2952_v24  ;;  %v1863_v24 = vsel %vm1823_vm2, %v9010_v34, -1e+30  ;;  %v9053_v42 = vadd.f32 %v10413_v37, %v6986_v0  ;;  %v2000_v37 = vsel %vm1823_vm2, %v8747_v14, 0.0 }
 0x7b3   :  { %v1864_v5 = vsel %vm1823_vm2, %v9053_v42, -1e+30  ;;  %v2258_v55 = vsel %vm2217_vm3, %v9053_v42, -1e+30 }
 0x7b8   :  { %2344 = vmax.xlane.f32.xlu1 %v2257_v32  ;;  %v3310_v32 = vsel %vm3280_vm4, %v3261_v44, %v3098_v19 }
 0x7b9   :  { %3099 = vrot.lane.b32.xlu0 %v8923_v17, %s6319_s14  ;;  %v6109_v62 = vpop.eup %6108 }
 0x7ba   :  { %v9018_v16 = vpop.xlane.xlu0 %2533  ;;  %v3358_v18 = vmul.f32 %v6109_v62, %v3310_v32  ;;  %v9029_v63 = vpop.eup %6110 }
 0x7be   :  { %v3096_v27 = vpop.permute.xlu0 %3095 }
 0x7bf   :  { %v3309_v36 = vsel %vm3280_vm4, %v3260_v59, %v3096_v27  ;;  %v9066_v59 = vld [vmem:[%s10238_s0 + $0x108] sm:$0xff] }
 0x7c0   :  { %v3357_v46 = vmul.f32 %v8917_v30, %v3309_v36  ;;  %v2059_v30 = vsel %vm2020_vm5, %v8941_v38, -1e+30  ;;  %v2454_v36 = vsel %vm2414_vm6, %v9010_v34, -1e+30 }
 0x7c2   :  { %3614 = vmatmul.mubr.f32.gmra.mrb[104].mxu1 %v3357_v46 }
 0x7c3   :  { %3618 = vmatprep.mubr.f32.mxu1 %v6109_v62  ;;  %v2453_v62 = vsel %vm2414_vm6, %v8941_v38, -1e+30 }
 0x7c6   :  { %3619 = vmatmul.mubr.f32.gmra.mrb[106].mxu1 %v3358_v18  ;;  %v1999_v18 = vsel %vm1823_vm2, %v8757_v51, 0.0 }
 0x7c7   :  { %3623 = vmatprep.mubr.f32.mxu1 %v9029_v63 }
 0x7c9   :  { %2959 = vrot.lane.b32.xlu1 %v9035_v15, %s6318_s13 }
 0x7cf   :  { %v9074_v44 = vpop.xlane.xlu1 %2340 }
 0x7d3   :  { %v2956_v27 = vpop.permute.xlu1 %2955 }
 0x7d8   :  { %2145 = vmax.xlane.f32.xlu0 %v2059_v30  ;;  %v2196_v30 = vsel %vm2020_vm5, %v8779_v54, %v1999_v18  ;;  %v2197_v54 = vsel %vm2020_vm5, %v8852_v47, %v2000_v37 }
 0x7d9   :  { %v2394_v14 = vsel %vm2217_vm3, %v8765_v48, %v2197_v54 }
 0x7dc   :  { %2539 = vmax.xlane.f32.xlu0 %v2453_v62 }
 0x7e0   :  { %1950 = vmax.xlane.f32.xlu0 %v1863_v24 }
 0x7e4   :  { %2147 = vmax.xlane.f32.xlu0 %v2060_v35 }
 0x7ed   :  { %1952 = vmax.xlane.f32.xlu1 %v1864_v5  ;;  %v2393_v5 = vsel %vm2217_vm3, %v8738_v49, %v2196_v30  ;;  %v2591_v30 = vsel %vm2414_vm6, %v8857_v60, %v2394_v14 }
 0x7ee   :  { %v2590_v51 = vsel %vm2414_vm6, %v8794_v11, %v2393_v5  ;;  %v10416_v5 = vld [vmem:[#allocation59_spill] sm:$0xff]  ;;  %v2639_v37 = vsub.f32 %v8605_v29, %v2591_v30 }
 0x7ef   :  { %v9076_v19 = vpop.xlane.xlu0 %2141 }
 0x7f0   :  { %v2719_v48 = vmul.f32 1.442695, %v2639_v37 }
 0x7f1   :  { %2346 = vmax.xlane.f32.xlu1 %v2258_v55 }
 0x7f3   :  { %v9081_v46 = vpop.xlane.xlu0 %2535 }
 0x7f7   :  { %v9093_v24 = vpop.xlane.xlu0 %1946 }
 0x7fa   :  { %2815 = vrot.lane.b32.xlu0 %v9035_v15, %s6317_s2 }
 0x7fb   :  { %v9115_v49 = vpop.xlane.xlu0 %2143 }
 0x802   :  { %2817 = vrot.lane.b32.xlu1 %v9066_v59, %s6317_s2 }
 0x804   :  { %v9083_v32 = vpop.xlane.xlu1 %1948 }
 0x806   :  { %2961 = vrot.lane.b32.xlu1 %v9066_v59, %s6318_s13 }
 0x808   :  { %v9101_v55 = vpop.xlane.xlu1 %2342 }
 0x80a   :  { %3105 = vrot.lane.b32.xlu1 %v9066_v59, %s6319_s14 }
 0x80c   :  { %v2814_v11 = vpop.permute.xlu1 %2813 }
 0x80d   :  { %v3214_v29 = vsel %vm101_vm0, %v2814_v11, %v8954_v52  ;;  %v9147_v52 = vld [vmem:[%s10238_s0 + $0x110] sm:$0xff] }
 0x819   :  { %2541 = vmax.xlane.f32.xlu0 %v2454_v36 }
 0x81f   :  { %v9091_v62 = vpop.f32.mrb[100].mxu1 }
 0x820   :  { %10414 = vst [vmem:[#allocation55_spill] sm:$0xff] %v9091_v62  ;;  %v3607_v35 = vpop.f32.mrb[101].mxu1  ;;  %v9122_v62 = vadd.f32 %v10416_v5, %v6986_v0 }
 0x821   :  { %v2638_v35 = vsub.f32 %v8562_v8, %v2590_v51  ;;  %v2958_v51 = vpop.permute.xlu1 %2957 }
 0x822   :  { %10417 = vst [vmem:[#allocation59_spill] sm:$0xff] %v9122_v62  ;;  %v2259_v8 = vsel %vm2217_vm3, %v9122_v62, -1e+30  ;;  %v3263_v14 = vsel %vm3231_vm1, %v3214_v29, %v2958_v51  ;;  %v2062_v11 = vsel %vm2020_vm5, %v9122_v62, -1e+30 }
 0x823   :  { %v9109_v36 = vpop.f32.mrb[102].mxu1  ;;  %v2717_v47 = vmul.f32 1.442695, %v2638_v35 }
 0x824   :  { %10415 = vst [vmem:[#allocation57_spill] sm:$0xff] %v9109_v36  ;;  %v3612_v18 = vpop.f32.mrb[103].mxu1 }
 0x825   :  { %v2812_v18 = vpop.permute.xlu0 %2811  ;;  %6112 = vpow2.f32 %v2717_v47  ;;  %v3102_v30 = vpop.permute.xlu1 %3101 }
 0x826   :  { %v3213_v54 = vsel %vm101_vm0, %v2812_v18, %v8923_v17  ;;  %6114 = vpow2.f32 %v2719_v48  ;;  %v10418_v48 = vld [vmem:[#allocation61_spill] sm:$0xff] }
 0x827   :  { %v3262_v35 = vsel %vm3231_vm1, %v3213_v54, %v2956_v27  ;;  %v2455_v27 = vsel %vm2414_vm6, %v9053_v42, -1e+30  ;;  %v9165_v51 = vadd.f32 %v10418_v48, %v6986_v0  ;;  %v2002_v48 = vsel %vm1823_vm2, %v8859_v31, 0.0 }
 0x829   :  { %10419 = vst [vmem:[#allocation61_spill] sm:$0xff] %v9165_v51  ;;  %v1866_v54 = vsel %vm1823_vm2, %v9165_v51, -1e+30  ;;  %v2260_v29 = vsel %vm2217_vm3, %v9165_v51, -1e+30 }
 0x82e   :  { %2348 = vmax.xlane.f32.xlu1 %v2259_v8  ;;  %v3312_v8 = vsel %vm3280_vm4, %v3263_v14, %v3102_v30 }
 0x82f   :  { %3103 = vrot.lane.b32.xlu0 %v9035_v15, %s6319_s14  ;;  %v6113_v36 = vpop.eup %6112 }
 0x830   :  { %v9130_v60 = vpop.xlane.xlu0 %2537  ;;  %v3360_v17 = vmul.f32 %v6113_v36, %v3312_v8  ;;  %v9141_v18 = vpop.eup %6114 }
 0x834   :  { %v3100_v5 = vpop.permute.xlu0 %3099 }
 0x835   :  { %v3311_v47 = vsel %vm3280_vm4, %v3262_v35, %v3100_v5  ;;  %v9178_v35 = vld [vmem:[%s10238_s0 + $0x118] sm:$0xff] }
 0x836   :  { %v3359_v37 = vmul.f32 %v9029_v63, %v3311_v47  ;;  %v2061_v63 = vsel %vm2020_vm5, %v9053_v42, -1e+30  ;;  %v2456_v47 = vsel %vm2414_vm6, %v9122_v62, -1e+30 }
 0x838   :  { %3624 = vmatmul.mubr.f32.gmra.mrb[108].mxu1 %v3359_v37 }
 0x839   :  { %3628 = vmatprep.mubr.f32.mxu1 %v6113_v36  ;;  %v1865_v36 = vsel %vm1823_vm2, %v9122_v62, -1e+30 }
 0x83c   :  { %3629 = vmatmul.mubr.f32.gmra.mrb[110].mxu1 %v3360_v17  ;;  %v2001_v17 = vsel %vm1823_vm2, %v8869_v9, 0.0 }
 0x83d   :  { %3633 = vmatprep.mubr.f32.mxu1 %v9141_v18 }
 0x83f   :  { %2963 = vrot.lane.b32.xlu1 %v9147_v52, %s6318_s13 }
 0x845   :  { %v9186_v14 = vpop.xlane.xlu1 %2344 }
 0x849   :  { %v2960_v5 = vpop.permute.xlu1 %2959 }
 0x84e   :  { %2149 = vmax.xlane.f32.xlu0 %v2061_v63  ;;  %v2198_v63 = vsel %vm2020_vm5, %v8891_v43, %v2001_v17  ;;  %v2199_v43 = vsel %vm2020_vm5, %v8964_v12, %v2002_v48 }
 0x84f   :  { %v2396_v31 = vsel %vm2217_vm3, %v8877_v22, %v2199_v43 }
 0x852   :  { %2543 = vmax.xlane.f32.xlu0 %v2455_v27 }
 0x856   :  { %1954 = vmax.xlane.f32.xlu0 %v1865_v36 }
 0x85a   :  { %2151 = vmax.xlane.f32.xlu0 %v2062_v11 }
 0x863   :  { %1956 = vmax.xlane.f32.xlu1 %v1866_v54  ;;  %v2395_v54 = vsel %vm2217_vm3, %v8850_v2, %v2198_v63  ;;  %v2593_v63 = vsel %vm2414_vm6, %v8969_v58, %v2396_v31 }
 0x864   :  { %v2592_v9 = vsel %vm2414_vm6, %v8906_v40, %v2395_v54  ;;  %v10422_v54 = vld [vmem:[#allocation63_spill] sm:$0xff]  ;;  %v2641_v48 = vsub.f32 %v8717_v23, %v2593_v63 }
 0x865   :  { %v9188_v30 = vpop.xlane.xlu0 %2145 }
 0x866   :  { %v2723_v22 = vmul.f32 1.442695, %v2641_v48 }
 0x867   :  { %2350 = vmax.xlane.f32.xlu1 %v2260_v29 }
 0x869   :  { %v9193_v37 = vpop.xlane.xlu0 %2539 }
 0x86d   :  { %v9205_v36 = vpop.xlane.xlu0 %1950 }
 0x870   :  { %2819 = vrot.lane.b32.xlu0 %v9147_v52, %s6317_s2 }
 0x871   :  { %v9227_v2 = vpop.xlane.xlu0 %2147 }
 0x878   :  { %2821 = vrot.lane.b32.xlu1 %v9178_v35, %s6317_s2 }
 0x87a   :  { %v9195_v8 = vpop.xlane.xlu1 %1952 }
 0x87c   :  { %2965 = vrot.lane.b32.xlu1 %v9178_v35, %s6318_s13 }
 0x87e   :  { %v9213_v29 = vpop.xlane.xlu1 %2346 }
 0x880   :  { %3109 = vrot.lane.b32.xlu1 %v9178_v35, %s6319_s14 }
 0x882   :  { %v2818_v40 = vpop.permute.xlu1 %2817 }
 0x883   :  { %v3216_v23 = vsel %vm101_vm0, %v2818_v40, %v9066_v59  ;;  %v9259_v59 = vld [vmem:[%s10238_s0 + $0x120] sm:$0xff] }
 0x88f   :  { %2545 = vmax.xlane.f32.xlu0 %v2456_v47 }
 0x895   :  { %v9203_v27 = vpop.f32.mrb[104].mxu1 }
 0x896   :  { %10420 = vst [vmem:[#allocation86_spill] sm:$0xff] %v9203_v27  ;;  %v3617_v11 = vpop.f32.mrb[105].mxu1  ;;  %v9234_v27 = vadd.f32 %v10422_v54, %v6986_v0 }
 0x897   :  { %v2640_v11 = vsub.f32 %v8674_v25, %v2592_v9  ;;  %v2962_v9 = vpop.permute.xlu1 %2961 }
 0x898   :  { %10423 = vst [vmem:[#allocation63_spill] sm:$0xff] %v9234_v27  ;;  %v2261_v25 = vsel %vm2217_vm3, %v9234_v27, -1e+30  ;;  %v3265_v31 = vsel %vm3231_vm1, %v3216_v23, %v2962_v9  ;;  %v2064_v40 = vsel %vm2020_vm5, %v9234_v27, -1e+30 }
 0x899   :  { %v9221_v47 = vpop.f32.mrb[106].mxu1  ;;  %v2721_v12 = vmul.f32 1.442695, %v2640_v11 }
 0x89a   :  { %10421 = vst [vmem:[#allocation87_spill] sm:$0xff] %v9221_v47  ;;  %v3622_v17 = vpop.f32.mrb[107].mxu1 }
 0x89b   :  { %v2816_v17 = vpop.permute.xlu0 %2815  ;;  %6116 = vpow2.f32 %v2721_v12  ;;  %v3106_v63 = vpop.permute.xlu1 %3105 }
 0x89c   :  { %v3215_v43 = vsel %vm101_vm0, %v2816_v17, %v9035_v15  ;;  %6118 = vpow2.f32 %v2723_v22  ;;  %v10424_v22 = vld [vmem:[#allocation65_spill] sm:$0xff] }
 0x89d   :  { %v3264_v11 = vsel %vm3231_vm1, %v3215_v43, %v2960_v5  ;;  %v1867_v5 = vsel %vm1823_vm2, %v9234_v27, -1e+30  ;;  %v9277_v9 = vadd.f32 %v10424_v22, %v6986_v0  ;;  %v2004_v22 = vsel %vm1823_vm2, %v8971_v26, 0.0 }
 0x89f   :  { %v1868_v43 = vsel %vm1823_vm2, %v9277_v9, -1e+30  ;;  %v2262_v23 = vsel %vm2217_vm3, %v9277_v9, -1e+30 }
 0x8a4   :  { %2352 = vmax.xlane.f32.xlu1 %v2261_v25  ;;  %v3314_v25 = vsel %vm3280_vm4, %v3265_v31, %v3106_v63 }
 0x8a5   :  { %3107 = vrot.lane.b32.xlu0 %v9147_v52, %s6319_s14  ;;  %v6117_v62 = vpop.eup %6116 }
 0x8a6   :  { %v9242_v58 = vpop.xlane.xlu0 %2541  ;;  %v3362_v15 = vmul.f32 %v6117_v62, %v3314_v25  ;;  %v9253_v17 = vpop.eup %6118 }
 0x8aa   :  { %v3104_v54 = vpop.permute.xlu0 %3103 }
 0x8ab   :  { %v3313_v12 = vsel %vm3280_vm4, %v3264_v11, %v3104_v54  ;;  %v9290_v11 = vld [vmem:[%s10238_s0 + $0x128] sm:$0xff] }
 0x8ac   :  { %v3361_v48 = vmul.f32 %v9141_v18, %v3313_v12  ;;  %v2063_v18 = vsel %vm2020_vm5, %v9165_v51, -1e+30  ;;  %v2458_v12 = vsel %vm2414_vm6, %v9234_v27, -1e+30 }
 0x8ae   :  { %3634 = vmatmul.mubr.f32.gmra.mrb[112].mxu1 %v3361_v48 }
 0x8af   :  { %3638 = vmatprep.mubr.f32.mxu1 %v6117_v62  ;;  %v2457_v62 = vsel %vm2414_vm6, %v9165_v51, -1e+30 }
 0x8b2   :  { %3639 = vmatmul.mubr.f32.gmra.mrb[114].mxu1 %v3362_v15  ;;  %v2003_v15 = vsel %vm1823_vm2, %v8981_v39, 0.0 }
 0x8b3   :  { %3643 = vmatprep.mubr.f32.mxu1 %v9253_v17 }
 0x8b5   :  { %2967 = vrot.lane.b32.xlu1 %v9259_v59, %s6318_s13 }
 0x8bb   :  { %v9298_v31 = vpop.xlane.xlu1 %2348 }
 0x8bf   :  { %v2964_v54 = vpop.permute.xlu1 %2963 }
 0x8c4   :  { %2153 = vmax.xlane.f32.xlu0 %v2063_v18  ;;  %v2200_v18 = vsel %vm2020_vm5, %v9003_v53, %v2003_v15  ;;  %v2201_v53 = vsel %vm2020_vm5, %v9076_v19, %v2004_v22 }
 0x8c5   :  { %v2398_v26 = vsel %vm2217_vm3, %v8989_v33, %v2201_v53 }
 0x8c8   :  { %2547 = vmax.xlane.f32.xlu0 %v2457_v62 }
 0x8cc   :  { %1958 = vmax.xlane.f32.xlu0 %v1867_v5 }
 0x8d0   :  { %2155 = vmax.xlane.f32.xlu0 %v2064_v40 }
 0x8d9   :  { %1960 = vmax.xlane.f32.xlu1 %v1868_v43  ;;  %v2397_v43 = vsel %vm2217_vm3, %v8962_v28, %v2200_v18  ;;  %v2595_v18 = vsel %vm2414_vm6, %v9081_v46, %v2398_v26 }
 0x8da   :  { %v2594_v39 = vsel %vm2414_vm6, %v9018_v16, %v2397_v43  ;;  %v10427_v43 = vld [vmem:[#allocation67_spill] sm:$0xff]  ;;  %v2643_v22 = vsub.f32 %v8829_v50, %v2595_v18 }
 0x8db   :  { %v9300_v63 = vpop.xlane.xlu0 %2149  ;;  %v9346_v27 = vadd.f32 %v10427_v43, %v6986_v0 }
 0x8dc   :  { %v2727_v33 = vmul.f32 1.442695, %v2643_v22 }
 0x8dd   :  { %2354 = vmax.xlane.f32.xlu1 %v2262_v23  ;;  %10428 = vst [vmem:[#allocation67_spill] sm:$0xff] %v9346_v27 }
 0x8df   :  { %v9305_v48 = vpop.xlane.xlu0 %2543 }
 0x8e3   :  { %v9317_v5 = vpop.xlane.xlu0 %1954 }
 0x8e6   :  { %2823 = vrot.lane.b32.xlu0 %v9259_v59, %s6317_s2 }
 0x8e7   :  { %v9339_v28 = vpop.xlane.xlu0 %2151 }
 0x8ee   :  { %2825 = vrot.lane.b32.xlu1 %v9290_v11, %s6317_s2 }
 0x8f0   :  { %v9307_v25 = vpop.xlane.xlu1 %1956 }
 0x8f2   :  { %2969 = vrot.lane.b32.xlu1 %v9290_v11, %s6318_s13 }
 0x8f4   :  { %v9325_v23 = vpop.xlane.xlu1 %2350 }
 0x8f6   :  { %3113 = vrot.lane.b32.xlu1 %v9290_v11, %s6319_s14 }
 0x8f8   :  { %v2822_v16 = vpop.permute.xlu1 %2821 }
 0x8f9   :  { %v3218_v50 = vsel %vm101_vm0, %v2822_v16, %v9178_v35  ;;  %v9371_v35 = vld [vmem:[%s10238_s0 + $0x130] sm:$0xff]  ;;  %v2066_v16 = vsel %vm2020_vm5, %v9346_v27, -1e+30 }
 0x905   :  { %2549 = vmax.xlane.f32.xlu0 %v2458_v12 }
 0x90b   :  { %v9315_v62 = vpop.f32.mrb[108].mxu1 }
 0x90c   :  { %10425 = vst [vmem:[#allocation65_spill] sm:$0xff] %v9315_v62  ;;  %v3627_v40 = vpop.f32.mrb[109].mxu1 }
 0x90d   :  { %v2642_v40 = vsub.f32 %v8786_v20, %v2594_v39  ;;  %v2263_v20 = vsel %vm2217_vm3, %v9346_v27, -1e+30  ;;  %v2966_v39 = vpop.permute.xlu1 %2965 }
 0x90e   :  { %v3267_v26 = vsel %vm3231_vm1, %v3218_v50, %v2966_v39 }
 0x90f   :  { %v9333_v12 = vpop.f32.mrb[110].mxu1  ;;  %v2725_v19 = vmul.f32 1.442695, %v2642_v40 }
 0x910   :  { %10426 = vst [vmem:[#allocation88_spill] sm:$0xff] %v9333_v12  ;;  %v3632_v15 = vpop.f32.mrb[111].mxu1 }
 0x911   :  { %v2820_v15 = vpop.permute.xlu0 %2819  ;;  %6120 = vpow2.f32 %v2725_v19  ;;  %v3110_v18 = vpop.permute.xlu1 %3109 }
 0x912   :  { %v3217_v53 = vsel %vm101_vm0, %v2820_v15, %v9147_v52  ;;  %6122 = vpow2.f32 %v2727_v33  ;;  %v10429_v33 = vld [vmem:[#allocation69_spill] sm:$0xff] }
 0x913   :  { %v3266_v40 = vsel %vm3231_vm1, %v3217_v53, %v2964_v54  ;;  %v1869_v54 = vsel %vm1823_vm2, %v9346_v27, -1e+30  ;;  %v9389_v39 = vadd.f32 %v10429_v33, %v6986_v0  ;;  %v2006_v33 = vsel %vm1823_vm2, %v9083_v32, 0.0 }
 0x915   :  { %v1870_v53 = vsel %vm1823_vm2, %v9389_v39, -1e+30  ;;  %v2264_v50 = vsel %vm2217_vm3, %v9389_v39, -1e+30 }
 0x91a   :  { %2356 = vmax.xlane.f32.xlu1 %v2263_v20  ;;  %v3316_v20 = vsel %vm3280_vm4, %v3267_v26, %v3110_v18 }
 0x91b   :  { %3111 = vrot.lane.b32.xlu0 %v9259_v59, %s6319_s14  ;;  %v6121_v51 = vpop.eup %6120 }
 0x91c   :  { %v9354_v46 = vpop.xlane.xlu0 %2545  ;;  %v3364_v52 = vmul.f32 %v6121_v51, %v3316_v20  ;;  %v9365_v15 = vpop.eup %6122 }
 0x920   :  { %v3108_v43 = vpop.permute.xlu0 %3107 }
 0x921   :  { %v3315_v19 = vsel %vm3280_vm4, %v3266_v40, %v3108_v43  ;;  %v9402_v40 = vld [vmem:[%s10238_s0 + $0x138] sm:$0xff] }
 0x922   :  { %v3363_v22 = vmul.f32 %v9253_v17, %v3315_v19  ;;  %v2065_v17 = vsel %vm2020_vm5, %v9277_v9, -1e+30  ;;  %v2460_v19 = vsel %vm2414_vm6, %v9346_v27, -1e+30 }
 0x924   :  { %3644 = vmatmul.mubr.f32.gmra.mrb[116].mxu1 %v3363_v22 }
 0x925   :  { %3648 = vmatprep.mubr.f32.mxu1 %v6121_v51  ;;  %v2459_v51 = vsel %vm2414_vm6, %v9277_v9, -1e+30 }
 0x928   :  { %3649 = vmatmul.mubr.f32.gmra.mrb[118].mxu1 %v3364_v52  ;;  %v2005_v52 = vsel %vm1823_vm2, %v9093_v24, 0.0 }
 0x929   :  { %3653 = vmatprep.mubr.f32.mxu1 %v9365_v15 }
 0x92b   :  { %2971 = vrot.lane.b32.xlu1 %v9371_v35, %s6318_s13 }
 0x931   :  { %v2353_v26 = vpop.xlane.xlu1 %2352 }
 0x935   :  { %v2968_v43 = vpop.permute.xlu1 %2967 }
 0x93a   :  { %2157 = vmax.xlane.f32.xlu0 %v2065_v17  ;;  %v2202_v17 = vsel %vm2020_vm5, %v9115_v49, %v2005_v52  ;;  %v2203_v49 = vsel %vm2020_vm5, %v9188_v30, %v2006_v33 }
 0x93b   :  { %v2400_v32 = vsel %vm2217_vm3, %v9101_v55, %v2203_v49 }
 0x93e   :  { %2551 = vmax.xlane.f32.xlu0 %v2459_v51 }
 0x942   :  { %1962 = vmax.xlane.f32.xlu0 %v1869_v54 }
 0x946   :  { %2159 = vmax.xlane.f32.xlu0 %v2066_v16 }
 0x94f   :  { %1964 = vmax.xlane.f32.xlu1 %v1870_v53  ;;  %v2399_v53 = vsel %vm2217_vm3, %v9074_v44, %v2202_v17  ;;  %v2597_v17 = vsel %vm2414_vm6, %v9193_v37, %v2400_v32 }
 0x950   :  { %v2596_v24 = vsel %vm2414_vm6, %v9130_v60, %v2399_v53  ;;  %v10432_v60 = vld [vmem:[#allocation71_spill] sm:$0xff]  ;;  %v2645_v33 = vsub.f32 %v8941_v38, %v2597_v17 }
 0x951   :  { %v9410_v18 = vpop.xlane.xlu0 %2153  ;;  %v9452_v53 = vadd.f32 %v10432_v60, %v6986_v0 }
 0x952   :  { %v2731_v37 = vmul.f32 1.442695, %v2645_v33 }
 0x953   :  { %2358 = vmax.xlane.f32.xlu1 %v2264_v50  ;;  %v2265_v49 = vsel %vm2217_vm3, %v9452_v53, -1e+30 }
 0x955   :  { %v9415_v22 = vpop.xlane.xlu0 %2547 }
 0x959   :  { %v1959_v54 = vpop.xlane.xlu0 %1958 }
 0x95c   :  { %2827 = vrot.lane.b32.xlu0 %v9371_v35, %s6317_s2 }
 0x95d   :  { %v2156_v44 = vpop.xlane.xlu0 %2155 }
 0x964   :  { %2829 = vrot.lane.b32.xlu1 %v9402_v40, %s6317_s2 }
 0x966   :  { %v9417_v20 = vpop.xlane.xlu1 %1960 }
 0x968   :  { %2973 = vrot.lane.b32.xlu1 %v9402_v40, %s6318_s13 }
 0x96a   :  { %v9433_v50 = vpop.xlane.xlu1 %2354 }
 0x96c   :  { %3117 = vrot.lane.b32.xlu1 %v9402_v40, %s6319_s14 }
 0x96e   :  { %v2826_v27 = vpop.permute.xlu1 %2825 }
 0x97b   :  { %2553 = vmax.xlane.f32.xlu0 %v2460_v19 }
 0x981   :  { %v9425_v51 = vpop.f32.mrb[112].mxu1 }
 0x982   :  { %10430 = vst [vmem:[#allocation69_spill] sm:$0xff] %v9425_v51  ;;  %v3637_v16 = vpop.f32.mrb[113].mxu1 }
 0x983   :  { %v2644_v16 = vsub.f32 %v8898_v6, %v2596_v24  ;;  %v2011_v6 = vsel %vm1823_vm2, %v1959_v54, 0.0  ;;  %v2824_v24 = vpop.permute.xlu0 %2823 }
 0x984   :  { %v2208_v55 = vsel %vm2020_vm5, %v2156_v44, %v2011_v6  ;;  %v3219_v54 = vsel %vm101_vm0, %v2824_v24, %v9259_v59  ;;  %v2067_v24 = vsel %vm2020_vm5, %v9389_v39, -1e+30 }
 0x985   :  { %v9441_v19 = vpop.f32.mrb[114].mxu1  ;;  %v2729_v30 = vmul.f32 1.442695, %v2644_v16  ;;  %v2405_v0 = vsel %vm2217_vm3, %v2353_v26, %v2208_v55  ;;  %v3220_v16 = vsel %vm101_vm0, %v2826_v27, %v9290_v11  ;;  %v3268_v44 = vsel %vm3231_vm1, %v3219_v54, %v2968_v43  ;;  %v9485_v43 = vld [vmem:[%s10238_s0 + $0x140] sm:$0xff]  ;;  %v9506_v55 = vld [vmem:[%s10238_s0 + $0x150] sm:$0xff] }
 0x986   :  { %10431 = vst [vmem:[#allocation89_spill] sm:$0xff] %v9441_v19  ;;  %v3642_v52 = vpop.f32.mrb[115].mxu1  ;;  %v2012_v54 = vsel %vm1823_vm2, %v9417_v20, 0.0 }
 0x987   :  { %6124 = vpow2.f32 %v2729_v30  ;;  %v2970_v52 = vpop.permute.xlu1 %2969 }
 0x988   :  { %6126 = vpow2.f32 %v2731_v37  ;;  %v3269_v17 = vsel %vm3231_vm1, %v3220_v16, %v2970_v52  ;;  %v1871_v37 = vsel %vm1823_vm2, %v9452_v53, -1e+30  ;;  %v2068_v52 = vsel %vm2020_vm5, %v9452_v53, -1e+30 }
 0x98b   :  { %v3114_v60 = vpop.permute.xlu1 %3113 }
 0x98c   :  { %v3318_v59 = vsel %vm3280_vm4, %v3269_v17, %v3114_v60  ;;  %v9547_v17 = vld [vmem:[%s10238_s0 + $0x168] sm:$0xff] }
 0x990   :  { %2360 = vmax.xlane.f32.xlu1 %v2265_v49  ;;  %v2461_v49 = vsel %vm2414_vm6, %v9389_v39, -1e+30 }
 0x991   :  { %3115 = vrot.lane.b32.xlu0 %v9371_v35, %s6319_s14  ;;  %v6125_v6 = vpop.eup %6124 }
 0x992   :  { %v2550_v38 = vpop.xlane.xlu0 %2549  ;;  %v3366_v27 = vmul.f32 %v6125_v6, %v3318_v59  ;;  %v9479_v11 = vpop.eup %6126 }
 0x993   :  { %v9472_v32 = vsel %vm2414_vm6, %v2550_v38, %v2405_v0  ;;  %v9526_v0 = vld [vmem:[%s10238_s0 + $0x158] sm:$0xff]  ;;  %v9535_v38 = vld [vmem:[%s10238_s0 + $0x160] sm:$0xff] }
 0x996   :  { %v3112_v30 = vpop.permute.xlu0 %3111 }
 0x997   :  { %v3317_v26 = vsel %vm3280_vm4, %v3268_v44, %v3112_v30 }
 0x998   :  { %v3365_v33 = vmul.f32 %v9365_v15, %v3317_v26  ;;  %v9494_v15 = vld [vmem:[%s10238_s0 + $0x148] sm:$0xff] }
 0x99a   :  { %3654 = vmatmul.mubr.f32.gmra.mrb[120].mxu1 %v3365_v33  ;;  %v9563_v33 = vld [vmem:[%s10238_s0 + $0x170] sm:$0xff] }
 0x99b   :  { %3658 = vmatprep.mubr.f32.mxu1 %v6125_v6 }
 0x99e   :  { %3659 = vmatmul.mubr.f32.gmra.mrb[122].mxu1 %v3366_v27 }
 0x99f   :  { %3663 = vmatprep.mubr.f32.mxu1 %v9479_v11 }
 0x9a1   :  { %2975 = vrot.lane.b32.xlu1 %v9485_v43, %s6318_s13 }
 0x9a5   :  { %3119 = vrot.lane.b32.xlu1 %v9485_v43, %s6319_s14 }
 0x9a7   :  { %v2357_v6 = vpop.xlane.xlu1 %2356 }
 0x9a9   :  { %2977 = vrot.lane.b32.xlu1 %v9494_v15, %s6318_s13 }
 0x9ad   :  { %3121 = vrot.lane.b32.xlu1 %v9494_v15, %s6319_s14 }
 0x9b0   :  { %2161 = vmax.xlane.f32.xlu0 %v2067_v24  ;;  %v9576_v24 = vld [vmem:[%s10238_s0 + $0x178] sm:$0xff] }
 0x9b1   :  { %2835 = vrot.lane.b32.xlu1 %v9506_v55, %s6317_s2 }
 0x9b4   :  { %2555 = vmax.xlane.f32.xlu0 %v2461_v49 }
 0x9b5   :  { %2979 = vrot.lane.b32.xlu1 %v9506_v55, %s6318_s13 }
 0x9b8   :  { %1966 = vmax.xlane.f32.xlu0 %v1871_v37  ;;  %v10433_v37 = vld [vmem:[#allocation73_spill] sm:$0xff] }
 0x9b9   :  { %3123 = vrot.lane.b32.xlu1 %v9506_v55, %s6319_s14 }
 0x9bc   :  { %2163 = vmax.xlane.f32.xlu0 %v2068_v52  ;;  %v10434_v52 = vld [vmem:[#allocation75_spill] sm:$0xff] }
 0x9bd   :  { %2837 = vrot.lane.b32.xlu1 %v9526_v0, %s6317_s2 }
 0x9c1   :  { %3125 = vrot.lane.b32.xlu1 %v9526_v0, %s6319_s14 }
 0x9c5   :  { %2983 = vrot.lane.b32.xlu1 %v9535_v38, %s6318_s13 }
 0x9c7   :  { %v2158_v16 = vpop.xlane.xlu0 %2157 }
 0x9c8   :  { %v2209_v44 = vsel %vm2020_vm5, %v2158_v16, %v2012_v54  ;;  %v10435_v54 = vld [vmem:[#allocation77_spill] sm:$0xff]  ;;  %v10436_v16 = vld [vmem:[#allocation79_spill] sm:$0xff] }
 0x9c9   :  { %2841 = vrot.lane.b32.xlu1 %v9547_v17, %s6317_s2  ;;  %v2406_v60 = vsel %vm2217_vm3, %v9433_v50, %v2209_v44  ;;  %v2972_v44 = vpop.permute.xlu1 %2971 }
 0x9cb   :  { %v2552_v30 = vpop.xlane.xlu0 %2551 }
 0x9cc   :  { %v9556_v20 = vsel %vm2414_vm6, %v2552_v30, %v2406_v60  ;;  %v2462_v60 = vsel %vm2414_vm6, %v9452_v53, -1e+30  ;;  %v10437_v30 = vld [vmem:[#allocation81_spill] sm:$0xff] }
 0x9cd   :  { %3129 = vrot.lane.b32.xlu1 %v9547_v17, %s6319_s14 }
 0x9cf   :  { %v1963_v26 = vpop.xlane.xlu0 %1962 }
 0x9d0   :  { %v2013_v50 = vsel %vm1823_vm2, %v1963_v26, 0.0 }
 0x9d1   :  { %2987 = vrot.lane.b32.xlu1 %v9563_v33, %s6318_s13 }
 0x9d2   :  { %2831 = vrot.lane.b32.xlu0 %v9485_v43, %s6317_s2 }
 0x9d3   :  { %v2160_v59 = vpop.xlane.xlu0 %2159 }
 0x9d4   :  { %v2210_v27 = vsel %vm2020_vm5, %v2160_v59, %v2013_v50  ;;  %v2007_v50 = vsel %vm1823_vm2, %v9205_v36, 0.0 }
 0x9d5   :  { %2845 = vrot.lane.b32.xlu1 %v9576_v24, %s6317_s2  ;;  %v2407_v49 = vsel %vm2217_vm3, %v2357_v6, %v2210_v27  ;;  %v2204_v59 = vsel %vm2020_vm5, %v9227_v2, %v2007_v50 }
 0x9d9   :  { %3133 = vrot.lane.b32.xlu1 %v9576_v24, %s6319_s14 }
 0x9dc   :  { %v9599_v26 = vpop.xlane.xlu1 %1964 }
 0x9dd   :  { %3764 = vrot.lane.b32.xlu1 %v8118_v10, %s6322_s30 }
 0x9e1   :  { %3768 = vrot.lane.b32.xlu1 %v10433_v37, %s6322_s30 }
 0x9e5   :  { %3772 = vrot.lane.b32.xlu1 %v10434_v52, %s6322_s30 }
 0x9e9   :  { %3776 = vrot.lane.b32.xlu1 %v10435_v54, %s6322_s30 }
 0x9ed   :  { %3780 = vrot.lane.b32.xlu1 %v10436_v16, %s6322_s30 }
 0x9f1   :  { %3784 = vrot.lane.b32.xlu1 %v10437_v30, %s6322_s30  ;;  %2557 = vmax.xlane.f32.xlu0 %v2462_v60  ;;  %v2008_v60 = vsel %vm1823_vm2, %v9195_v8, 0.0  ;;  %v9619_v30 = vpop.xlane.xlu1 %2358 }
 0x9f2   :  { %v2205_v2 = vsel %vm2020_vm5, %v9300_v63, %v2008_v60  ;;  %v2828_v60 = vpop.permute.xlu0 %2827 }
 0x9f5   :  { %3788 = vrot.lane.b32.xlu1 %v8325_v41, %s6322_s30  ;;  %v2401_v41 = vsel %vm2217_vm3, %v9186_v14, %v2204_v59  ;;  %v2402_v14 = vsel %vm2217_vm3, %v9213_v29, %v2205_v2 }
 0x9f6   :  { %v2598_v36 = vsel %vm2414_vm6, %v9242_v58, %v2401_v41  ;;  %v2599_v41 = vsel %vm2414_vm6, %v9305_v48, %v2402_v14  ;;  %v2830_v58 = vpop.permute.xlu1 %2829  ;;  %v3221_v48 = vsel %vm101_vm0, %v2828_v60, %v9371_v35 }
 0x9f7   :  { %v9609_v6 = vpop.f32.mrb[116].mxu1  ;;  %v2646_v8 = vsub.f32 %v9010_v34, %v2598_v36  ;;  %v2647_v59 = vsub.f32 %v9053_v42, %v2599_v41  ;;  %v3222_v2 = vsel %vm101_vm0, %v2830_v58, %v9402_v40 }
 0x9f8   :  { %10438 = vst [vmem:[#allocation71_spill] sm:$0xff] %v9609_v6  ;;  %v3647_v27 = vpop.f32.mrb[117].mxu1 }
 0x9f9   :  { %3792 = vrot.lane.b32.xlu1 %v8437_v13, %s6322_s30  ;;  %v2733_v63 = vmul.f32 1.442695, %v2646_v8  ;;  %v2735_v34 = vmul.f32 1.442695, %v2647_v59 }
 0x9fa   :  { %v2974_v36 = vpop.permute.xlu1 %2973 }
 0x9fb   :  { %v9627_v50 = vpop.f32.mrb[118].mxu1  ;;  %6128 = vpow2.f32 %v2733_v63  ;;  %v3271_v8 = vsel %vm3231_vm1, %v3222_v2, %v2974_v36  ;;  %v10443_v2 = vld [vmem:[#allocation74_spill] sm:$0xff] }
 0x9fc   :  { %10439 = vst [vmem:[#allocation73_spill] sm:$0xff] %v9627_v50  ;;  %v3652_v27 = vpop.f32.mrb[119].mxu1  ;;  %6130 = vpow2.f32 %v2735_v34  ;;  %v10441_v34 = vld [vmem:[#allocation27_spill] sm:$0xff] }
 0x9fd   :  { %3796 = vrot.lane.b32.xlu1 %v8549_v61, %s6322_s30  ;;  %v3270_v27 = vsel %vm3231_vm1, %v3221_v48, %v2972_v44  ;;  %v10440_v44 = vld [vmem:[#allocation57_spill] sm:$0xff] }
 0x9fe   :  { %v3118_v14 = vpop.permute.xlu1 %3117 }
 0xa01   :  { %3800 = vrot.lane.b32.xlu1 %v8661_v7, %s6322_s30  ;;  %v10453_v7 = vld [vmem:[#allocation47_spill] sm:$0xff] }
 0xa05   :  { %3804 = vrot.lane.b32.xlu1 %v8773_v45, %s6322_s30  ;;  %v6129_v58 = vpop.eup %6128 }
 0xa06   :  { %v6131_v59 = vpop.eup %6130 }
 0xa07   :  { %2833 = vrot.lane.b32.xlu0 %v9494_v15, %s6317_s2 }
 0xa08   :  { %v2554_v29 = vpop.xlane.xlu0 %2553 }
 0xa09   :  { %v9651_v42 = vsel %vm2414_vm6, %v2554_v29, %v2407_v49  ;;  %3808 = vrot.lane.b32.xlu1 %v8885_v1, %s6322_s30  ;;  %v3320_v49 = vsel %vm3280_vm4, %v3271_v8, %v3118_v14  ;;  %v10442_v29 = vld [vmem:[#allocation28_spill] sm:$0xff] }
 0xa0a   :  { %v3368_v63 = vmul.f32 %v6129_v58, %v3320_v49  ;;  %v10444_v8 = vld [vmem:[#allocation76_spill] sm:$0xff] }
 0xa0b   :  { %2981 = vrot.lane.b32.xlu0 %v9526_v0, %s6318_s13 }
 0xa0c   :  { %v3116_v35 = vpop.permute.xlu0 %3115 }
 0xa0d   :  { %v3319_v41 = vsel %vm3280_vm4, %v3270_v27, %v3116_v35  ;;  %3812 = vrot.lane.b32.xlu1 %v8997_v21, %s6322_s30  ;;  %v4002_v27 = vld [vmem:[%s10247_s9] sm:$0xf]  ;;  %v10445_v35 = vld [vmem:[#allocation78_spill] sm:$0xff] }
 0xa0e   :  { %v3367_v40 = vmul.f32 %v9479_v11, %v3319_v41  ;;  %5790 = vmatprep.subr.msk.mxu0 %vm4148_vm7, %v4002_v27  ;;  %v2009_v41 = vsel %vm1823_vm2, %v9317_v5, 0.0 }
 0xa0f   :  { %2839 = vrot.lane.b32.xlu0 %v9535_v38, %s6317_s2  ;;  %5791 = vmatpush3.msk.msra.mxu0 %vm4148_vm7, %v4002_v27  ;;  %v2014_v27 = vsel %vm1823_vm2, %v9599_v26, 0.0 }
 0xa10   :  { %3664 = vmatmul.mubr.f32.gmra.mrb[124].mxu1 %v3367_v40  ;;  %v2206_v40 = vsel %vm2020_vm5, %v9339_v28, %v2009_v41  ;;  %v10447_v41 = vld [vmem:[#allocation29_spill] sm:$0xff] }
 0xa11   :  { %3816 = vrot.lane.b32.xlu1 %v10440_v44, %s6322_s30  ;;  %3668 = vmatprep.mubr.f32.mxu1 %v6129_v58  ;;  %v10446_v58 = vld [vmem:[#allocation80_spill] sm:$0xff] }
 0xa13   :  { %3127 = vrot.lane.b32.xlu0 %v9535_v38, %s6319_s14 }
 0xa14   :  { %3669 = vmatmul.mubr.f32.gmra.mrb[126].mxu1 %v3368_v63  ;;  %v2403_v63 = vsel %vm2217_vm3, %v9298_v31, %v2206_v40 }
 0xa15   :  { %3820 = vrot.lane.b32.xlu1 %v9221_v47, %s6322_s30  ;;  %3673 = vmatprep.mubr.f32.mxu1 %v6131_v59  ;;  %v2600_v5 = vsel %vm2414_vm6, %v9354_v46, %v2403_v63  ;;  %v10449_v46 = vld [vmem:[#allocation82_spill] sm:$0xff] }
 0xa17   :  { %2985 = vrot.lane.b32.xlu0 %v9547_v17, %s6318_s13 }
 0xa19   :  { %3824 = vrot.lane.b32.xlu1 %v9333_v12, %s6322_s30 }
 0xa1b   :  { %2843 = vrot.lane.b32.xlu0 %v9563_v33, %s6317_s2 }
 0xa1d   :  { %v2361_v11 = vpop.xlane.xlu1 %2360  ;;  %3828 = vrot.lane.b32.xlu1 %v9441_v19, %s6322_s30  ;;  %v10448_v19 = vld [vmem:[#allocation59_spill] sm:$0xff] }
 0xa1e   :  { %v2648_v12 = vsub.f32 %v10448_v19, %v2600_v5  ;;  %v10450_v19 = vld [vmem:[#allocation83_spill] sm:$0xff] }
 0xa1f   :  { %3131 = vrot.lane.b32.xlu0 %v9563_v33, %s6319_s14 }
 0xa21   :  { %3832 = vrot.lane.b32.xlu1 %v9627_v50, %s6322_s30  ;;  %v2976_v60 = vpop.permute.xlu1 %2975 }
 0xa23   :  { %2989 = vrot.lane.b32.xlu0 %v9576_v24, %s6318_s13 }
 0xa25   :  { %v3120_v36 = vpop.permute.xlu1 %3119 }
 0xa27   :  { %3762 = vrot.lane.b32.xlu0 %v10441_v34, %s6322_s30 }
 0xa29   :  { %v9690_v48 = vpop.permute.xlu1 %2977 }
 0xa2b   :  { %3766 = vrot.lane.b32.xlu0 %v10442_v29, %s6322_s30 }
 0xa2d   :  { %v9699_v14 = vpop.permute.xlu1 %3121 }
 0xa2f   :  { %3770 = vrot.lane.b32.xlu0 %v10443_v2, %s6322_s30 }
 0xa31   :  { %v9709_v49 = vpop.permute.xlu1 %2835 }
 0xa33   :  { %3774 = vrot.lane.b32.xlu0 %v10444_v8, %s6322_s30 }
 0xa35   :  { %v9727_v47 = vpop.permute.xlu1 %2979 }
 0xa37   :  { %3778 = vrot.lane.b32.xlu0 %v10445_v35, %s6322_s30 }
 0xa3b   :  { %3782 = vrot.lane.b32.xlu0 %v10446_v58, %s6322_s30 }
 0xa3d   :  { %v2162_v50 = vpop.xlane.xlu0 %2161 }
 0xa3e   :  { %v2211_v28 = vsel %vm2020_vm5, %v2162_v50, %v2014_v27  ;;  %v2737_v50 = vmul.f32 1.442695, %v2648_v12  ;;  %v9738_v27 = vpop.permute.xlu1 %3123 }
 0xa3f   :  { %3786 = vrot.lane.b32.xlu0 %v10447_v41, %s6322_s30  ;;  %v2408_v31 = vsel %vm2217_vm3, %v9619_v30, %v2211_v28 }
 0xa40   :  { %6132 = vpow2.f32 %v2737_v50 }
 0xa41   :  { %v2556_v26 = vpop.xlane.xlu0 %2555 }
 0xa42   :  { %v9734_v40 = vsel %vm2414_vm6, %v2556_v26, %v2408_v31  ;;  %v10451_v31 = vld [vmem:[#allocation84_spill] sm:$0xff]  ;;  %v2838_v26 = vpop.permute.xlu1 %2837 }
 0xa43   :  { %3790 = vrot.lane.b32.xlu0 %v10449_v46, %s6322_s30 }
 0xa45   :  { %v1967_v63 = vpop.xlane.xlu0 %1966 }
 0xa46   :  { %v2015_v5 = vsel %vm1823_vm2, %v1967_v63, 0.0  ;;  %v10452_v63 = vld [vmem:[#allocation43_spill] sm:$0xff]  ;;  %v3126_v45 = vpop.permute.xlu1 %3125 }
 0xa47   :  { %3794 = vrot.lane.b32.xlu0 %v10450_v19, %s6322_s30 }
 0xa49   :  { %v2164_v30 = vpop.xlane.xlu0 %2163 }
 0xa4a   :  { %v2212_v28 = vsel %vm2020_vm5, %v2164_v30, %v2015_v5  ;;  %v6133_v30 = vpop.eup %6132 }
 0xa4b   :  { %3798 = vrot.lane.b32.xlu0 %v10451_v31, %s6322_s30  ;;  %v9750_v12 = vsel %vm2217_vm3, %v2361_v11, %v2212_v28  ;;  %v10454_v11 = vld [vmem:[#allocation51_spill] sm:$0xff]  ;;  %v9762_v28 = vpop.permute.xlu1 %2983 }
 0xa4d   :  { %v2832_v44 = vpop.permute.xlu0 %2831 }
 0xa4e   :  { %v3223_v21 = vsel %vm101_vm0, %v2832_v44, %v9485_v43  ;;  %v10456_v44 = vld [vmem:[#allocation86_spill] sm:$0xff] }
 0xa4f   :  { %v3272_v50 = vsel %vm3231_vm1, %v3223_v21, %v2976_v60  ;;  %3802 = vrot.lane.b32.xlu0 %v10452_v63, %s6322_s30  ;;  %v10455_v21 = vld [vmem:[#allocation55_spill] sm:$0xff]  ;;  %v9766_v43 = vpop.permute.xlu1 %2841 }
 0xa50   :  { %v3321_v1 = vsel %vm3280_vm4, %v3272_v50, %v3120_v36  ;;  %v2010_v36 = vsel %vm1823_vm2, %v9307_v25, 0.0  ;;  %v10458_v25 = vld [vmem:[#allocation61_spill] sm:$0xff] }
 0xa51   :  { %v3369_v5 = vmul.f32 %v6131_v59, %v3321_v1 }
 0xa53   :  { %3806 = vrot.lane.b32.xlu0 %v10453_v7, %s6322_s30  ;;  %3674 = vmatmul.mubr.f32.gmra.mrb[128].mxu1 %v3369_v5  ;;  %v9772_v1 = vpop.permute.xlu1 %3129  ;;  %v2207_v5 = vsel %vm2020_vm5, %v9410_v18, %v2010_v36 }
 0xa54   :  { %3678 = vmatprep.mubr.f32.mxu1 %v6133_v30 }
 0xa57   :  { %3810 = vrot.lane.b32.xlu0 %v10454_v11, %s6322_s30  ;;  %v9776_v59 = vpop.permute.xlu1 %2987 }
 0xa5b   :  { %3814 = vrot.lane.b32.xlu0 %v10455_v21, %s6322_s30 }
 0xa5f   :  { %3818 = vrot.lane.b32.xlu0 %v10456_v44, %s6322_s30 }
 0xa63   :  { %3822 = vrot.lane.b32.xlu0 %v9315_v62, %s6322_s30 }
 0xa67   :  { %3826 = vrot.lane.b32.xlu0 %v9425_v51, %s6322_s30  ;;  %v9790_v51 = vpop.permute.xlu1 %2845 }
 0xa6b   :  { %3830 = vrot.lane.b32.xlu0 %v9609_v6, %s6322_s30  ;;  %v2404_v6 = vsel %vm2217_vm3, %v9325_v23, %v2207_v5  ;;  %v9803_v36 = vpop.permute.xlu1 %3133  ;;  %v2651_v23 = vsub.f32 %v9277_v9, %v9556_v20 }
 0xa6c   :  { %v2601_v3 = vsel %vm2414_vm6, %v9415_v22, %v2404_v6  ;;  %v3225_v22 = vsel %vm101_vm0, %v9709_v49, %v9506_v55 }
 0xa6d   :  { %v9780_v60 = vpop.f32.mrb[120].mxu1  ;;  %v2649_v18 = vsub.f32 %v10458_v25, %v2601_v3  ;;  %v2743_v6 = vmul.f32 1.442695, %v2651_v23 }
 0xa6e   :  { %10457 = vst [vmem:[#allocation75_spill] sm:$0xff] %v9780_v60  ;;  %v3657_v50 = vpop.f32.mrb[121].mxu1 }
 0xa6f   :  { %3834 = vrot.lane.b32.xlu0 %v9780_v60, %s6322_s30  ;;  %v2739_v50 = vmul.f32 1.442695, %v2649_v18  ;;  %v10459_v60 = vld [vmem:[#allocation63_spill] sm:$0xff]  ;;  %v9807_v21 = vpop.permute.xlu1 %3764 }
 0xa70   :  { %v2650_v44 = vsub.f32 %v10459_v60, %v9472_v32 }
 0xa71   :  { %v9792_v62 = vpop.f32.mrb[122].mxu1  ;;  %6134 = vpow2.f32 %v2739_v50 }
 0xa72   :  { %3836 = vrot.lane.b32.xlu1 %v9792_v62, %s6322_s30  ;;  %v3662_v56 = vpop.f32.mrb[123].mxu1  ;;  %v2741_v57 = vmul.f32 1.442695, %v2650_v44  ;;  %v3274_v44 = vsel %vm3231_vm1, %v3225_v22, %v9727_v47 }
 0xa73   :  { %v10460_v56 = vld [vmem:[#allocation67_spill] sm:$0xff]  ;;  %v9816_v18 = vpop.permute.xlu1 %3768  ;;  %v3323_v50 = vsel %vm3280_vm4, %v3274_v44, %v9738_v27 }
 0xa74   :  { %6136 = vpow2.f32 %v2741_v57  ;;  %v2652_v3 = vsub.f32 %v10460_v56, %v9651_v42  ;;  %v2653_v42 = vsub.f32 %v9389_v39, %v9734_v40 }
 0xa75   :  { %6138 = vpow2.f32 %v2743_v6 }
 0xa76   :  { %v2745_v20 = vmul.f32 1.442695, %v2652_v3  ;;  %v2747_v40 = vmul.f32 1.442695, %v2653_v42 }
 0xa78   :  { %6140 = vpow2.f32 %v2745_v20 }
 0xa79   :  { %6142 = vpow2.f32 %v2747_v40 }
 0xa7b   :  { %v6135_v47 = vpop.eup %6134 }
 0xa7c   :  { %v3371_v39 = vmul.f32 %v6135_v47, %v3323_v50 }
 0xa7e   :  { %v2558_v5 = vpop.xlane.xlu0 %2557 }
 0xa82   :  { %v2834_v25 = vpop.permute.xlu0 %2833 }
 0xa83   :  { %v3224_v32 = vsel %vm101_vm0, %v2834_v25, %v9494_v15  ;;  %v3226_v15 = vsel %vm101_vm0, %v2838_v26, %v9526_v0  ;;  %v6137_v0 = vpop.eup %6136 }
 0xa84   :  { %v3273_v9 = vsel %vm3231_vm1, %v3224_v32, %v9690_v48  ;;  %v3773_v48 = vpop.permute.xlu1 %3772  ;;  %v6139_v56 = vpop.eup %6138 }
 0xa85   :  { %v3322_v55 = vsel %vm3280_vm4, %v3273_v9, %v9699_v14  ;;  %v2606_v14 = vsel %vm2414_vm6, %v2558_v5, %v9750_v12  ;;  %v6141_v32 = vpop.eup %6140 }
 0xa86   :  { %v2982_v49 = vpop.permute.xlu0 %2981  ;;  %v3370_v60 = vmul.f32 %v6133_v30, %v3322_v55  ;;  %v2654_v26 = vsub.f32 %v9452_v53, %v2606_v14  ;;  %v6143_v42 = vpop.eup %6142 }
 0xa87   :  { %v3275_v57 = vsel %vm3231_vm1, %v3226_v15, %v2982_v49  ;;  %v3230_v15 = vsel %vm101_vm0, %v9790_v51, %v9576_v24 }
 0xa88   :  { %3679 = vmatmul.mubr.f32.gmra.mrb[130].mxu1 %v3370_v60  ;;  %v3324_v23 = vsel %vm3280_vm4, %v3275_v57, %v3126_v45  ;;  %v3777_v22 = vpop.permute.xlu1 %3776  ;;  %v2749_v3 = vmul.f32 1.442695, %v2654_v26  ;;  %v3228_v45 = vsel %vm101_vm0, %v9766_v43, %v9547_v17 }
 0xa89   :  { %3683 = vmatprep.mubr.f32.mxu1 %v6135_v47  ;;  %v3372_v5 = vmul.f32 %v6137_v0, %v3324_v23 }
 0xa8a   :  { %v2840_v30 = vpop.permute.xlu0 %2839  ;;  %6144 = vpow2.f32 %v2749_v3 }
 0xa8b   :  { %v3227_v27 = vsel %vm101_vm0, %v2840_v30, %v9535_v38  ;;  %6146 = vrcp.f32 %v9807_v21 }
 0xa8c   :  { %3684 = vmatmul.mubr.f32.gmra.mrb[132].mxu1 %v3371_v39  ;;  %v3276_v4 = vsel %vm3231_vm1, %v3227_v27, %v9762_v28  ;;  %v3781_v44 = vpop.permute.xlu1 %3780 }
 0xa8d   :  { %3688 = vmatprep.mubr.f32.mxu1 %v6137_v0 }
 0xa8e   :  { %v3128_v12 = vpop.permute.xlu0 %3127 }
 0xa8f   :  { %v3325_v6 = vsel %vm3280_vm4, %v3276_v4, %v3128_v12 }
 0xa90   :  { %3689 = vmatmul.mubr.f32.gmra.mrb[134].mxu1 %v3372_v5  ;;  %v3373_v53 = vmul.f32 %v6139_v56, %v3325_v6  ;;  %v3785_v49 = vpop.permute.xlu1 %3784 }
 0xa91   :  { %3693 = vmatprep.mubr.f32.mxu1 %v6139_v56 }
 0xa92   :  { %v2986_v38 = vpop.permute.xlu0 %2985 }
 0xa93   :  { %v3277_v25 = vsel %vm3231_vm1, %v3228_v45, %v2986_v38 }
 0xa94   :  { %v3326_v28 = vsel %vm3280_vm4, %v3277_v25, %v9772_v1  ;;  %3694 = vmatmul.mubr.f32.gmra.mrb[136].mxu1 %v3373_v53  ;;  %v6145_v1 = vpop.eup %6144  ;;  %v3789_v14 = vpop.permute.xlu1 %3788 }
 0xa95   :  { %3698 = vmatprep.mubr.f32.mxu1 %v6141_v32  ;;  %v3374_v9 = vmul.f32 %v6141_v32, %v3326_v28  ;;  %v6147_v24 = vpop.eup %6146 }
 0xa96   :  { %v2844_v55 = vpop.permute.xlu0 %2843  ;;  %v3909_v21 = vmul.f32 %v6147_v24, %v8118_v10 }
 0xa97   :  { %v3229_v20 = vsel %vm101_vm0, %v2844_v55, %v9563_v33  ;;  %vm4003_vm0 = vcmask 31744  }
 0xa98   :  { %3699 = vmatmul.mubr.f32.gmra.mrb[138].mxu1 %v3374_v9  ;;  %v3278_v17 = vsel %vm3231_vm1, %v3229_v20, %v9776_v59  ;;  %v3793_v30 = vpop.permute.xlu1 %3792  ;;  %v10461_v20 = vld [vmem:[#allocation81_spill] sm:$0xff] }
 0xa99   :  { %3703 = vmatprep.mubr.f32.mxu1 %v6143_v42 }
 0xa9a   :  { %v3132_v43 = vpop.permute.xlu0 %3131 }
 0xa9b   :  { %v3327_v60 = vsel %vm3280_vm4, %v3278_v17, %v3132_v43 }
 0xa9c   :  { %v3375_v50 = vmul.f32 %v6143_v42, %v3327_v60  ;;  %v3797_v27 = vpop.permute.xlu1 %3796  ;;  %v10462_v60 = vld [vmem:[#allocation30_spill] sm:$0xff] }
 0xa9e   :  { %3704 = vmatmul.mubr.f32.gmra.mrb[140].mxu1 %v3375_v50  ;;  %v2990_v47 = vpop.permute.xlu0 %2989 }
 0xa9f   :  { %v3279_v33 = vsel %vm3231_vm1, %v3230_v15, %v2990_v47  ;;  %3708 = vmatprep.mubr.f32.mxu1 %v6145_v1 }
 0xaa0   :  { %v3328_v57 = vsel %vm3280_vm4, %v3279_v33, %v9803_v36  ;;  %v3801_v12 = vpop.permute.xlu1 %3800 }
 0xaa1   :  { %v3376_v59 = vmul.f32 %v6145_v1, %v3328_v57 }
 0xaa2   :  { %v3763_v39 = vpop.permute.xlu0 %3762 }
 0xaa3   :  { %6148 = vrcp.f32 %v3763_v39  ;;  %3709 = vmatmul.mubr.f32.gmra.mrb[142].mxu1 %v3376_v59 }
 0xaa4   :  { %6150 = vrcp.f32 %v9816_v18  ;;  %v3805_v45 = vpop.permute.xlu1 %3804 }
 0xaa6   :  { %v3767_v40 = vpop.permute.xlu0 %3766 }
 0xaa7   :  { %6152 = vrcp.f32 %v3767_v40 }
 0xaa8   :  { %6154 = vrcp.f32 %v3773_v48  ;;  %v3809_v28 = vpop.permute.xlu1 %3808 }
 0xaaa   :  { %v3771_v51 = vpop.permute.xlu0 %3770 }
 0xaab   :  { %6156 = vrcp.f32 %v3771_v51 }
 0xaac   :  { %6158 = vrcp.f32 %v3777_v22  ;;  %v3813_v43 = vpop.permute.xlu1 %3812 }
 0xaad   :  { %v6149_v23 = vpop.eup %6148 }
 0xaae   :  { %v3775_v36 = vpop.permute.xlu0 %3774  ;;  %v3907_v0 = vmul.f32 %v6149_v23, %v10441_v34  ;;  %v6151_v26 = vpop.eup %6150  ;;  %v10463_v23 = vld [vmem:[#allocation85_spill] sm:$0xff] }
 0xaaf   :  { %6160 = vrcp.f32 %v3775_v36  ;;  %v3913_v5 = vmul.f32 %v6151_v26, %v10433_v37  ;;  %v10464_v26 = vld [vmem:[#allocation45_spill] sm:$0xff] }
 0xab0   :  { %5792 = vmatprep.mubr.msk.f32.mxu0 %vm4003_vm0, %v3907_v0  ;;  %6162 = vrcp.f32 %v3781_v44  ;;  %v3817_v33 = vpop.permute.xlu1 %3816 }
 0xab1   :  { %v6153_v18 = vpop.eup %6152  ;;  %5793 = vmatmul.mubr.msk.f32.vlgmr.msra.gmra.mrb[144].mxu0 %vm4003_vm0, %v3909_v21 }
 0xab2   :  { %v3779_v48 = vpop.permute.xlu0 %3778  ;;  %v3911_v4 = vmul.f32 %v6153_v18, %v10442_v29  ;;  %v6155_v22 = vpop.eup %6154 }
 0xab3   :  { %6164 = vrcp.f32 %v3779_v48  ;;  %v3917_v56 = vmul.f32 %v6155_v22, %v10434_v52 }
 0xab4   :  { %5795 = vmatprep.mubr.msk.f32.mxu0 %vm4003_vm0, %v3911_v4  ;;  %6166 = vrcp.f32 %v3785_v49  ;;  %v3821_v51 = vpop.permute.xlu1 %3820 }
 0xab5   :  { %v6157_v34 = vpop.eup %6156  ;;  %5796 = vmatmul.mubr.msk.f32.gmra.mrb[146].mxu0 %vm4003_vm0, %v3913_v5  ;;  %v10465_v5 = vld [vmem:[#allocation49_spill] sm:$0xff] }
 0xab6   :  { %v3783_v10 = vpop.permute.xlu0 %3782  ;;  %v3915_v6 = vmul.f32 %v6157_v34, %v10443_v2  ;;  %v6159_v3 = vpop.eup %6158 }
 0xab7   :  { %6168 = vrcp.f32 %v3783_v10  ;;  %v3921_v38 = vmul.f32 %v6159_v3, %v10435_v54  ;;  %v10466_v3 = vld [vmem:[#allocation53_spill] sm:$0xff] }
 0xab8   :  { %5798 = vmatprep.mubr.msk.f32.mxu0 %vm4003_vm0, %v3915_v6  ;;  %6170 = vrcp.f32 %v3789_v14  ;;  %v3825_v21 = vpop.permute.xlu1 %3824 }
 0xab9   :  { %v6161_v29 = vpop.eup %6160  ;;  %5799 = vmatmul.mubr.msk.f32.gmra.mrb[148].mxu0 %vm4003_vm0, %v3917_v56 }
 0xaba   :  { %v3787_v37 = vpop.permute.xlu0 %3786  ;;  %v3919_v53 = vmul.f32 %v6161_v29, %v10444_v8  ;;  %v6163_v25 = vpop.eup %6162 }
 0xabb   :  { %6172 = vrcp.f32 %v3787_v37  ;;  %v3925_v44 = vmul.f32 %v6163_v25, %v10436_v16 }
 0xabc   :  { %5801 = vmatprep.mubr.msk.f32.mxu0 %vm4003_vm0, %v3919_v53  ;;  %6174 = vrcp.f32 %v3793_v30  ;;  %v3829_v10 = vpop.permute.xlu1 %3828  ;;  %v10467_v53 = vld [vmem:[#allocation55_spill] sm:$0xff] }
 0xabd   :  { %v6165_v2 = vpop.eup %6164  ;;  %5802 = vmatmul.mubr.msk.f32.gmra.mrb[150].mxu0 %vm4003_vm0, %v3921_v38 }
 0xabe   :  { %v3791_v52 = vpop.permute.xlu0 %3790  ;;  %v3923_v32 = vmul.f32 %v6165_v2, %v10445_v35  ;;  %v6167_v9 = vpop.eup %6166 }
 0xabf   :  { %6176 = vrcp.f32 %v3791_v52  ;;  %v3929_v42 = vmul.f32 %v6167_v9, %v10461_v20  ;;  %v10468_v52 = vld [vmem:[#allocation57_spill] sm:$0xff] }
 0xac0   :  { %5804 = vmatprep.mubr.msk.f32.mxu0 %vm4003_vm0, %v3923_v32  ;;  %6178 = vrcp.f32 %v3797_v27  ;;  %v3833_v25 = vpop.permute.xlu1 %3832 }
 0xac1   :  { %v6169_v8 = vpop.eup %6168  ;;  %5805 = vmatmul.mubr.msk.f32.gmra.mrb[152].mxu0 %vm4003_vm0, %v3925_v44 }
 0xac2   :  { %v3795_v54 = vpop.permute.xlu0 %3794  ;;  %v3927_v55 = vmul.f32 %v6169_v8, %v10446_v58  ;;  %v6171_v17 = vpop.eup %6170  ;;  %v10469_v8 = vld [vmem:[#allocation86_spill] sm:$0xff] }
 0xac3   :  { %6180 = vrcp.f32 %v3795_v54  ;;  %v3933_v50 = vmul.f32 %v6171_v17, %v10462_v60  ;;  %v10471_v60 = vld [vmem:[#allocation65_spill] sm:$0xff] }
 0xac4   :  { %5807 = vmatprep.mubr.msk.f32.mxu0 %vm4003_vm0, %v3927_v55  ;;  %6182 = vrcp.f32 %v3801_v12 }
 0xac5   :  { %v6173_v35 = vpop.eup %6172  ;;  %5808 = vmatmul.mubr.msk.f32.gmra.mrb[154].mxu0 %vm4003_vm0, %v3929_v42  ;;  %v10470_v42 = vld [vmem:[#allocation87_spill] sm:$0xff] }
 0xac6   :  { %v3799_v16 = vpop.permute.xlu0 %3798  ;;  %v3931_v49 = vmul.f32 %v6173_v35, %v10447_v41  ;;  %v6175_v1 = vpop.eup %6174 }
 0xac7   :  { %6184 = vrcp.f32 %v3799_v16  ;;  %v3937_v57 = vmul.f32 %v6175_v1, %v8437_v13  ;;  %v10472_v1 = vld [vmem:[#allocation88_spill] sm:$0xff] }
 0xac8   :  { %5810 = vmatprep.mubr.msk.f32.mxu0 %vm4003_vm0, %v3931_v49  ;;  %6186 = vrcp.f32 %v3805_v45 }
 0xac9   :  { %v6177_v58 = vpop.eup %6176  ;;  %5811 = vmatmul.mubr.msk.f32.gmra.mrb[156].mxu0 %vm4003_vm0, %v3933_v50 }
 0xaca   :  { %v3803_v15 = vpop.permute.xlu0 %3802  ;;  %v3935_v47 = vmul.f32 %v6177_v58, %v10449_v46  ;;  %v6179_v14 = vpop.eup %6178 }
 0xacb   :  { %6188 = vrcp.f32 %v3803_v15  ;;  %v3941_v40 = vmul.f32 %v6179_v14, %v8549_v61  ;;  %v10474_v14 = vld [vmem:[#allocation89_spill] sm:$0xff] }
 0xacc   :  { %5813 = vmatprep.mubr.msk.f32.mxu0 %vm4003_vm0, %v3935_v47  ;;  %6190 = vrcp.f32 %v3809_v28 }
 0xacd   :  { %v6181_v41 = vpop.eup %6180  ;;  %5814 = vmatmul.mubr.msk.f32.gmra.mrb[158].mxu0 %vm4003_vm0, %v3937_v57 }
 0xace   :  { %v3807_v59 = vpop.permute.xlu0 %3806  ;;  %v3939_v39 = vmul.f32 %v6181_v41, %v10450_v19  ;;  %v6183_v30 = vpop.eup %6182 }
 0xacf   :  { %6192 = vrcp.f32 %v3807_v59  ;;  %v3945_v27 = vmul.f32 %v6183_v30, %v10463_v23  ;;  %v10477_v23 = vld [vmem:[#allocation75_spill] sm:$0xff] }
 0xad0   :  { %5816 = vmatprep.mubr.msk.f32.mxu0 %vm4003_vm0, %v3939_v39  ;;  %6194 = vrcp.f32 %v3813_v43 }
 0xad1   :  { %v6185_v46 = vpop.eup %6184  ;;  %5817 = vmatmul.mubr.msk.f32.gmra.mrb[160].mxu0 %vm4003_vm0, %v3941_v40  ;;  %v10475_v40 = vld [vmem:[#allocation71_spill] sm:$0xff] }
 0xad2   :  { %v3811_v13 = vpop.permute.xlu0 %3810  ;;  %v3943_v24 = vmul.f32 %v6185_v46, %v10451_v31  ;;  %v6187_v36 = vpop.eup %6186  ;;  %v10476_v46 = vld [vmem:[#allocation73_spill] sm:$0xff] }
 0xad3   :  { %6196 = vrcp.f32 %v3811_v13  ;;  %v3949_v18 = vmul.f32 %v6187_v36, %v10464_v26  ;;  %v4652_v26 = vld [vmem:[%s10248_s10 + $0x18] sm:$0xff] }
 0xad4   :  { %5819 = vmatprep.mubr.msk.f32.mxu0 %vm4003_vm0, %v3943_v24  ;;  %6198 = vrcp.f32 %v3817_v33  ;;  %v10473_v33 = vld [vmem:[#allocation69_spill] sm:$0xff] }
 0xad5   :  { %v6189_v19 = vpop.eup %6188  ;;  %5820 = vmatmul.mubr.msk.f32.gmra.mrb[162].mxu0 %vm4003_vm0, %v3945_v27 }
 0xad6   :  { %v3815_v61 = vpop.permute.xlu0 %3814  ;;  %v3947_v0 = vmul.f32 %v6189_v19, %v10452_v63  ;;  %v6191_v48 = vpop.eup %6190  ;;  %v4649_v19 = vld [vmem:[%s10248_s10] sm:$0xff] }
 0xad7   :  { %6200 = vrcp.f32 %v3815_v61  ;;  %v3953_v22 = vmul.f32 %v6191_v48, %v10465_v5  ;;  %v4650_v61 = vld [vmem:[%s10248_s10 + $0x8] sm:$0xff] }
 0xad8   :  { %5822 = vmatprep.mubr.msk.f32.mxu0 %vm4003_vm0, %v3947_v0  ;;  %6202 = vrcp.f32 %v3821_v51  ;;  %v4651_v0 = vld [vmem:[%s10248_s10 + $0x10] sm:$0xff]  ;;  %v4654_v48 = vld [vmem:[%s10248_s10 + $0x28] sm:$0xff] }
 0xad9   :  { %v6193_v31 = vpop.eup %6192  ;;  %5823 = vmatmul.mubr.msk.f32.gmra.mrb[164].mxu0 %vm4003_vm0, %v3949_v18  ;;  %v4653_v18 = vld [vmem:[%s10248_s10 + $0x20] sm:$0xff] }
 0xada   :  { %v3819_v4 = vpop.permute.xlu0 %3818  ;;  %v3951_v12 = vmul.f32 %v6193_v31, %v10453_v7  ;;  %v6195_v34 = vpop.eup %6194  ;;  %v6032_v31 = vpack.c.bf16 %v4654_v48, %v4653_v18 }
 0xadb   :  { %6204 = vrcp.f32 %v3819_v4  ;;  %v3957_v29 = vmul.f32 %v6195_v34, %v10466_v3  ;;  %v4655_v4 = vld [vmem:[%s10248_s10 + $0x30] sm:$0xff] }
 0xadc   :  { %5825 = vmatprep.mubr.msk.f32.mxu0 %vm4003_vm0, %v3951_v12  ;;  %6206 = vrcp.f32 %v3825_v21  ;;  %v6024_v21 = vpack.c.bf16 %v4650_v61, %v4649_v19  ;;  %v4656_v12 = vld [vmem:[%s10248_s10 + $0x38] sm:$0xff] }
 0xadd   :  { %v6197_v63 = vpop.eup %6196  ;;  %5826 = vmatmul.mubr.msk.f32.gmra.mrb[166].mxu0 %vm4003_vm0, %v3953_v22  ;;  %v6036_v5 = vpack.c.bf16 %v4656_v12, %v4655_v4  ;;  %v10487_v4 = vld [vmem:[#allocation12_spill] sm:$0xff] }
 0xade   :  { %v3823_v6 = vpop.permute.xlu0 %3822  ;;  %v3955_v56 = vmul.f32 %v6197_v63, %v10454_v11  ;;  %v6199_v45 = vpop.eup %6198  ;;  %6025 = vmatprep.subr.bf16.mxu1 %v6024_v21 }
 0xadf   :  { %6208 = vrcp.f32 %v3823_v6  ;;  %v3961_v32 = vmul.f32 %v6199_v45, %v10468_v52  ;;  %6027 = vmatpush3.bf16.msra.mxu1 %v6024_v21 }
 0xae0   :  { %5828 = vmatprep.mubr.msk.f32.mxu0 %vm4003_vm0, %v3955_v56  ;;  %6210 = vrcp.f32 %v3829_v10 }
 0xae1   :  { %v6201_v7 = vpop.eup %6200  ;;  %5829 = vmatmul.mubr.msk.f32.gmra.mrb[168].mxu0 %vm4003_vm0, %v3957_v29 }
 0xae2   :  { %v3827_v37 = vpop.permute.xlu0 %3826  ;;  %v3959_v38 = vmul.f32 %v6201_v7, %v10467_v53  ;;  %v6203_v11 = vpop.eup %6202 }
 0xae3   :  { %6212 = vrcp.f32 %v3827_v37  ;;  %v9915_v2 = vpop.f32.mrb[124].mxu1  ;;  %v3965_v17 = vmul.f32 %v6203_v11, %v10470_v42 }
 0xae4   :  { %3838 = vrot.lane.b32.xlu0 %v9915_v2, %s6322_s30  ;;  %v3667_v28 = vpop.f32.mrb[125].mxu1  ;;  %5831 = vmatprep.mubr.msk.f32.mxu0 %vm4003_vm0, %v3959_v38  ;;  %6214 = vrcp.f32 %v3833_v25  ;;  %v3837_v55 = vpop.permute.xlu1 %3836 }
 0xae5   :  { %v6205_v44 = vpop.eup %6204  ;;  %5832 = vmatmul.mubr.msk.f32.gmra.mrb[170].mxu0 %vm4003_vm0, %v3961_v32 }
 0xae6   :  { %v3831_v9 = vpop.permute.xlu0 %3830  ;;  %v3963_v54 = vmul.f32 %v6205_v44, %v10469_v8  ;;  %v6207_v35 = vpop.eup %6206 }
 0xae7   :  { %6216 = vrcp.f32 %v3831_v9  ;;  %v9923_v20 = vpop.f32.mrb[126].mxu1  ;;  %v3969_v58 = vmul.f32 %v6207_v35, %v10472_v1 }
 0xae8   :  { %3840 = vrot.lane.b32.xlu1 %v9923_v20, %s6322_s30  ;;  %v3672_v43 = vpop.f32.mrb[127].mxu1  ;;  %5834 = vmatprep.mubr.msk.f32.mxu0 %vm4003_vm0, %v3963_v54  ;;  %6218 = vrcp.f32 %v3837_v55  ;;  %v6291_v54 = vld [vmem:[%s10244_s6] sm:$0x3] }
 0xae9   :  { %v6209_v16 = vpop.eup %6208  ;;  %5835 = vmatmul.mubr.msk.f32.gmra.mrb[172].mxu0 %vm4003_vm0, %v3965_v17  ;;  %v10478_v55 = vld [vmem:[#allocation5_spill] sm:$0xff]  ;;  %v10480_v17 = vld [vmem:[#allocation7_spill] sm:$0xff]  ;;  %v10481_v43 = vld [vmem:[#allocation6_spill] sm:$0xff] }
 0xaea   :  { %v3835_v49 = vpop.permute.xlu0 %3834  ;;  %v3967_v50 = vmul.f32 %v6209_v16, %v10471_v60  ;;  %v6211_v15 = vpop.eup %6210 }
 0xaeb   :  { %6220 = vrcp.f32 %v3835_v49  ;;  %v3973_v41 = vmul.f32 %v6211_v15, %v10474_v14 }
 0xaec   :  { %5837 = vmatprep.mubr.msk.f32.mxu0 %vm4003_vm0, %v3967_v50 }
 0xaed   :  { %v6213_v47 = vpop.eup %6212  ;;  %5838 = vmatmul.mubr.msk.f32.gmra.mrb[174].mxu0 %vm4003_vm0, %v3969_v58  ;;  %v10482_v58 = vld [vmem:[#allocation9_spill] sm:$0xff] }
 0xaee   :  { %v3971_v57 = vmul.f32 %v6213_v47, %v10473_v33  ;;  %v6215_v59 = vpop.eup %6214  ;;  %v10483_v33 = vld [vmem:[#allocation8_spill] sm:$0xff] }
 0xaef   :  { %v3977_v51 = vmul.f32 %v6215_v59, %v10476_v46  ;;  %v10484_v46 = vld [vmem:[#allocation11_spill] sm:$0xff] }
 0xaf0   :  { %5840 = vmatprep.mubr.msk.f32.mxu0 %vm4003_vm0, %v3971_v57 }
 0xaf1   :  { %v6217_v39 = vpop.eup %6216  ;;  %5841 = vmatmul.mubr.msk.f32.gmra.mrb[176].mxu0 %vm4003_vm0, %v3973_v41 }
 0xaf2   :  { %v3975_v30 = vmul.f32 %v6217_v39, %v10475_v40  ;;  %v6219_v13 = vpop.eup %6218 }
 0xaf3   :  { %v3981_v36 = vmul.f32 %v6219_v13, %v9792_v62  ;;  %v6028_v62 = vpack.c.bf16 %v4652_v26, %v4651_v0 }
 0xaf4   :  { %5843 = vmatprep.mubr.msk.f32.mxu0 %vm4003_vm0, %v3975_v30 }
 0xaf5   :  { %v6221_v24 = vpop.eup %6220  ;;  %5844 = vmatmul.mubr.msk.f32.gmra.mrb[178].mxu0 %vm4003_vm0, %v3977_v51  ;;  %6029 = vmatprep.subr.bf16.mxu1 %v6028_v62 }
 0xaf6   :  { %v3979_v27 = vmul.f32 %v6221_v24, %v10477_v23  ;;  %6031 = vmatpush3.bf16.msra.mxu1 %v6028_v62  ;;  %v10485_v23 = vld [vmem:[#allocation10_spill] sm:$0xff]  ;;  %v10486_v62 = vld [vmem:[#allocation13_spill] sm:$0xff] }
 0xaf7   :  { %6033 = vmatprep.subr.bf16.mxu1 %v6032_v31 }
 0xaf8   :  { %5846 = vmatprep.mubr.msk.f32.mxu0 %vm4003_vm0, %v3979_v27 }
 0xaf9   :  { %5847 = vmatmul.mubr.msk.f32.gmra.mrb[180].mxu0 %vm4003_vm0, %v3981_v36 }
 0xafa   :  { %6035 = vmatpush3.bf16.msra.mxu1 %v6032_v31 }
 0xafb   :  { %6037 = vmatprep.subr.bf16.mxu1 %v6036_v5 }
 0xafe   :  { %6039 = vmatpush3.bf16.msra.mxu1 %v6036_v5 }
 0xb26   :  { %v9970_v22 = vpop.f32.mrb[128].mxu1 }
 0xb27   :  { %3842 = vrot.lane.b32.xlu0 %v9970_v22, %s6322_s30  ;;  %v3677_v34 = vpop.f32.mrb[129].mxu1 }
 0xb56   :  { %v3839_v63 = vpop.permute.xlu0 %3838 }
 0xb57   :  { %6222 = vrcp.f32 %v3839_v63 }
 0xb5a   :  { %v3841_v10 = vpop.permute.xlu1 %3840 }
 0xb5b   :  { %6224 = vrcp.f32 %v3841_v10  ;;  %v9974_v6 = vpop.f32.mrb[130].mxu1 }
 0xb5c   :  { %3844 = vrot.lane.b32.xlu1 %v9974_v6, %s6322_s30  ;;  %v3682_v56 = vpop.f32.mrb[131].mxu1 }
 0xb5f   :  { %v9978_v3 = vpop.f32.mrb[132].mxu1 }
 0xb60   :  { %3846 = vrot.lane.b32.xlu0 %v9978_v3, %s6322_s30  ;;  %v3687_v29 = vpop.f32.mrb[133].mxu1 }
 0xb61   :  { %v6223_v45 = vpop.eup %6222 }
 0xb62   :  { %v3983_v7 = vmul.f32 %v6223_v45, %v9915_v2  ;;  %v10488_v45 = vld [vmem:[#allocation15_spill] sm:$0xff] }
 0xb63   :  { %v9983_v37 = vpop.f32.mrb[134].mxu1 }
 0xb64   :  { %3848 = vrot.lane.b32.xlu1 %v9983_v37, %s6322_s30  ;;  %v3692_v53 = vpop.f32.mrb[135].mxu1  ;;  %5849 = vmatprep.mubr.msk.f32.mxu0 %vm4003_vm0, %v3983_v7 }
 0xb65   :  { %v6225_v38 = vpop.eup %6224 }
 0xb66   :  { %v3985_v25 = vmul.f32 %v6225_v38, %v9923_v20  ;;  %v10479_v20 = vsub.s32 1, %v10478_v55 }
 0xb67   :  { %v9989_v52 = vpop.f32.mrb[136].mxu1 }
 0xb68   :  { %3850 = vrot.lane.b32.xlu0 %v9989_v52, %s6322_s30  ;;  %v3697_v32 = vpop.f32.mrb[137].mxu1  ;;  %5850 = vmatmul.mubr.msk.f32.gmra.mrb[182].mxu0 %vm4003_vm0, %v3985_v25  ;;  %v10011_v42 = vrot.slane %v6291_v54, %v10479_v20  ;;  %v10489_v25 = vld [vmem:[#allocation14_spill] sm:$0xff] }
 0xb6a   :  { %v1538_v35 = vadd.f32 %v10480_v17, %v10011_v42  ;;  %v1532_v16 = vadd.f32 %v10481_v43, %v10011_v42  ;;  %v1550_v15 = vadd.f32 %v10482_v58, %v10011_v42  ;;  %v1544_v57 = vadd.f32 %v10483_v33, %v10011_v42  ;;  %v10490_v17 = vld [vmem:[#allocation17_spill] sm:$0xff] }
 0xb6b   :  { %v9994_v2 = vpop.f32.mrb[138].mxu1  ;;  %v1562_v51 = vadd.f32 %v10484_v46, %v10011_v42  ;;  %v1556_v27 = vadd.f32 %v10485_v23, %v10011_v42  ;;  %v1574_v18 = vadd.f32 %v10486_v62, %v10011_v42  ;;  %v1568_v12 = vadd.f32 %v10487_v4, %v10011_v42 }
 0xb6c   :  { %3852 = vrot.lane.b32.xlu1 %v9994_v2, %s6322_s30  ;;  %v3702_v11 = vpop.f32.mrb[139].mxu1  ;;  %v1586_v7 = vadd.f32 %v10488_v45, %v10011_v42  ;;  %v1580_v32 = vadd.f32 %v10489_v25, %v10011_v42 }
 0xb71   :  { %v9998_v28 = vpop.f32.mrb[140].mxu1 }
 0xb72   :  { %3854 = vrot.lane.b32.xlu0 %v9998_v28, %s6322_s30  ;;  %v3707_v44 = vpop.f32.mrb[141].mxu1 }
 0xb76   :  { %v10002_v9 = vpop.f32.mrb[142].mxu1 }
 0xb77   :  { %3856 = vrot.lane.b32.xlu1 %v10002_v9, %s6322_s30  ;;  %v3712_v8 = vpop.f32.mrb[143].mxu1 }
 0xb84   :  { %v5794_v49 = vpop.f32.mrb[144].mxu0 }
 0xb85   :  { %v4458_v60 = vadd.f32 %v5794_v49, %v1538_v35  ;;  %v4218_v50 = vpop.f32.mrb[145].mxu0  ;;  %v1598_v35 = vadd.f32 %v10490_v17, %v10011_v42  ;;  %v10491_v49 = vld [vmem:[#allocation16_spill] sm:$0xff] }
 0xb86   :  { %v4457_v1 = vadd.f32 %v4218_v50, %v1532_v16  ;;  %v10499_v17 = vld [vmem:[#allocation24_spill] sm:$0xff] }
 0xb87   :  { %v4554_v47 = vmul.f32 0.01, %v4458_v60  ;;  %vm4506_vm2 = vcmp.gt.f32.partialorder %v4458_v60, 0.0 }
 0xb88   :  { %vm4505_vm3 = vcmp.gt.f32.partialorder %v4457_v1, 0.0  ;;  %v4553_v14 = vmul.f32 0.01, %v4457_v1  ;;  %v5797_v41 = vpop.f32.mrb[146].mxu0 }
 0xb89   :  { %v4460_v59 = vadd.f32 %v5797_v41, %v1550_v15  ;;  %v4228_v39 = vpop.f32.mrb[147].mxu0  ;;  %v4602_v13 = vsel %vm4506_vm2, %v4458_v60, %v4554_v47  ;;  %v1592_v60 = vadd.f32 %v10491_v49, %v10011_v42 }
 0xb8a   :  { %v4459_v40 = vadd.f32 %v4228_v39, %v1544_v57  ;;  %v4601_v30 = vsel %vm4505_vm3, %v4457_v1, %v4553_v14  ;;  %v10492_v14 = vld [vmem:[#allocation19_spill] sm:$0xff] }
 0xb8b   :  { %v4556_v24 = vmul.f32 0.01, %v4460_v59  ;;  %5880 = vmatprep.mubr.msk.f32.mxu1 %vm3231_vm1, %v4601_v30  ;;  %vm4508_vm5 = vcmp.gt.f32.partialorder %v4460_v59, 0.0  ;;  %v1610_v41 = vadd.f32 %v10492_v14, %v10011_v42 }
 0xb8c   :  { %vm4507_vm6 = vcmp.gt.f32.partialorder %v4459_v40, 0.0  ;;  %v4555_v36 = vmul.f32 0.01, %v4459_v40  ;;  %v5800_v19 = vpop.f32.mrb[148].mxu0  ;;  %5881 = vmatmul.mubr.msk.f32.vlgmr.msra.gmra.mrb[144].mxu1 %vm3231_vm1, %v4602_v13 }
 0xb8d   :  { %v4462_v61 = vadd.f32 %v5800_v19, %v1562_v51  ;;  %v4238_v0 = vpop.f32.mrb[149].mxu0  ;;  %v4604_v31 = vsel %vm4508_vm5, %v4460_v59, %v4556_v24 }
 0xb8e   :  { %v4461_v21 = vadd.f32 %v4238_v0, %v1556_v27  ;;  %v4603_v26 = vsel %vm4507_vm6, %v4459_v40, %v4555_v36  ;;  %v10493_v40 = vld [vmem:[#allocation18_spill] sm:$0xff]  ;;  %v10494_v36 = vld [vmem:[#allocation21_spill] sm:$0xff] }
 0xb8f   :  { %v4558_v48 = vmul.f32 0.01, %v4462_v61  ;;  %5883 = vmatprep.mubr.msk.f32.mxu1 %vm3231_vm1, %v4603_v26  ;;  %vm4510_vm8 = vcmp.gt.f32.partialorder %v4462_v61, 0.0  ;;  %v1604_v30 = vadd.f32 %v10493_v40, %v10011_v42  ;;  %v1622_v19 = vadd.f32 %v10494_v36, %v10011_v42 }
 0xb90   :  { %vm4509_vm9 = vcmp.gt.f32.partialorder %v4461_v21, 0.0  ;;  %v4557_v5 = vmul.f32 0.01, %v4461_v21  ;;  %v5803_v34 = vpop.f32.mrb[150].mxu0  ;;  %5884 = vmatmul.mubr.msk.f32.gmra.mrb[146].mxu1 %vm3231_vm1, %v4604_v31 }
 0xb91   :  { %v4464_v63 = vadd.f32 %v5803_v34, %v1574_v18  ;;  %v4248_v10 = vpop.f32.mrb[151].mxu0  ;;  %v4606_v38 = vsel %vm4510_vm8, %v4462_v61, %v4558_v48 }
 0xb92   :  { %v4463_v56 = vadd.f32 %v4248_v10, %v1568_v12  ;;  %v4605_v29 = vsel %vm4509_vm9, %v4461_v21, %v4557_v5  ;;  %v10495_v21 = vld [vmem:[#allocation20_spill] sm:$0xff]  ;;  %v10496_v5 = vld [vmem:[#allocation23_spill] sm:$0xff] }
 0xb93   :  { %v4560_v53 = vmul.f32 0.01, %v4464_v63  ;;  %5886 = vmatprep.mubr.msk.f32.mxu1 %vm3231_vm1, %v4605_v29  ;;  %vm4512_vm10 = vcmp.gt.f32.partialorder %v4464_v63, 0.0  ;;  %v1616_v26 = vadd.f32 %v10495_v21, %v10011_v42  ;;  %v1634_v34 = vadd.f32 %v10496_v5, %v10011_v42  ;;  %v10497_v29 = vld [vmem:[#allocation22_spill] sm:$0xff] }
 0xb94   :  { %vm4511_vm11 = vcmp.gt.f32.partialorder %v4463_v56, 0.0  ;;  %v4559_v11 = vmul.f32 0.01, %v4463_v56  ;;  %v5806_v44 = vpop.f32.mrb[152].mxu0  ;;  %5887 = vmatmul.mubr.msk.f32.gmra.mrb[148].mxu1 %vm3231_vm1, %v4606_v38  ;;  %v1628_v45 = vadd.f32 %v10497_v29, %v10011_v42 }
 0xb95   :  { %v4466_v8 = vadd.f32 %v5806_v44, %v1586_v7  ;;  %v4258_v54 = vpop.f32.mrb[153].mxu0  ;;  %v4608_v16 = vsel %vm4512_vm10, %v4464_v63, %v4560_v53 }
 0xb96   :  { %v4465_v55 = vadd.f32 %v4258_v54, %v1580_v32  ;;  %v4607_v20 = vsel %vm4511_vm11, %v4463_v56, %v4559_v11 }
 0xb97   :  { %v4562_v43 = vmul.f32 0.01, %v4466_v8  ;;  %5889 = vmatprep.mubr.msk.f32.mxu1 %vm3231_vm1, %v4607_v20  ;;  %vm4514_vm12 = vcmp.gt.f32.partialorder %v4466_v8, 0.0 }
 0xb98   :  { %vm4513_vm13 = vcmp.gt.f32.partialorder %v4465_v55, 0.0  ;;  %v4561_v50 = vmul.f32 0.01, %v4465_v55  ;;  %v5809_v1 = vpop.f32.mrb[154].mxu0  ;;  %5890 = vmatmul.mubr.msk.f32.gmra.mrb[150].mxu1 %vm3231_vm1, %v4608_v16 }
 0xb99   :  { %v4468_v58 = vadd.f32 %v5809_v1, %v1598_v35  ;;  %v4268_v15 = vpop.f32.mrb[155].mxu0  ;;  %v3843_v47 = vpop.permute.xlu0 %3842  ;;  %v4610_v39 = vsel %vm4514_vm12, %v4466_v8, %v4562_v43  ;;  %v10498_v8 = vld [vmem:[#allocation25_spill] sm:$0xff]  ;;  %v1640_v35 = vadd.f32 %v10499_v17, %v10011_v42  ;;  %v10508_v17 = vld [vmem:[#allocation36_spill] sm:$0xff] }
 0xb9a   :  { %v4467_v33 = vadd.f32 %v4268_v15, %v1592_v60  ;;  %6226 = vrcp.f32 %v3843_v47  ;;  %v4609_v57 = vsel %vm4513_vm13, %v4465_v55, %v4561_v50  ;;  %v1646_v54 = vadd.f32 %v10498_v8, %v10011_v42  ;;  %v10500_v1 = vld [vmem:[#allocation33_spill] sm:$0xff] }
 0xb9b   :  { %v4564_v59 = vmul.f32 0.01, %v4468_v58  ;;  %5892 = vmatprep.mubr.msk.f32.mxu1 %vm3231_vm1, %v4609_v57  ;;  %vm4516_vm14 = vcmp.gt.f32.partialorder %v4468_v58, 0.0 }
 0xb9c   :  { %vm4515_vm15 = vcmp.gt.f32.partialorder %v4467_v33, 0.0  ;;  %v4563_v46 = vmul.f32 0.01, %v4467_v33  ;;  %v5812_v51 = vpop.f32.mrb[156].mxu0  ;;  %5893 = vmatmul.mubr.msk.f32.gmra.mrb[152].mxu1 %vm3231_vm1, %v4610_v39 }
 0xb9d   :  { %v4470_v13 = vadd.f32 %v5812_v51, %v1610_v41  ;;  %v4278_v24 = vpop.f32.mrb[157].mxu0  ;;  %v4612_v0 = vsel %vm4516_vm14, %v4468_v58, %v4564_v59  ;;  %v1658_v58 = vadd.f32 %v10500_v1, %v10011_v42 }
 0xb9e   :  { %v4469_v23 = vadd.f32 %v4278_v24, %v1604_v30  ;;  %v4611_v27 = vsel %vm4515_vm15, %v4467_v33, %v4563_v46  ;;  %v10501_v33 = vld [vmem:[#allocation31_spill] sm:$0xff] }
 0xb9f   :  { %v4566_v61 = vmul.f32 0.01, %v4470_v13  ;;  %5895 = vmatprep.mubr.msk.f32.mxu1 %vm3231_vm1, %v4611_v27  ;;  %vm4518_vm4 = vcmp.gt.f32.partialorder %v4470_v13, 0.0  ;;  %v1652_v57 = vadd.f32 %v10501_v33, %v10011_v42  ;;  %v10502_v46 = vld [vmem:[#allocation39_spill] sm:$0xff]  ;;  %v10510_v33 = vld [vmem:[#allocation41_spill] sm:$0xff] }
 0xba0   :  { %vm4517_vm7 = vcmp.gt.f32.partialorder %v4469_v23, 0.0  ;;  %v4565_v62 = vmul.f32 0.01, %v4469_v23  ;;  %v5815_v18 = vpop.f32.mrb[158].mxu0  ;;  %5896 = vmatmul.mubr.msk.f32.gmra.mrb[154].mxu1 %vm3231_vm1, %v4612_v0  ;;  %v1670_v51 = vadd.f32 %v10502_v46, %v10011_v42 }
 0xba1   :  { %v4472_v48 = vadd.f32 %v5815_v18, %v1622_v19  ;;  %v4288_v31 = vpop.f32.mrb[159].mxu0  ;;  %v4614_v10 = vsel %vm4518_vm4, %v4470_v13, %v4566_v61 }
 0xba2   :  { %v4471_v4 = vadd.f32 %v4288_v31, %v1616_v26  ;;  %v4613_v12 = vsel %vm4517_vm7, %v4469_v23, %v4565_v62  ;;  %v10503_v23 = vld [vmem:[#allocation38_spill] sm:$0xff]  ;;  %v10504_v62 = vld [vmem:[#allocation32_spill] sm:$0xff] }
 0xba3   :  { %v4568_v63 = vmul.f32 0.01, %v4472_v48  ;;  %5898 = vmatprep.mubr.msk.f32.mxu1 %vm3231_vm1, %v4613_v12  ;;  %vm4520_vm2 = vcmp.gt.f32.partialorder %v4472_v48, 0.0  ;;  %v1664_v27 = vadd.f32 %v10503_v23, %v10011_v42  ;;  %v1682_v18 = vadd.f32 %v10504_v62, %v10011_v42  ;;  %v10512_v23 = vld [vmem:[#allocation44_spill] sm:$0xff] }
 0xba4   :  { %v6227_v56 = vpop.eup %6226  ;;  %vm4519_vm3 = vcmp.gt.f32.partialorder %v4471_v4, 0.0  ;;  %v4567_v7 = vmul.f32 0.01, %v4471_v4  ;;  %v5818_v53 = vpop.f32.mrb[160].mxu0  ;;  %5899 = vmatmul.mubr.msk.f32.gmra.mrb[156].mxu1 %vm3231_vm1, %v4614_v10 }
 0xba5   :  { %v4474_v38 = vadd.f32 %v5818_v53, %v1634_v34  ;;  %v4298_v25 = vpop.f32.mrb[161].mxu0  ;;  %v3987_v32 = vmul.f32 %v6227_v56, %v9970_v22  ;;  %v4616_v20 = vsel %vm4520_vm2, %v4472_v48, %v4568_v63 }
 0xba6   :  { %v4473_v11 = vadd.f32 %v4298_v25, %v1628_v45  ;;  %v4615_v44 = vsel %vm4519_vm3, %v4471_v4, %v4567_v7  ;;  %v10505_v4 = vld [vmem:[#allocation37_spill] sm:$0xff]  ;;  %v10506_v45 = vld [vmem:[#allocation26_spill] sm:$0xff] }
 0xba7   :  { %v4570_v55 = vmul.f32 0.01, %v4474_v38  ;;  %5852 = vmatprep.mubr.msk.f32.mxu0 %vm4003_vm0, %v3987_v32  ;;  %5901 = vmatprep.mubr.msk.f32.mxu1 %vm3231_vm1, %v4615_v44  ;;  %vm4522_vm5 = vcmp.gt.f32.partialorder %v4474_v38, 0.0  ;;  %v1676_v12 = vadd.f32 %v10505_v4, %v10011_v42  ;;  %v1694_v7 = vadd.f32 %v10506_v45, %v10011_v42  ;;  %v10507_v25 = vld [vmem:[#allocation34_spill] sm:$0xff]  ;;  %v10514_v4 = vld [vmem:[#allocation48_spill] sm:$0xff] }
 0xba8   :  { %vm4521_vm6 = vcmp.gt.f32.partialorder %v4473_v11, 0.0  ;;  %v4569_v43 = vmul.f32 0.01, %v4473_v11  ;;  %v5821_v16 = vpop.f32.mrb[162].mxu0  ;;  %5902 = vmatmul.mubr.msk.f32.gmra.mrb[158].mxu1 %vm3231_vm1, %v4616_v20  ;;  %v1688_v32 = vadd.f32 %v10507_v25, %v10011_v42  ;;  %v10516_v25 = vld [vmem:[#allocation52_spill] sm:$0xff] }
 0xba9   :  { %v4476_v22 = vadd.f32 %v5821_v16, %v1646_v54  ;;  %v4308_v49 = vpop.f32.mrb[163].mxu0  ;;  %v4618_v47 = vsel %vm4522_vm5, %v4474_v38, %v4570_v55 }
 0xbaa   :  { %v4475_v60 = vadd.f32 %v4308_v49, %v1640_v35  ;;  %v4617_v50 = vsel %vm4521_vm6, %v4473_v11, %v4569_v43  ;;  %v1706_v35 = vadd.f32 %v10508_v17, %v10011_v42 }
 0xbab   :  { %v4572_v15 = vmul.f32 0.01, %v4476_v22  ;;  %5904 = vmatprep.mubr.msk.f32.mxu1 %vm3231_vm1, %v4617_v50  ;;  %vm4524_vm8 = vcmp.gt.f32.partialorder %v4476_v22, 0.0 }
 0xbac   :  { %vm4523_vm9 = vcmp.gt.f32.partialorder %v4475_v60, 0.0  ;;  %v4571_v14 = vmul.f32 0.01, %v4475_v60  ;;  %v5824_v41 = vpop.f32.mrb[164].mxu0  ;;  %5905 = vmatmul.mubr.msk.f32.gmra.mrb[160].mxu1 %vm3231_vm1, %v4618_v47 }
 0xbad   :  { %v4478_v59 = vadd.f32 %v5824_v41, %v1658_v58  ;;  %v4318_v39 = vpop.f32.mrb[165].mxu0  ;;  %v4620_v24 = vsel %vm4524_vm8, %v4476_v22, %v4572_v15  ;;  %v10509_v22 = vld [vmem:[#allocation35_spill] sm:$0xff] }
 0xbae   :  { %v4477_v40 = vadd.f32 %v4318_v39, %v1652_v57  ;;  %v4619_v30 = vsel %vm4523_vm9, %v4475_v60, %v4571_v14  ;;  %v1700_v49 = vadd.f32 %v10509_v22, %v10011_v42  ;;  %v1718_v57 = vadd.f32 %v10510_v33, %v10011_v42 }
 0xbaf   :  { %v4574_v13 = vmul.f32 0.01, %v4478_v59  ;;  %5907 = vmatprep.mubr.msk.f32.mxu1 %vm3231_vm1, %v4619_v30  ;;  %vm4526_vm10 = vcmp.gt.f32.partialorder %v4478_v59, 0.0 }
 0xbb0   :  { %vm4525_vm11 = vcmp.gt.f32.partialorder %v4477_v40, 0.0  ;;  %v4573_v36 = vmul.f32 0.01, %v4477_v40  ;;  %v5827_v19 = vpop.f32.mrb[166].mxu0  ;;  %5908 = vmatmul.mubr.msk.f32.gmra.mrb[162].mxu1 %vm3231_vm1, %v4620_v24 }
 0xbb1   :  { %v4480_v61 = vadd.f32 %v5827_v19, %v1670_v51  ;;  %v4328_v0 = vpop.f32.mrb[167].mxu0  ;;  %v4622_v31 = vsel %vm4526_vm10, %v4478_v59, %v4574_v13  ;;  %v10511_v59 = vld [vmem:[#allocation40_spill] sm:$0xff] }
 0xbb2   :  { %v4479_v21 = vadd.f32 %v4328_v0, %v1664_v27  ;;  %v4621_v26 = vsel %vm4525_vm11, %v4477_v40, %v4573_v36  ;;  %v1712_v39 = vadd.f32 %v10511_v59, %v10011_v42  ;;  %v1730_v27 = vadd.f32 %v10512_v23, %v10011_v42 }
 0xbb3   :  { %v4576_v48 = vmul.f32 0.01, %v4480_v61  ;;  %5910 = vmatprep.mubr.msk.f32.mxu1 %vm3231_vm1, %v4621_v26  ;;  %vm4528_vm12 = vcmp.gt.f32.partialorder %v4480_v61, 0.0 }
 0xbb4   :  { %vm4527_vm13 = vcmp.gt.f32.partialorder %v4479_v21, 0.0  ;;  %v4575_v5 = vmul.f32 0.01, %v4479_v21  ;;  %v5830_v34 = vpop.f32.mrb[168].mxu0  ;;  %5911 = vmatmul.mubr.msk.f32.gmra.mrb[164].mxu1 %vm3231_vm1, %v4622_v31 }
 0xbb5   :  { %v4482_v63 = vadd.f32 %v5830_v34, %v1682_v18  ;;  %v4338_v10 = vpop.f32.mrb[169].mxu0  ;;  %v4624_v38 = vsel %vm4528_vm12, %v4480_v61, %v4576_v48  ;;  %v10513_v61 = vld [vmem:[#allocation42_spill] sm:$0xff] }
 0xbb6   :  { %v4481_v56 = vadd.f32 %v4338_v10, %v1676_v12  ;;  %v4623_v29 = vsel %vm4527_vm13, %v4479_v21, %v4575_v5  ;;  %v1724_v0 = vadd.f32 %v10513_v61, %v10011_v42  ;;  %v1742_v12 = vadd.f32 %v10514_v4, %v10011_v42  ;;  %v10519_v61 = vld [vmem:[#allocation54_spill] sm:$0xff] }
 0xbb7   :  { %v4578_v53 = vmul.f32 0.01, %v4482_v63  ;;  %5913 = vmatprep.mubr.msk.f32.mxu1 %vm3231_vm1, %v4623_v29  ;;  %vm4530_vm14 = vcmp.gt.f32.partialorder %v4482_v63, 0.0 }
 0xbb8   :  { %vm4529_vm15 = vcmp.gt.f32.partialorder %v4481_v56, 0.0  ;;  %v4577_v11 = vmul.f32 0.01, %v4481_v56  ;;  %v5833_v44 = vpop.f32.mrb[170].mxu0  ;;  %5914 = vmatmul.mubr.msk.f32.gmra.mrb[166].mxu1 %vm3231_vm1, %v4624_v38 }
 0xbb9   :  { %v4484_v8 = vadd.f32 %v5833_v44, %v1694_v7  ;;  %v4348_v54 = vpop.f32.mrb[171].mxu0  ;;  %v4626_v16 = vsel %vm4530_vm14, %v4482_v63, %v4578_v53  ;;  %v10515_v63 = vld [vmem:[#allocation46_spill] sm:$0xff] }
 0xbba   :  { %v4483_v55 = vadd.f32 %v4348_v54, %v1688_v32  ;;  %v4625_v20 = vsel %vm4529_vm15, %v4481_v56, %v4577_v11  ;;  %v1736_v10 = vadd.f32 %v10515_v63, %v10011_v42  ;;  %v1754_v32 = vadd.f32 %v10516_v25, %v10011_v42 }
 0xbbb   :  { %v4580_v43 = vmul.f32 0.01, %v4484_v8  ;;  %5916 = vmatprep.mubr.msk.f32.mxu1 %vm3231_vm1, %v4625_v20  ;;  %vm4532_vm4 = vcmp.gt.f32.partialorder %v4484_v8, 0.0 }
 0xbbc   :  { %vm4531_vm7 = vcmp.gt.f32.partialorder %v4483_v55, 0.0  ;;  %v4579_v60 = vmul.f32 0.01, %v4483_v55  ;;  %v5836_v50 = vpop.f32.mrb[172].mxu0  ;;  %5917 = vmatmul.mubr.msk.f32.gmra.mrb[168].mxu1 %vm3231_vm1, %v4626_v16 }
 0xbbd   :  { %v4486_v1 = vadd.f32 %v5836_v50, %v1706_v35  ;;  %v4358_v58 = vpop.f32.mrb[173].mxu0  ;;  %v4628_v41 = vsel %vm4532_vm4, %v4484_v8, %v4580_v43  ;;  %v10517_v8 = vld [vmem:[#allocation50_spill] sm:$0xff] }
 0xbbe   :  { %v4485_v15 = vadd.f32 %v4358_v58, %v1700_v49  ;;  %v4627_v47 = vsel %vm4531_vm7, %v4483_v55, %v4579_v60  ;;  %v1748_v54 = vadd.f32 %v10517_v8, %v10011_v42 }
 0xbbf   :  { %v4582_v14 = vmul.f32 0.01, %v4486_v1  ;;  %5919 = vmatprep.mubr.msk.f32.mxu1 %vm3231_vm1, %v4627_v47  ;;  %vm4534_vm2 = vcmp.gt.f32.partialorder %v4486_v1, 0.0 }
 0xbc0   :  { %vm4533_vm3 = vcmp.gt.f32.partialorder %v4485_v15, 0.0  ;;  %v4581_v40 = vmul.f32 0.01, %v4485_v15  ;;  %v5839_v30 = vpop.f32.mrb[174].mxu0  ;;  %5920 = vmatmul.mubr.msk.f32.gmra.mrb[170].mxu1 %vm3231_vm1, %v4628_v41 }
 0xbc1   :  { %v4488_v46 = vadd.f32 %v5839_v30, %v1718_v57  ;;  %v4368_v51 = vpop.f32.mrb[175].mxu0  ;;  %v4630_v19 = vsel %vm4534_vm2, %v4486_v1, %v4582_v14 }
 0xbc2   :  { %v4487_v13 = vadd.f32 %v4368_v51, %v1712_v39  ;;  %v4629_v24 = vsel %vm4533_vm3, %v4485_v15, %v4581_v40 }
 0xbc3   :  { %v4584_v36 = vmul.f32 0.01, %v4488_v46  ;;  %5922 = vmatprep.mubr.msk.f32.mxu1 %vm3231_vm1, %v4629_v24  ;;  %vm4536_vm5 = vcmp.gt.f32.partialorder %v4488_v46, 0.0 }
 0xbc4   :  { %vm4535_vm6 = vcmp.gt.f32.partialorder %v4487_v13, 0.0  ;;  %v4583_v21 = vmul.f32 0.01, %v4487_v13  ;;  %v5842_v26 = vpop.f32.mrb[176].mxu0  ;;  %5923 = vmatmul.mubr.msk.f32.gmra.mrb[172].mxu1 %vm3231_vm1, %v4630_v19 }
 0xbc5   :  { %v4490_v62 = vadd.f32 %v5842_v26, %v1730_v27  ;;  %v4378_v18 = vpop.f32.mrb[177].mxu0  ;;  %v4632_v34 = vsel %vm4536_vm5, %v4488_v46, %v4584_v36 }
 0xbc6   :  { %v4489_v48 = vadd.f32 %v4378_v18, %v1724_v0  ;;  %v4631_v31 = vsel %vm4535_vm6, %v4487_v13, %v4583_v21  ;;  %v1760_v0 = vadd.f32 %v10519_v61, %v10011_v42 }
 0xbc7   :  { %v4586_v5 = vmul.f32 0.01, %v4490_v62  ;;  %5925 = vmatprep.mubr.msk.f32.mxu1 %vm3231_vm1, %v4631_v31  ;;  %vm4538_vm8 = vcmp.gt.f32.partialorder %v4490_v62, 0.0  ;;  %v10152_v31 = vld [vmem:[%s10249_s11] ss:$0 sm:$0xff]  ;;  %s6323_s11 = smov [#allocation2]  }
 0xbc8   :  { %vm4537_vm9 = vcmp.gt.f32.partialorder %v4489_v48, 0.0  ;;  %v4585_v56 = vmul.f32 0.01, %v4489_v48  ;;  %v5845_v29 = vpop.f32.mrb[178].mxu0  ;;  %5926 = vmatmul.mubr.msk.f32.gmra.mrb[174].mxu1 %vm3231_vm1, %v4632_v34  ;;  %s5166_s25 = sshll.u32 %s6323_s11, 4  ;;  %s5167_s25 = int_to_ptr.vmem [resolvable:$true] %s5166_s25 }
 0xbc9   :  { %v4492_v45 = vadd.f32 %v5845_v29, %v1742_v12  ;;  %v4388_v7 = vpop.f32.mrb[179].mxu0  ;;  %v4634_v44 = vsel %vm4538_vm8, %v4490_v62, %v4586_v5  ;;  %s6292_s26 = scalar_lea.vmem %s5167_s25, 6144  ;;  %p6297_p1 = scmp.lt.s32.totalorder %s5167_s25, %s5167_s25 }
 0xbca   :  { %v4491_v53 = vadd.f32 %v4388_v7, %v1736_v10  ;;  %v4633_v38 = vsel %vm4537_vm9, %v4489_v48, %v4585_v56  ;;  %p6293_p0 = scmp.ne.s32.totalorder %s5167_s25, %s6292_s26  ;;  %p6298_p2 = scmp.lt.s32.totalorder %s6292_s26, %s6292_s26 }
 0xbcb   :  { %v4588_v11 = vmul.f32 0.01, %v4492_v45  ;;  %5928 = vmatprep.mubr.msk.f32.mxu1 %vm3231_vm1, %v4633_v38  ;;  %vm4540_vm10 = vcmp.gt.f32.partialorder %v4492_v45, 0.0 }
 0xbcc   :  { %vm4539_vm11 = vcmp.gt.f32.partialorder %v4491_v53, 0.0  ;;  %v4587_v55 = vmul.f32 0.01, %v4491_v53  ;;  %v5848_v20 = vpop.f32.mrb[180].mxu0  ;;  %5929 = vmatmul.mubr.msk.f32.gmra.mrb[176].mxu1 %vm3231_vm1, %v4634_v44  ;;  %p6299_p3 = por %p6298_p2, %p6297_p1 }
 0xbcd   :  { %v4494_v17 = vadd.f32 %v5848_v20, %v1754_v32  ;;  %v4398_v35 = vpop.f32.mrb[181].mxu0  ;;  %v4636_v60 = vsel %vm4540_vm10, %v4492_v45, %v4588_v11 }
 0xbce   :  { %v4493_v43 = vadd.f32 %v4398_v35, %v1748_v54  ;;  %v3845_v16 = vpop.permute.xlu1 %3844  ;;  %v4635_v22 = vsel %vm4539_vm11, %v4491_v53, %v4587_v55  ;;  %p6300_p4 = pnand %p6299_p3, %p6293_p0 }
 0xbcf   :  { %v4590_v49 = vmul.f32 0.01, %v4494_v17  ;;  %6228 = vrcp.f32 %v3845_v16  ;;  %5931 = vmatprep.mubr.msk.f32.mxu1 %vm3231_vm1, %v4635_v22  ;;  %vm4542_vm12 = vcmp.gt.f32.partialorder %v4494_v17, 0.0 }
 0xbd0   :  { %vm4541_vm13 = vcmp.gt.f32.partialorder %v4493_v43, 0.0  ;;  %v4589_v50 = vmul.f32 0.01, %v4493_v43  ;;  %5932 = vmatmul.mubr.msk.f32.gmra.mrb[178].mxu1 %vm3231_vm1, %v4636_v60 }
 0xbd1   :  { %v4638_v15 = vsel %vm4542_vm12, %v4494_v17, %v4590_v49 }
 0xbd2   :  { %v3847_v1 = vpop.permute.xlu0 %3846  ;;  %v4637_v58 = vsel %vm4541_vm13, %v4493_v43, %v4589_v50 }
 0xbd3   :  { %6230 = vrcp.f32 %v3847_v1  ;;  %5934 = vmatprep.mubr.msk.f32.mxu1 %vm3231_vm1, %v4637_v58 }
 0xbd4   :  { %5935 = vmatmul.mubr.msk.f32.gmra.mrb[180].mxu1 %vm3231_vm1, %v4638_v15 }
 0xbd6   :  { %v3849_v47 = vpop.permute.xlu1 %3848 }
 0xbd7   :  { %6232 = vrcp.f32 %v3849_v47 }
 0xbd9   :  { %v6229_v33 = vpop.eup %6228 }
 0xbda   :  { %v3851_v57 = vpop.permute.xlu0 %3850  ;;  %v3989_v14 = vmul.f32 %v6229_v33, %v9974_v6 }
 0xbdb   :  { %6234 = vrcp.f32 %v3851_v57 }
 0xbdc   :  { %5853 = vmatmul.mubr.msk.f32.gmra.mrb[184].mxu0 %vm4003_vm0, %v3989_v14 }
 0xbdd   :  { %v6231_v41 = vpop.eup %6230 }
 0xbde   :  { %v3853_v59 = vpop.permute.xlu1 %3852  ;;  %v3991_v39 = vmul.f32 %v6231_v41, %v9978_v3 }
 0xbdf   :  { %6236 = vrcp.f32 %v3853_v59 }
 0xbe0   :  { %5855 = vmatprep.mubr.msk.f32.mxu0 %vm4003_vm0, %v3991_v39 }
 0xbe1   :  { %v6233_v40 = vpop.eup %6232 }
 0xbe2   :  { %v3993_v30 = vmul.f32 %v6233_v40, %v9983_v37 }
 0xbe4   :  { %5856 = vmatmul.mubr.msk.f32.gmra.mrb[186].mxu0 %vm4003_vm0, %v3993_v30  ;;  %v3855_v46 = vpop.permute.xlu0 %3854 }
 0xbe5   :  { %v6235_v51 = vpop.eup %6234  ;;  %6238 = vrcp.f32 %v3855_v46 }
 0xbe6   :  { %v3995_v6 = vmul.f32 %v6235_v51, %v9989_v52  ;;  %v10518_v52 = vld [vmem:[#allocation56_spill] sm:$0xff] }
 0xbe7   :  { %v1766_v19 = vadd.f32 %v10518_v52, %v10011_v42 }
 0xbe8   :  { %5858 = vmatprep.mubr.msk.f32.mxu0 %vm4003_vm0, %v3995_v6 }
 0xbe9   :  { %v6237_v13 = vpop.eup %6236  ;;  %v3857_v24 = vpop.permute.xlu1 %3856 }
 0xbea   :  { %6240 = vrcp.f32 %v3857_v24  ;;  %v3997_v3 = vmul.f32 %v6237_v13, %v9994_v2 }
 0xbec   :  { %5859 = vmatmul.mubr.msk.f32.gmra.mrb[188].mxu0 %vm4003_vm0, %v3997_v3 }
 0xbef   :  { %v6239_v23 = vpop.eup %6238 }
 0xbf0   :  { %v3999_v27 = vmul.f32 %v6239_v23, %v9998_v28 }
 0xbf2   :  { %5861 = vmatprep.mubr.msk.f32.mxu0 %vm4003_vm0, %v3999_v27 }
 0xbf4   :  { %v6241_v37 = vpop.eup %6240 }
 0xbf5   :  { %v4001_v36 = vmul.f32 %v6241_v37, %v10002_v9 }
 0xbf7   :  { %5862 = vmatmul.mubr.msk.f32.gmra.mrb[190].mxu0 %vm4003_vm0, %v4001_v36 }
 0xc3b   :  { %v5851_v21 = vpop.f32.mrb[182].mxu0 }
 0xc3c   :  { %v4496_v2 = vadd.f32 %v5851_v21, %v1766_v19  ;;  %v4408_v26 = vpop.f32.mrb[183].mxu0 }
 0xc3d   :  { %v4495_v62 = vadd.f32 %v4408_v26, %v1760_v0 }
 0xc3e   :  { %v4592_v18 = vmul.f32 0.01, %v4496_v2  ;;  %vm4544_vm14 = vcmp.gt.f32.partialorder %v4496_v2, 0.0 }
 0xc3f   :  { %vm4543_vm15 = vcmp.gt.f32.partialorder %v4495_v62, 0.0  ;;  %v4591_v28 = vmul.f32 0.01, %v4495_v62 }
 0xc40   :  { %v4640_v9 = vsel %vm4544_vm14, %v4496_v2, %v4592_v18 }
 0xc41   :  { %v4639_v48 = vsel %vm4543_vm15, %v4495_v62, %v4591_v28 }
 0xc42   :  { %5937 = vmatprep.mubr.msk.f32.mxu1 %vm3231_vm1, %v4639_v48 }
 0xc43   :  { %5938 = vmatmul.mubr.msk.f32.gmra.mrb[182].mxu1 %vm3231_vm1, %v4640_v9 }
 0xc5f   :  { %v5882_v4 = vpop.f32.mrb[144].mxu1 }
 0xc60   :  { %v4880_v12 = vadd.f32 %v5882_v4, %v10152_v31  ;;  %v4874_v5 = vpop.f32.mrb[145].mxu1 }
 0xc61   :  { %v4875_v34 = vadd.f32 %v10152_v31, %v4874_v5 }
 0xc62   :  { %5114 = vst [vmem:[#allocation2 + $0x8] sm:$0xff] %v4880_v12 }
 0xc63   :  { %5113 = vst [vmem:[#allocation2] sm:$0xff] %v4875_v34  ;;  %v5885_v63 = vpop.f32.mrb[146].mxu1 }
 0xc64   :  { %v4890_v10 = vadd.f32 %v5885_v63, %v10152_v31  ;;  %v4884_v56 = vpop.f32.mrb[147].mxu1 }
 0xc65   :  { %v4885_v29 = vadd.f32 %v10152_v31, %v4884_v56 }
 0xc66   :  { %5116 = vst [vmem:[#allocation2 + $0x18] sm:$0xff] %v4890_v10 }
 0xc67   :  { %5115 = vst [vmem:[#allocation2 + $0x10] sm:$0xff] %v4885_v29  ;;  %v5888_v45 = vpop.f32.mrb[148].mxu1 }
 0xc68   :  { %v4900_v7 = vadd.f32 %v5888_v45, %v10152_v31  ;;  %v4894_v53 = vpop.f32.mrb[149].mxu1 }
 0xc69   :  { %v4895_v38 = vadd.f32 %v10152_v31, %v4894_v53 }
 0xc6a   :  { %5118 = vst [vmem:[#allocation2 + $0x28] sm:$0xff] %v4900_v7 }
 0xc6b   :  { %5117 = vst [vmem:[#allocation2 + $0x20] sm:$0xff] %v4895_v38  ;;  %v5891_v25 = vpop.f32.mrb[150].mxu1 }
 0xc6c   :  { %v4910_v32 = vadd.f32 %v5891_v25, %v10152_v31  ;;  %v4904_v11 = vpop.f32.mrb[151].mxu1 }
 0xc6d   :  { %v4905_v44 = vadd.f32 %v10152_v31, %v4904_v11  ;;  %v10520_v11 = vld [vmem:[#allocation60_spill] sm:$0xff] }
 0xc6e   :  { %5120 = vst [vmem:[#allocation2 + $0x38] sm:$0xff] %v4910_v32 }
 0xc6f   :  { %5119 = vst [vmem:[#allocation2 + $0x30] sm:$0xff] %v4905_v44  ;;  %v5894_v8 = vpop.f32.mrb[152].mxu1  ;;  %v1778_v44 = vadd.f32 %v10520_v11, %v10011_v42 }
 0xc70   :  { %v4920_v54 = vadd.f32 %v5894_v8, %v10152_v31  ;;  %v4914_v55 = vpop.f32.mrb[153].mxu1  ;;  %v10521_v8 = vld [vmem:[#allocation58_spill] sm:$0xff] }
 0xc71   :  { %v4915_v20 = vadd.f32 %v10152_v31, %v4914_v55 }
 0xc72   :  { %5122 = vst [vmem:[#allocation2 + $0x48] sm:$0xff] %v4920_v54  ;;  %v1772_v54 = vadd.f32 %v10521_v8, %v10011_v42 }
 0xc73   :  { %5121 = vst [vmem:[#allocation2 + $0x40] sm:$0xff] %v4915_v20  ;;  %v5897_v17 = vpop.f32.mrb[154].mxu1 }
 0xc74   :  { %v4930_v35 = vadd.f32 %v5897_v17, %v10152_v31  ;;  %v4924_v43 = vpop.f32.mrb[155].mxu1 }
 0xc75   :  { %v4925_v16 = vadd.f32 %v10152_v31, %v4924_v43 }
 0xc76   :  { %5124 = vst [vmem:[#allocation2 + $0x58] sm:$0xff] %v4930_v35 }
 0xc77   :  { %5123 = vst [vmem:[#allocation2 + $0x50] sm:$0xff] %v4925_v16  ;;  %v5900_v22 = vpop.f32.mrb[156].mxu1 }
 0xc78   :  { %v4940_v49 = vadd.f32 %v5900_v22, %v10152_v31  ;;  %v4934_v60 = vpop.f32.mrb[157].mxu1 }
 0xc79   :  { %v4935_v50 = vadd.f32 %v10152_v31, %v4934_v60 }
 0xc7a   :  { %5126 = vst [vmem:[#allocation2 + $0x68] sm:$0xff] %v4940_v49  ;;  %v10522_v49 = vld [vmem:[#allocation64_spill] sm:$0xff] }
 0xc7b   :  { %5125 = vst [vmem:[#allocation2 + $0x60] sm:$0xff] %v4935_v50  ;;  %v5903_v1 = vpop.f32.mrb[158].mxu1  ;;  %v1790_v60 = vadd.f32 %v10522_v49, %v10011_v42 }
 0xc7c   :  { %v4950_v58 = vadd.f32 %v5903_v1, %v10152_v31  ;;  %v4944_v15 = vpop.f32.mrb[159].mxu1  ;;  %v10523_v1 = vld [vmem:[#allocation62_spill] sm:$0xff] }
 0xc7d   :  { %v4945_v47 = vadd.f32 %v10152_v31, %v4944_v15 }
 0xc7e   :  { %5128 = vst [vmem:[#allocation2 + $0x78] sm:$0xff] %v4950_v58  ;;  %v1784_v58 = vadd.f32 %v10523_v1, %v10011_v42 }
 0xc7f   :  { %5127 = vst [vmem:[#allocation2 + $0x70] sm:$0xff] %v4945_v47  ;;  %v5906_v33 = vpop.f32.mrb[160].mxu1 }
 0xc80   :  { %v4960_v57 = vadd.f32 %v5906_v33, %v10152_v31  ;;  %v4954_v14 = vpop.f32.mrb[161].mxu1 }
 0xc81   :  { %v4955_v41 = vadd.f32 %v10152_v31, %v4954_v14 }
 0xc82   :  { %5130 = vst [vmem:[#allocation2 + $0x88] sm:$0xff] %v4960_v57 }
 0xc83   :  { %5129 = vst [vmem:[#allocation2 + $0x80] sm:$0xff] %v4955_v41  ;;  %v5909_v59 = vpop.f32.mrb[162].mxu1 }
 0xc84   :  { %v4970_v39 = vadd.f32 %v5909_v59, %v10152_v31  ;;  %v4964_v40 = vpop.f32.mrb[163].mxu1 }
 0xc85   :  { %v4965_v30 = vadd.f32 %v10152_v31, %v4964_v40 }
 0xc86   :  { %5132 = vst [vmem:[#allocation2 + $0x98] sm:$0xff] %v4970_v39  ;;  %v10524_v39 = vld [vmem:[#allocation68_spill] sm:$0xff] }
 0xc87   :  { %5131 = vst [vmem:[#allocation2 + $0x90] sm:$0xff] %v4965_v30  ;;  %v5912_v46 = vpop.f32.mrb[164].mxu1  ;;  %v1802_v40 = vadd.f32 %v10524_v39, %v10011_v42 }
 0xc88   :  { %v4980_v51 = vadd.f32 %v5912_v46, %v10152_v31  ;;  %v4974_v6 = vpop.f32.mrb[165].mxu1  ;;  %v10525_v46 = vld [vmem:[#allocation66_spill] sm:$0xff] }
 0xc89   :  { %v4975_v13 = vadd.f32 %v10152_v31, %v4974_v6 }
 0xc8a   :  { %5134 = vst [vmem:[#allocation2 + $0xa8] sm:$0xff] %v4980_v51  ;;  %v1796_v51 = vadd.f32 %v10525_v46, %v10011_v42 }
 0xc8b   :  { %5133 = vst [vmem:[#allocation2 + $0xa0] sm:$0xff] %v4975_v13  ;;  %v5915_v24 = vpop.f32.mrb[166].mxu1 }
 0xc8c   :  { %v4990_v3 = vadd.f32 %v5915_v24, %v10152_v31  ;;  %v4984_v23 = vpop.f32.mrb[167].mxu1 }
 0xc8d   :  { %v4985_v27 = vadd.f32 %v10152_v31, %v4984_v23 }
 0xc8e   :  { %5136 = vst [vmem:[#allocation2 + $0xb8] sm:$0xff] %v4990_v3 }
 0xc8f   :  { %5135 = vst [vmem:[#allocation2 + $0xb0] sm:$0xff] %v4985_v27  ;;  %v5918_v37 = vpop.f32.mrb[168].mxu1 }
 0xc90   :  { %v5000_v36 = vadd.f32 %v5918_v37, %v10152_v31  ;;  %v4994_v52 = vpop.f32.mrb[169].mxu1 }
 0xc91   :  { %v4995_v19 = vadd.f32 %v10152_v31, %v4994_v52  ;;  %v10526_v52 = vld [vmem:[#allocation72_spill] sm:$0xff] }
 0xc92   :  { %5138 = vst [vmem:[#allocation2 + $0xc8] sm:$0xff] %v5000_v36 }
 0xc93   :  { %5137 = vst [vmem:[#allocation2 + $0xc0] sm:$0xff] %v4995_v19  ;;  %v5921_v61 = vpop.f32.mrb[170].mxu1  ;;  %v1814_v19 = vadd.f32 %v10526_v52, %v10011_v42 }
 0xc94   :  { %v5010_v0 = vadd.f32 %v5921_v61, %v10152_v31  ;;  %v5004_v21 = vpop.f32.mrb[171].mxu1  ;;  %v10527_v61 = vld [vmem:[#allocation70_spill] sm:$0xff] }
 0xc95   :  { %v5005_v2 = vadd.f32 %v10152_v31, %v5004_v21 }
 0xc96   :  { %5140 = vst [vmem:[#allocation2 + $0xd8] sm:$0xff] %v5010_v0  ;;  %v1808_v0 = vadd.f32 %v10527_v61, %v10011_v42 }
 0xc97   :  { %5139 = vst [vmem:[#allocation2 + $0xd0] sm:$0xff] %v5005_v2  ;;  %v5924_v26 = vpop.f32.mrb[172].mxu1 }
 0xc98   :  { %v5020_v62 = vadd.f32 %v5924_v26, %v10152_v31  ;;  %v5014_v18 = vpop.f32.mrb[173].mxu1 }
 0xc99   :  { %v5015_v28 = vadd.f32 %v10152_v31, %v5014_v18 }
 0xc9a   :  { %5142 = vst [vmem:[#allocation2 + $0xe8] sm:$0xff] %v5020_v62 }
 0xc9b   :  { %5141 = vst [vmem:[#allocation2 + $0xe0] sm:$0xff] %v5015_v28  ;;  %v5927_v48 = vpop.f32.mrb[174].mxu1 }
 0xc9c   :  { %v5030_v9 = vadd.f32 %v5927_v48, %v10152_v31  ;;  %v5024_v4 = vpop.f32.mrb[175].mxu1 }
 0xc9d   :  { %v5025_v12 = vadd.f32 %v10152_v31, %v5024_v4 }
 0xc9e   :  { %5144 = vst [vmem:[#allocation2 + $0xf8] sm:$0xff] %v5030_v9 }
 0xc9f   :  { %5143 = vst [vmem:[#allocation2 + $0xf0] sm:$0xff] %v5025_v12  ;;  %v5930_v5 = vpop.f32.mrb[176].mxu1 }
 0xca0   :  { %v5040_v34 = vadd.f32 %v5930_v5, %v10152_v31  ;;  %v5034_v63 = vpop.f32.mrb[177].mxu1 }
 0xca1   :  { %v5035_v10 = vadd.f32 %v10152_v31, %v5034_v63 }
 0xca2   :  { %5146 = vst [vmem:[#allocation2 + $0x108] sm:$0xff] %v5040_v34 }
 0xca3   :  { %5145 = vst [vmem:[#allocation2 + $0x100] sm:$0xff] %v5035_v10  ;;  %v5933_v56 = vpop.f32.mrb[178].mxu1 }
 0xca4   :  { %v5050_v29 = vadd.f32 %v5933_v56, %v10152_v31  ;;  %v5044_v45 = vpop.f32.mrb[179].mxu1 }
 0xca5   :  { %v5045_v7 = vadd.f32 %v10152_v31, %v5044_v45 }
 0xca6   :  { %5148 = vst [vmem:[#allocation2 + $0x118] sm:$0xff] %v5050_v29 }
 0xca7   :  { %5147 = vst [vmem:[#allocation2 + $0x110] sm:$0xff] %v5045_v7  ;;  %v5936_v53 = vpop.f32.mrb[180].mxu1 }
 0xca8   :  { %v5060_v38 = vadd.f32 %v5936_v53, %v10152_v31  ;;  %v5054_v25 = vpop.f32.mrb[181].mxu1 }
 0xca9   :  { %v5055_v32 = vadd.f32 %v10152_v31, %v5054_v25 }
 0xcaa   :  { %5150 = vst [vmem:[#allocation2 + $0x128] sm:$0xff] %v5060_v38 }
 0xcab   :  { %5149 = vst [vmem:[#allocation2 + $0x120] sm:$0xff] %v5055_v32 }
 0xcaf   :  { %v5854_v55 = vpop.f32.mrb[184].mxu0 }
 0xcb0   :  { %v4498_v20 = vadd.f32 %v5854_v55, %v1778_v44  ;;  %v4418_v17 = vpop.f32.mrb[185].mxu0 }
 0xcb1   :  { %v4497_v35 = vadd.f32 %v4418_v17, %v1772_v54 }
 0xcb2   :  { %v4594_v43 = vmul.f32 0.01, %v4498_v20  ;;  %vm4546_vm0 = vcmp.gt.f32.partialorder %v4498_v20, 0.0 }
 0xcb3   :  { %vm4545_vm4 = vcmp.gt.f32.partialorder %v4497_v35, 0.0  ;;  %v4593_v16 = vmul.f32 0.01, %v4497_v35 }
 0xcb4   :  { %v4642_v50 = vsel %vm4546_vm0, %v4498_v20, %v4594_v43 }
 0xcb5   :  { %v4641_v22 = vsel %vm4545_vm4, %v4497_v35, %v4593_v16 }
 0xcb6   :  { %5940 = vmatprep.mubr.msk.f32.mxu1 %vm3231_vm1, %v4641_v22 }
 0xcb7   :  { %v5857_v15 = vpop.f32.mrb[186].mxu0  ;;  %5941 = vmatmul.mubr.msk.f32.gmra.mrb[184].mxu1 %vm3231_vm1, %v4642_v50 }
 0xcb8   :  { %v4500_v47 = vadd.f32 %v5857_v15, %v1790_v60  ;;  %v4428_v33 = vpop.f32.mrb[187].mxu0 }
 0xcb9   :  { %v4499_v57 = vadd.f32 %v4428_v33, %v1784_v58 }
 0xcba   :  { %v4596_v14 = vmul.f32 0.01, %v4500_v47  ;;  %vm4548_vm7 = vcmp.gt.f32.partialorder %v4500_v47, 0.0 }
 0xcbb   :  { %vm4547_vm2 = vcmp.gt.f32.partialorder %v4499_v57, 0.0  ;;  %v4595_v41 = vmul.f32 0.01, %v4499_v57 }
 0xcbc   :  { %v4644_v30 = vsel %vm4548_vm7, %v4500_v47, %v4596_v14 }
 0xcbd   :  { %v4643_v59 = vsel %vm4547_vm2, %v4499_v57, %v4595_v41 }
 0xcbe   :  { %5943 = vmatprep.mubr.msk.f32.mxu1 %vm3231_vm1, %v4643_v59 }
 0xcbf   :  { %v5860_v6 = vpop.f32.mrb[188].mxu0  ;;  %5944 = vmatmul.mubr.msk.f32.gmra.mrb[186].mxu1 %vm3231_vm1, %v4644_v30 }
 0xcc0   :  { %v4502_v13 = vadd.f32 %v5860_v6, %v1802_v40  ;;  %v4438_v24 = vpop.f32.mrb[189].mxu0 }
 0xcc1   :  { %v4501_v3 = vadd.f32 %v4438_v24, %v1796_v51 }
 0xcc2   :  { %v4598_v23 = vmul.f32 0.01, %v4502_v13  ;;  %vm4550_vm3 = vcmp.gt.f32.partialorder %v4502_v13, 0.0 }
 0xcc3   :  { %vm4549_vm5 = vcmp.gt.f32.partialorder %v4501_v3, 0.0  ;;  %v4597_v27 = vmul.f32 0.01, %v4501_v3 }
 0xcc4   :  { %v4646_v36 = vsel %vm4550_vm3, %v4502_v13, %v4598_v23 }
 0xcc5   :  { %v4645_v37 = vsel %vm4549_vm5, %v4501_v3, %v4597_v27 }
 0xcc6   :  { %5946 = vmatprep.mubr.msk.f32.mxu1 %vm3231_vm1, %v4645_v37 }
 0xcc7   :  { %5947 = vmatmul.mubr.msk.f32.gmra.mrb[188].mxu1 %vm3231_vm1, %v4646_v36 }
 0xcca   :  { %v5863_v21 = vpop.f32.mrb[190].mxu0 }
 0xccb   :  { %v4504_v2 = vadd.f32 %v5863_v21, %v1814_v19  ;;  %v4448_v26 = vpop.f32.mrb[191].mxu0 }
 0xccc   :  { %v4503_v62 = vadd.f32 %v4448_v26, %v1808_v0 }
 0xccd   :  { %v4600_v18 = vmul.f32 0.01, %v4504_v2  ;;  %vm4552_vm6 = vcmp.gt.f32.partialorder %v4504_v2, 0.0 }
 0xcce   :  { %vm4551_vm8 = vcmp.gt.f32.partialorder %v4503_v62, 0.0  ;;  %v4599_v28 = vmul.f32 0.01, %v4503_v62 }
 0xccf   :  { %v4648_v9 = vsel %vm4552_vm6, %v4504_v2, %v4600_v18 }
 0xcd0   :  { %v4647_v48 = vsel %vm4551_vm8, %v4503_v62, %v4599_v28 }
 0xcd1   :  { %5949 = vmatprep.mubr.msk.f32.mxu1 %vm3231_vm1, %v4647_v48 }
 0xcd2   :  { %5950 = vmatmul.mubr.msk.f32.gmra.mrb[190].mxu1 %vm3231_vm1, %v4648_v9 }
 0xd16   :  { %v5939_v4 = vpop.f32.mrb[182].mxu1 }
 0xd17   :  { %v5070_v12 = vadd.f32 %v5939_v4, %v10152_v31  ;;  %v5064_v5 = vpop.f32.mrb[183].mxu1 }
 0xd18   :  { %v5065_v42 = vadd.f32 %v10152_v31, %v5064_v5 }
 0xd19   :  { %5152 = vst [vmem:[#allocation2 + $0x138] sm:$0xff] %v5070_v12 }
 0xd1a   :  { %5151 = vst [vmem:[#allocation2 + $0x130] sm:$0xff] %v5065_v42 }
 0xd8a   :  { %v5942_v34 = vpop.f32.mrb[184].mxu1 }
 0xd8b   :  { %v5080_v63 = vadd.f32 %v5942_v34, %v10152_v31  ;;  %v5074_v10 = vpop.f32.mrb[185].mxu1 }
 0xd8c   :  { %v5075_v56 = vadd.f32 %v10152_v31, %v5074_v10 }
 0xd8d   :  { %5154 = vst [vmem:[#allocation2 + $0x148] sm:$0xff] %v5080_v63 }
 0xd8e   :  { %5153 = vst [vmem:[#allocation2 + $0x140] sm:$0xff] %v5075_v56 }
 0xd92   :  { %v5945_v29 = vpop.f32.mrb[186].mxu1 }
 0xd93   :  { %v5090_v45 = vadd.f32 %v5945_v29, %v10152_v31  ;;  %v5084_v7 = vpop.f32.mrb[187].mxu1 }
 0xd94   :  { %v5085_v53 = vadd.f32 %v10152_v31, %v5084_v7 }
 0xd95   :  { %5156 = vst [vmem:[#allocation2 + $0x158] sm:$0xff] %v5090_v45 }
 0xd96   :  { %5155 = vst [vmem:[#allocation2 + $0x150] sm:$0xff] %v5085_v53 }
 0xd9a   :  { %v5948_v38 = vpop.f32.mrb[188].mxu1 }
 0xd9b   :  { %v5100_v25 = vadd.f32 %v5948_v38, %v10152_v31  ;;  %v5094_v32 = vpop.f32.mrb[189].mxu1 }
 0xd9c   :  { %v5095_v11 = vadd.f32 %v10152_v31, %v5094_v32 }
 0xd9d   :  { %5158 = vst [vmem:[#allocation2 + $0x168] sm:$0xff] %v5100_v25 }
 0xd9e   :  { %5157 = vst [vmem:[#allocation2 + $0x160] sm:$0xff] %v5095_v11 }
 0xda5   :  { %v5951_v44 = vpop.f32.mrb[190].mxu1 }
 0xda6   :  { %v5110_v8 = vadd.f32 %v5951_v44, %v10152_v31  ;;  %v5104_v54 = vpop.f32.mrb[191].mxu1 }
 0xda7   :  { %v5105_v55 = vadd.f32 %v10152_v31, %v5104_v54 }
 0xda8   :  { %5160 = vst [vmem:[#allocation2 + $0x178] sm:$0xff] %v5110_v8 }
 0xda9   :  { %5159 = vst [vmem:[#allocation2 + $0x170] sm:$0xff] %v5105_v55 }
 0xdaa   :  { %6303 = shalt.err (!%p6300_p4)
}
 0xdab   :  { %s6304_s29 = scalar_lea.hbm %s10250_s12, 6144 }
 0xdac   :  { %p6305_p5 = scmp.ne.s32.totalorder %s10250_s12, %s6304_s29  ;;  %p6308_p6 = scmp.lt.u32.totalorder %s6304_s29, %s10250_s12 }
 0xdae   :  { %p6310_p7 = pnand %p6308_p6, %p6305_p5 }
 0xdb0   :  { %6313 = shalt.err (!%p6310_p7)
}
 0xdb1   :  { %s6324_s9 = smov 128   ;;  %s6325_s13 = smov 8  }
 0xdb2   :  { %5172 = dma.vmem_to_hbm [thread:$0]  %s5167_s25, 6144, %s10250_s12, [#allocation3], %s6324_s9, %s6324_s9, %s6325_s13  }
 0xdb3   :  { %6314 = dma.done.wait [#allocation3], 6144  }
 0xdb4   :  { %6315 = vsyncadd [#allocation3], 4294961152 }
 0xdb5   :  { %5176 = vsyncpa [#allocation3], 1 }

</bundles_post_ra>
